<compile_context>
chip_gen: v6e
topology: v6e:2x2x1
jax: 0.10.0
libtpu: 0.0.40
codegen_flags: <defaults>
</compile_context>

<pallas_src>
import functools

import jax
import jax.numpy as jnp
from jax import lax
from jax.experimental import pallas as pl
from jax.experimental.pallas import tpu as pltpu


COMPUTE_DTYPE = jnp.bfloat16    # MXU-native activations / weights
RESIDUAL_DTYPE = jnp.float32    # residual stream carried in f32 for parity

# Tile caps sized for v7x's 64 MiB VMEM with double buffering; v6e/v5e
# (128 MiB VMEM) can raise ROW/COL caps (e.g. 512/1024) for longer MXU bursts.
ROW_TILE_CAP = 256
COL_TILE_CANDIDATES = (512, 256, 128)
K_TILE_CANDIDATES = (512, 256)
MATMUL_VMEM_LIMIT = 48 * 1024 * 1024


def _row_tile(m):
    # Small-batch case: cover all rows so each weight matrix streams from HBM
    # exactly once.  Otherwise cap the tile (multiple of 128) -- tm never
    # silently becomes a huge full M; pl.cdiv handles the masked tail block.
    return m if m <= ROW_TILE_CAP else ROW_TILE_CAP


def _col_tile(n):
    for c in COL_TILE_CANDIDATES:
        if n % c == 0:
            return c
    return n          # tiny/irregular N: full dim (only hit by toy configs)


def _k_tile(k):
    # Contraction dim: the tile must divide K exactly (no padded tail).
    for c in K_TILE_CANDIDATES:
        if k % c == 0:
            return c
    return k


# --------------------------------------------------------------------------
# Fused LayerNorm + matmul (+ QuickGELU), LN cached across N tiles
# --------------------------------------------------------------------------

def _ln_matmul_kernel(x_ref, g_ref, b_ref, w_ref, bias_ref, o_ref, xn_ref,
                      *, eps, activation):
    # LayerNorm of the (tm, K) row tile is computed once (first N tile) and
    # cached in VMEM scratch; later N tiles (innermost "arbitrary" axis) reuse it.
    @pl.when(pl.program_id(1) == 0)
    def _():
        x = x_ref[...].astype(jnp.float32)
        mean = jnp.mean(x, axis=-1, keepdims=True)
        xc = x - mean
        var = jnp.mean(xc * xc, axis=-1, keepdims=True)
        xn = xc * lax.rsqrt(var + eps) * g_ref[...] + b_ref[...]
        xn_ref[...] = xn.astype(xn_ref.dtype)

    y = jnp.dot(xn_ref[...], w_ref[...], preferred_element_type=jnp.float32)
    y = y + bias_ref[...]
    if activation == "quick_gelu":              # CLIP QuickGELU: x * sigmoid(1.702 x)
        y = y * jax.nn.sigmoid(1.702 * y)
    o_ref[...] = y.astype(o_ref.dtype)


def pallas_ln_matmul(x, gamma, beta, w, bias, *, eps, activation=None,
                     out_dtype=COMPUTE_DTYPE):
    """y = act(LayerNorm(x) @ W + bias). x:(M,K), w:(K,N) bf16, bias:(1,N) f32."""
    M, K = x.shape
    K2, N = w.shape
    assert K == K2
    tm = _row_tile(M)
    tn = _col_tile(N)
    grid = (pl.cdiv(M, tm), N // tn)
    return pl.pallas_call(
        functools.partial(_ln_matmul_kernel, eps=eps, activation=activation),
        out_shape=jax.ShapeDtypeStruct((M, N), out_dtype),
        grid=grid,
        in_specs=[
            pl.BlockSpec((tm, K), lambda i, j: (i, 0)),
            pl.BlockSpec((1, K), lambda i, j: (0, 0)),
            pl.BlockSpec((1, K), lambda i, j: (0, 0)),
            pl.BlockSpec((K, tn), lambda i, j: (0, j)),
            pl.BlockSpec((1, tn), lambda i, j: (0, j)),
        ],
        out_specs=pl.BlockSpec((tm, tn), lambda i, j: (i, j)),
        scratch_shapes=[pltpu.VMEM((tm, K), COMPUTE_DTYPE)],
        compiler_params=pltpu.CompilerParams(
            dimension_semantics=("parallel", "arbitrary"),
            vmem_limit_bytes=MATMUL_VMEM_LIMIT),
    )(x, gamma, beta, w, bias)


# --------------------------------------------------------------------------
# K-tiled matmul with f32 accumulator; bias / activation / residual epilogue
# --------------------------------------------------------------------------

def _matmul_kernel(*refs, activation, has_residual):
    if has_residual:
        x_ref, w_ref, bias_ref, res_ref, o_ref, acc_ref = refs
    else:
        x_ref, w_ref, bias_ref, o_ref, acc_ref = refs
        res_ref = None

    @pl.when(pl.program_id(2) == 0)
    def _():
        acc_ref[...] = jnp.zeros_like(acc_ref)

    acc_ref[...] += jnp.dot(x_ref[...], w_ref[...],
                            preferred_element_type=jnp.float32)

    @pl.when(pl.program_id(2) == pl.num_programs(2) - 1)
    def _():
        y = acc_ref[...] + bias_ref[...]
        if activation == "quick_gelu":
            y = y * jax.nn.sigmoid(1.702 * y)
        if res_ref is not None:
            y = y + res_ref[...].astype(jnp.float32)
        o_ref[...] = y.astype(o_ref.dtype)


def pallas_matmul(x, w, bias, *, residual=None, activation=None,
                  out_dtype=COMPUTE_DTYPE):
    """y = act(x @ w + bias) [+ residual]. x:(M,K) bf16, w:(K,N) bf16, bias:(1,N) f32."""
    M, K = x.shape
    K2, N = w.shape
    assert K == K2
    tm = _row_tile(M)
    tn = _col_tile(N)
    tk = _k_tile(K)
    grid = (pl.cdiv(M, tm), N // tn, K // tk)

    in_specs = [
        pl.BlockSpec((tm, tk), lambda i, j, k: (i, k)),
        pl.BlockSpec((tk, tn), lambda i, j, k: (k, j)),
        pl.BlockSpec((1, tn), lambda i, j, k: (0, j)),
    ]
    args = [x, w, bias]
    if residual is not None:
        in_specs.append(pl.BlockSpec((tm, tn), lambda i, j, k: (i, j)))
        args.append(residual)

    return pl.pallas_call(
        functools.partial(_matmul_kernel, activation=activation,
                          has_residual=residual is not None),
        out_shape=jax.ShapeDtypeStruct((M, N), out_dtype),
        grid=grid,
        in_specs=in_specs,
        out_specs=pl.BlockSpec((tm, tn), lambda i, j, k: (i, j)),
        scratch_shapes=[pltpu.VMEM((tm, tn), jnp.float32)],
        compiler_params=pltpu.CompilerParams(
            dimension_semantics=("parallel", "parallel", "arbitrary"),
            vmem_limit_bytes=MATMUL_VMEM_LIMIT),
    )(*args)


# --------------------------------------------------------------------------
# Attention over lane-aligned head groups (grid = (batch, head_group))
# --------------------------------------------------------------------------

def _heads_per_group(num_heads, head_dim):
    """Smallest head count whose packed q|k|v slab (3*hg*D) is a multiple of
    128 lanes, so every attention block is lane-aligned; falls back to all
    heads in one group for tiny configs (3H < 128)."""
    for hg in range(1, num_heads + 1):
        if num_heads % hg == 0 and (3 * hg * head_dim) % 128 == 0:
            return hg
    return num_heads


def _attention_kernel(qkv_ref, o_ref, *, heads_per_group, head_dim):
    """Softmax attention on one (batch, head-group) block.

    Block layout is [q_h.. | k_h.. | v_h..] for the group's heads, so the q/k/v
    slabs start on 128-lane boundaries.  The attention scale is pre-folded into
    the q weights.  Only the group's few heads are unrolled (bounded live
    ranges); the group output is stored with a single lane-dense write.
    """
    hg, D = heads_per_group, head_dim
    hd = hg * D
    outs = []
    for h in range(hg):
        lo = h * D
        qh = qkv_ref[0, :, lo:lo + D]
        kh = qkv_ref[0, :, hd + lo:hd + lo + D]
        vh = qkv_ref[0, :, 2 * hd + lo:2 * hd + lo + D]
        s = lax.dot_general(qh, kh, (((1,), (1,)), ((), ())),
                            preferred_element_type=jnp.float32)        # (S, S)
        m = jnp.max(s, axis=-1, keepdims=True)
        p = jnp.exp(s - m)
        denom = jnp.sum(p, axis=-1, keepdims=True)                     # (S, 1)
        pv = jnp.dot(p.astype(vh.dtype), vh,
                     preferred_element_type=jnp.float32)               # (S, D)
        outs.append(pv * pl.reciprocal(denom, approx=True))
    out = outs[0] if hg == 1 else jnp.concatenate(outs, axis=-1)       # (S, hg*D)
    o_ref[0] = out.astype(o_ref.dtype)


def pallas_attention(qkv, *, num_heads, heads_per_group):
    """qkv:(B, S, 3H) in head-group layout -> (B, S, H) attention output."""
    B, S, H3 = qkv.shape
    H = H3 // 3
    D = H // num_heads
    hg = heads_per_group
    n_groups = num_heads // hg
    group_w = 3 * hg * D
    return pl.pallas_call(
        functools.partial(_attention_kernel, heads_per_group=hg, head_dim=D),
        out_shape=jax.ShapeDtypeStruct((B, S, H), COMPUTE_DTYPE),
        grid=(B, n_groups),
        in_specs=[pl.BlockSpec((1, S, group_w), lambda b, g: (b, 0, g))],
        out_specs=pl.BlockSpec((1, S, hg * D), lambda b, g: (b, 0, g)),
        compiler_params=pltpu.CompilerParams(
            dimension_semantics=("parallel", "parallel")),
    )(qkv)


# --------------------------------------------------------------------------
# Fused class-token concat + position embedding + pre-LayerNorm
# --------------------------------------------------------------------------

def _embed_ln_kernel(patch_ref, clspos_ref, pospatch_ref, g_ref, b_ref, o_ref, *, eps):
    cls_row = clspos_ref[...].astype(jnp.float32)                                # (1, H)
    patch_rows = patch_ref[0].astype(jnp.float32) + pospatch_ref[...].astype(jnp.float32)
    x = jnp.concatenate([cls_row, patch_rows], axis=0)                           # (S, H)
    mean = jnp.mean(x, axis=-1, keepdims=True)
    xc = x - mean
    var = jnp.mean(xc * xc, axis=-1, keepdims=True)
    xn = xc * lax.rsqrt(var + eps) * g_ref[...] + b_ref[...]
    o_ref[0] = xn.astype(o_ref.dtype)


def pallas_embed_ln(patch_embeds, cls_plus_pos, pos_patch, gamma, beta, *, eps):
    """[cls; patches] + pos_embed followed by pre-LayerNorm, one kernel per image."""
    B, n_patches, H = patch_embeds.shape
    S = n_patches + 1
    return pl.pallas_call(
        functools.partial(_embed_ln_kernel, eps=eps),
        out_shape=jax.ShapeDtypeStruct((B, S, H), RESIDUAL_DTYPE),
        grid=(B,),
        in_specs=[
            pl.BlockSpec((1, n_patches, H), lambda b: (b, 0, 0)),
            pl.BlockSpec((1, H), lambda b: (0, 0)),
            pl.BlockSpec((n_patches, H), lambda b: (0, 0)),
            pl.BlockSpec((1, H), lambda b: (0, 0)),
            pl.BlockSpec((1, H), lambda b: (0, 0)),
        ],
        out_specs=pl.BlockSpec((1, S, H), lambda b: (b, 0, 0)),
        compiler_params=pltpu.CompilerParams(dimension_semantics=("parallel",)),
    )(patch_embeds, cls_plus_pos, pos_patch, gamma, beta)


# --------------------------------------------------------------------------
# CLIP vision tower (synthetic small config with lane-dense dims)
# --------------------------------------------------------------------------

CFG = dict(
    image_size=32,
    patch_size=8,
    channels=3,
    hidden=256,
    heads=4,                  # head_dim = 64, like real CLIP
    intermediate=512,
    layers=3,
    select_layer=-2,          # args.mm_vision_select_layer
    select_feature="patch",   # default in module
    ln_eps=1e-5,
)


def _group_qkv_layout(q_w, k_w, v_w, q_b, k_b, v_b, num_heads, heads_per_group):
    """Interleave q/k/v columns per head-group: [q_h.. | k_h.. | v_h..] x groups."""
    H = q_w.shape[0]
    D = H // num_heads
    w_cols, b_cols = [], []
    for g in range(num_heads // heads_per_group):
        sl = slice(g * heads_per_group * D, (g + 1) * heads_per_group * D)
        w_cols += [q_w[:, sl], k_w[:, sl], v_w[:, sl]]
        b_cols += [q_b[sl], k_b[sl], v_b[sl]]
    return jnp.concatenate(w_cols, axis=1), jnp.concatenate(b_cols)


def init_params(key, cfg):
    H, C, P, I = cfg["hidden"], cfg["channels"], cfg["patch_size"], cfg["intermediate"]
    heads = cfg["heads"]
    D = H // heads
    scale = D ** -0.5
    hg = _heads_per_group(heads, D)
    S = (cfg["image_size"] // P) ** 2 + 1
    keys = iter(jax.random.split(key, 4 + 12 * cfg["layers"]))

    def nrm(shape, s=0.02):
        return s * jax.random.normal(next(keys), shape, dtype=jnp.float32)

    params = {
        "patch_embed_w": nrm((H, C, P, P)).astype(COMPUTE_DTYPE),  # Conv2d (out,in,kh,kw), no bias
        "class_embedding": nrm((H,)),
        "pos_embed": nrm((S, H)),
        "pre_ln_g": jnp.ones((1, H), jnp.float32),
        "pre_ln_b": jnp.zeros((1, H), jnp.float32),
        "layers": [],
    }
    for _ in range(cfg["layers"]):
        q_w, k_w, v_w = nrm((H, H)), nrm((H, H)), nrm((H, H))
        q_b, k_b, v_b = nrm((H,)), nrm((H,)), nrm((H,))
        # Fold the attention scale (head_dim**-0.5) into q, then lay out the
        # fused qkv projection per head-group so attention slabs are lane-aligned.
        qkv_w, qkv_b = _group_qkv_layout(q_w * scale, k_w, v_w,
                                         q_b * scale, k_b, v_b, heads, hg)
        params["layers"].append({
            "ln1_g": jnp.ones((1, H), jnp.float32), "ln1_b": jnp.zeros((1, H), jnp.float32),
            "qkv_w": qkv_w.astype(COMPUTE_DTYPE), "qkv_b": qkv_b.reshape(1, 3 * H),
            "o_w": nrm((H, H)).astype(COMPUTE_DTYPE), "o_b": nrm((H,)).reshape(1, H),
            "ln2_g": jnp.ones((1, H), jnp.float32), "ln2_b": jnp.zeros((1, H), jnp.float32),
            "fc1_w": nrm((H, I)).astype(COMPUTE_DTYPE), "fc1_b": nrm((I,)).reshape(1, I),
            "fc2_w": nrm((I, H)).astype(COMPUTE_DTYPE), "fc2_b": nrm((H,)).reshape(1, H),
        })
    return params


def _encoder_layer(x2d, lp, B, S, H, num_heads, heads_per_group, eps):
    """One CLIP pre-LN transformer layer. x2d:(B*S, H) f32 residual stream."""
    # fused LN1 + QKV projection (scale pre-folded, head-group column layout)
    qkv = pallas_ln_matmul(x2d, lp["ln1_g"], lp["ln1_b"],
                           lp["qkv_w"], lp["qkv_b"], eps=eps)             # (B*S, 3H)
    # attention on the packed qkv, head groups on a grid axis
    attn = pallas_attention(qkv.reshape(B, S, 3 * H), num_heads=num_heads,
                            heads_per_group=heads_per_group)
    attn2d = attn.reshape(B * S, H)
    # o-projection with the residual add fused into the epilogue (f32 residual)
    x2d = pallas_matmul(attn2d, lp["o_w"], lp["o_b"], residual=x2d,
                        out_dtype=RESIDUAL_DTYPE)
    # fused LN2 + fc1 + QuickGELU
    h1 = pallas_ln_matmul(x2d, lp["ln2_g"], lp["ln2_b"],
                          lp["fc1_w"], lp["fc1_b"], eps=eps, activation="quick_gelu")
    # fc2 with the residual add fused into the epilogue
    x2d = pallas_matmul(h1, lp["fc2_w"], lp["fc2_b"], residual=x2d,
                        out_dtype=RESIDUAL_DTYPE)
    return x2d


def clip_vision_tower_forward(params, images, cfg=CFG):
    """Equivalent of CLIPVisionTower.forward(images) for a batched tensor input."""
    B, C, Himg, Wimg = images.shape
    P = cfg["patch_size"]
    H = cfg["hidden"]
    gh, gw = Himg // P, Wimg // P
    n_patches = gh * gw
    S = n_patches + 1
    eps = cfg["ln_eps"]
    heads = cfg["heads"]
    hpg = _heads_per_group(heads, H // heads)

    x = images.astype(COMPUTE_DTYPE)

    # --- patch embedding: Conv2d(C, H, kernel=P, stride=P, bias=False) as tiled matmul ---
    patches = x.reshape(B, C, gh, P, gw, P).transpose(0, 2, 4, 1, 3, 5)
    patches = patches.reshape(B * n_patches, C * P * P)             # (c, kh, kw) flatten order
    w_patch = params["patch_embed_w"].reshape(H, C * P * P).T       # (C*P*P, H)
    zero_bias = jnp.zeros((1, H), jnp.float32)
    patch_embeds = pallas_matmul(patches, w_patch, zero_bias).reshape(B, n_patches, H)

    # --- class token + pos embedding + pre-LayerNorm fused (hidden_states[0]) ---
    cls_plus_pos = (params["class_embedding"] + params["pos_embed"][0]).reshape(1, H)
    pos_patch = params["pos_embed"][1:]
    h = pallas_embed_ln(patch_embeds, cls_plus_pos, pos_patch,
                        params["pre_ln_g"], params["pre_ln_b"], eps=eps)
    h = h.reshape(B * S, H)

    # --- only run the layers needed for hidden_states[select_layer] ---
    n_layers = len(params["layers"])
    sel = cfg["select_layer"]
    sel_idx = sel if sel >= 0 else (n_layers + 1) + sel   # index into hidden_states
    assert 0 <= sel_idx <= n_layers
    for lp in params["layers"][:sel_idx]:
        h = _encoder_layer(h, lp, B, S, H, heads, hpg, eps)

    selected = h.reshape(B, S, H)
    if cfg["select_feature"] == "patch":
        selected = selected[:, 1:]
    elif cfg["select_feature"] == "cls_patch":
        pass
    else:
        raise ValueError(f"Unexpected select feature: {cfg['select_feature']}")
    return selected.astype(images.dtype)

# TODO(synk): pretrained-checkpoint loading (CLIPVisionModel.from_pretrained) and
# CLIPImageProcessor preprocessing have no Pallas equivalent; params are synthetic.


if __name__ == "__main__":
    key = jax.random.PRNGKey(0)
    pkey, xkey = jax.random.split(key)
    params = init_params(pkey, CFG)
    images = jax.random.normal(
        xkey, (2, CFG["channels"], CFG["image_size"], CFG["image_size"]), dtype=jnp.float32
    )

    fwd = jax.jit(functools.partial(clip_vision_tower_forward, cfg=CFG))
    out = fwd(params, images)
    jax.block_until_ready(out)

    n_patches = (CFG["image_size"] // CFG["patch_size"]) ** 2
    assert out.shape == (2, n_patches, CFG["hidden"]), out.shape
    assert out.dtype == images.dtype
    assert bool(jnp.all(jnp.isfinite(out)))
    print("KERNEL_OK")
</pallas_src>

<mosaic_0001>
module attributes {stable_mosaic.version = 11 : i64} {
  func.func @_embed_ln_kernel(%arg0: i32, %arg1: memref<1x16x256xbf16, #tpu.memory_space<vmem>>, %arg2: memref<1x256xf32, #tpu.memory_space<vmem>>, %arg3: memref<16x256xf32, #tpu.memory_space<vmem>>, %arg4: memref<1x256xf32, #tpu.memory_space<vmem>>, %arg5: memref<1x256xf32, #tpu.memory_space<vmem>>, %arg6: memref<1x17x256xf32, #tpu.memory_space<vmem>>) attributes {dimension_semantics = [#tpu.dimension_semantics<parallel>], iteration_bounds = array<i64: 2>, scalar_prefetch = 0 : i64, scratch_operands = 0 : i64, tpu.core_type = #tpu.core_type<tc>, window_params = [{transform_indices = @transform_0, window_bounds = array<i64: 1, 16, 256>}, {pipeline_mode = #tpu.pipeline_mode<synchronous>, transform_indices = @transform_1, window_bounds = array<i64: 1, 256>}, {pipeline_mode = #tpu.pipeline_mode<synchronous>, transform_indices = @transform_2, window_bounds = array<i64: 16, 256>}, {pipeline_mode = #tpu.pipeline_mode<synchronous>, transform_indices = @transform_3, window_bounds = array<i64: 1, 256>}, {pipeline_mode = #tpu.pipeline_mode<synchronous>, transform_indices = @transform_4, window_bounds = array<i64: 1, 256>}, {transform_indices = @transform_5, window_bounds = array<i64: 1, 17, 256>}]} {
    %c0 = arith.constant 0 : index
    %c0_0 = arith.constant 0 : index
    %0 = vector.load %arg2[%c0, %c0_0] : memref<1x256xf32, #tpu.memory_space<vmem>>, vector<1x256xf32>
    %c0_1 = arith.constant 0 : index
    %c0_2 = arith.constant 0 : index
    %c0_3 = arith.constant 0 : index
    %1 = vector.load %arg1[%c0_1, %c0_2, %c0_3] : memref<1x16x256xbf16, #tpu.memory_space<vmem>>, vector<1x16x256xbf16>
    %2 = vector.shape_cast %1 : vector<1x16x256xbf16> to vector<16x256xbf16>
    %3 = arith.extf %2 : vector<16x256xbf16> to vector<16x256xf32>
    %c0_4 = arith.constant 0 : index
    %c0_5 = arith.constant 0 : index
    %4 = vector.load %arg3[%c0_4, %c0_5] : memref<16x256xf32, #tpu.memory_space<vmem>>, vector<16x256xf32>
    %5 = arith.addf %3, %4 : vector<16x256xf32>
    %6 = tpu.concatenate %0, %5 in 0 : vector<1x256xf32>, vector<16x256xf32> -> vector<17x256xf32>
    %cst = arith.constant dense<0.000000e+00> : vector<17xf32>
    %7 = vector.multi_reduction <add>, %6, %cst [1] : vector<17x256xf32> to vector<17xf32>
    %8 = vector.shape_cast %7 : vector<17xf32> to vector<17x1xf32>
    %cst_6 = arith.constant 2.560000e+02 : f32
    %9 = vector.broadcast %cst_6 : f32 to vector<17x1xf32>
    %10 = arith.divf %8, %9 : vector<17x1xf32>
    %11 = vector.broadcast %10 : vector<17x1xf32> to vector<17x256xf32>
    %12 = arith.subf %6, %11 : vector<17x256xf32>
    %13 = arith.mulf %12, %12 : vector<17x256xf32>
    %cst_7 = arith.constant dense<0.000000e+00> : vector<17xf32>
    %14 = vector.multi_reduction <add>, %13, %cst_7 [1] : vector<17x256xf32> to vector<17xf32>
    %15 = vector.shape_cast %14 : vector<17xf32> to vector<17x1xf32>
    %cst_8 = arith.constant 2.560000e+02 : f32
    %16 = vector.broadcast %cst_8 : f32 to vector<17x1xf32>
    %17 = arith.divf %15, %16 : vector<17x1xf32>
    %cst_9 = arith.constant 9.99999974E-6 : f32
    %18 = vector.broadcast %cst_9 : f32 to vector<17x1xf32>
    %19 = arith.addf %17, %18 : vector<17x1xf32>
    %20 = math.rsqrt %19 : vector<17x1xf32>
    %21 = vector.broadcast %20 : vector<17x1xf32> to vector<17x256xf32>
    %22 = arith.mulf %12, %21 : vector<17x256xf32>
    %c0_10 = arith.constant 0 : index
    %c0_11 = arith.constant 0 : index
    %23 = vector.load %arg4[%c0_10, %c0_11] : memref<1x256xf32, #tpu.memory_space<vmem>>, vector<1x256xf32>
    %24 = vector.broadcast %23 : vector<1x256xf32> to vector<17x256xf32>
    %25 = arith.mulf %22, %24 : vector<17x256xf32>
    %c0_12 = arith.constant 0 : index
    %c0_13 = arith.constant 0 : index
    %26 = vector.load %arg5[%c0_12, %c0_13] : memref<1x256xf32, #tpu.memory_space<vmem>>, vector<1x256xf32>
    %27 = vector.broadcast %26 : vector<1x256xf32> to vector<17x256xf32>
    %28 = arith.addf %25, %27 : vector<17x256xf32>
    %c0_14 = arith.constant 0 : index
    %c0_15 = arith.constant 0 : index
    %c0_16 = arith.constant 0 : index
    %29 = vector.load %arg6[%c0_14, %c0_15, %c0_16] : memref<1x17x256xf32, #tpu.memory_space<vmem>>, vector<1x17x256xf32>
    %30 = vector.shape_cast %29 : vector<1x17x256xf32> to vector<17x256xf32>
    %31 = vector.shape_cast %28 : vector<17x256xf32> to vector<1x17x256xf32>
    tpu.vector_store %arg6[%c0_14, %c0_15, %c0_16], %31 {strides = array<i32>} : memref<1x17x256xf32, #tpu.memory_space<vmem>>, vector<1x17x256xf32>,
    return
  }
  func.func @transform_0(%arg0: i32) -> (i32, i32, i32) {
    %c0_i32 = arith.constant 0 : i32
    %c0_i32_0 = arith.constant 0 : i32
    %c0_i32_1 = arith.constant 0 : i32
    return %arg0, %c0_i32, %c0_i32_0 : i32, i32, i32
  }
  func.func @transform_1(%arg0: i32) -> (i32, i32) {
    %c0_i32 = arith.constant 0 : i32
    %c0_i32_0 = arith.constant 0 : i32
    %c0_i32_1 = arith.constant 0 : i32
    return %c0_i32, %c0_i32_0 : i32, i32
  }
  func.func @transform_2(%arg0: i32) -> (i32, i32) {
    %c0_i32 = arith.constant 0 : i32
    %c0_i32_0 = arith.constant 0 : i32
    %c0_i32_1 = arith.constant 0 : i32
    return %c0_i32, %c0_i32_0 : i32, i32
  }
  func.func @transform_3(%arg0: i32) -> (i32, i32) {
    %c0_i32 = arith.constant 0 : i32
    %c0_i32_0 = arith.constant 0 : i32
    %c0_i32_1 = arith.constant 0 : i32
    return %c0_i32, %c0_i32_0 : i32, i32
  }
  func.func @transform_4(%arg0: i32) -> (i32, i32) {
    %c0_i32 = arith.constant 0 : i32
    %c0_i32_0 = arith.constant 0 : i32
    %c0_i32_1 = arith.constant 0 : i32
    return %c0_i32, %c0_i32_0 : i32, i32
  }
  func.func @transform_5(%arg0: i32) -> (i32, i32, i32) {
    %c0_i32 = arith.constant 0 : i32
    %c0_i32_0 = arith.constant 0 : i32
    %c0_i32_1 = arith.constant 0 : i32
    return %arg0, %c0_i32, %c0_i32_0 : i32, i32, i32
  }
}

module attributes {stable_mosaic.version = 11 : i64} {
  func.func @_matmul_kernel(%arg0: i32, %arg1: i32, %arg2: i32, %arg3: memref<32x192xbf16, #tpu.memory_space<vmem>>, %arg4: memref<192x256xbf16, #tpu.memory_space<vmem>>, %arg5: memref<1x256xf32, #tpu.memory_space<vmem>>, %arg6: memref<32x256xbf16, #tpu.memory_space<vmem>>, %arg7: memref<32x256xf32, #tpu.memory_space<vmem>>) attributes {dimension_semantics = [#tpu.dimension_semantics<parallel>, #tpu.dimension_semantics<parallel>, #tpu.dimension_semantics<arbitrary>], iteration_bounds = array<i64: 1, 1, 1>, scalar_prefetch = 0 : i64, scratch_operands = 1 : i64, tpu.core_type = #tpu.core_type<tc>, window_params = [{transform_indices = @transform_0, window_bounds = array<i64: 32, 192>}, {transform_indices = @transform_1, window_bounds = array<i64: 192, 256>}, {transform_indices = @transform_2, window_bounds = array<i64: 1, 256>}, {transform_indices = @transform_3, window_bounds = array<i64: 32, 256>}]} {
    %c0_i32 = arith.constant 0 : i32
    %0 = arith.cmpi eq, %arg2, %c0_i32 : i32
    %1 = arith.extui %0 : i1 to i32
    %c0_i32_0 = arith.constant 0 : i32
    %2 = arith.cmpi ne, %1, %c0_i32_0 : i32
    scf.if %2 {
      %cst_10 = arith.constant 0.000000e+00 : f32
      %12 = vector.broadcast %cst_10 : f32 to vector<32x256xf32>
      %c0_11 = arith.constant 0 : index
      %c0_12 = arith.constant 0 : index
      %13 = vector.load %arg7[%c0_11, %c0_12] : memref<32x256xf32, #tpu.memory_space<vmem>>, vector<32x256xf32>
      tpu.vector_store %arg7[%c0_11, %c0_12], %12 {strides = array<i32>} : memref<32x256xf32, #tpu.memory_space<vmem>>, vector<32x256xf32>,
    } else {
    }
    %c0 = arith.constant 0 : index
    %c0_1 = arith.constant 0 : index
    %3 = vector.load %arg7[%c0, %c0_1] : memref<32x256xf32, #tpu.memory_space<vmem>>, vector<32x256xf32>
    %c0_2 = arith.constant 0 : index
    %c0_3 = arith.constant 0 : index
    %4 = vector.load %arg3[%c0_2, %c0_3] : memref<32x192xbf16, #tpu.memory_space<vmem>>, vector<32x192xbf16>
    %c0_4 = arith.constant 0 : index
    %c0_5 = arith.constant 0 : index
    %5 = vector.load %arg4[%c0_4, %c0_5] : memref<192x256xbf16, #tpu.memory_space<vmem>>, vector<192x256xbf16>
    %cst = arith.constant dense<0.000000e+00> : vector<32x256xf32>
    %6 = tpu.matmul %4, %5, %cst {dimension_numbers = #tpu.dot_dimension_numbers<[1], [0], [0], [1], [0, 0, 1, 1], [], []>} : vector<32x192xbf16>, vector<192x256xbf16>, vector<32x256xf32> -> vector<32x256xf32>
    %7 = arith.addf %3, %6 : vector<32x256xf32>
    %c0_6 = arith.constant 0 : index
    %c0_7 = arith.constant 0 : index
    %8 = vector.load %arg7[%c0_6, %c0_7] : memref<32x256xf32, #tpu.memory_space<vmem>>, vector<32x256xf32>
    tpu.vector_store %arg7[%c0_6, %c0_7], %7 {strides = array<i32>} : memref<32x256xf32, #tpu.memory_space<vmem>>, vector<32x256xf32>,
    %c0_i32_8 = arith.constant 0 : i32
    %9 = arith.cmpi eq, %arg2, %c0_i32_8 : i32
    %10 = arith.extui %9 : i1 to i32
    %c0_i32_9 = arith.constant 0 : i32
    %11 = arith.cmpi ne, %10, %c0_i32_9 : i32
    scf.if %11 {
      %c0_10 = arith.constant 0 : index
      %c0_11 = arith.constant 0 : index
      %12 = vector.load %arg7[%c0_10, %c0_11] : memref<32x256xf32, #tpu.memory_space<vmem>>, vector<32x256xf32>
      %c0_12 = arith.constant 0 : index
      %c0_13 = arith.constant 0 : index
      %13 = vector.load %arg5[%c0_12, %c0_13] : memref<1x256xf32, #tpu.memory_space<vmem>>, vector<1x256xf32>
      %14 = vector.broadcast %13 : vector<1x256xf32> to vector<32x256xf32>
      %15 = arith.addf %12, %14 : vector<32x256xf32>
      %16 = arith.truncf %15 : vector<32x256xf32> to vector<32x256xbf16>
      %c0_14 = arith.constant 0 : index
      %c0_15 = arith.constant 0 : index
      %17 = vector.load %arg6[%c0_14, %c0_15] : memref<32x256xbf16, #tpu.memory_space<vmem>>, vector<32x256xbf16>
      tpu.vector_store %arg6[%c0_14, %c0_15], %16 {strides = array<i32>} : memref<32x256xbf16, #tpu.memory_space<vmem>>, vector<32x256xbf16>,
    } else {
    }
    return
  }
  func.func @transform_0(%arg0: i32, %arg1: i32, %arg2: i32) -> (i32, i32) {
    %c0_i32 = arith.constant 0 : i32
    return %arg0, %arg2 : i32, i32
  }
  func.func @transform_1(%arg0: i32, %arg1: i32, %arg2: i32) -> (i32, i32) {
    %c0_i32 = arith.constant 0 : i32
    return %arg2, %arg1 : i32, i32
  }
  func.func @transform_2(%arg0: i32, %arg1: i32, %arg2: i32) -> (i32, i32) {
    %c0_i32 = arith.constant 0 : i32
    %c0_i32_0 = arith.constant 0 : i32
    return %c0_i32, %arg1 : i32, i32
  }
  func.func @transform_3(%arg0: i32, %arg1: i32, %arg2: i32) -> (i32, i32) {
    %c0_i32 = arith.constant 0 : i32
    return %arg0, %arg1 : i32, i32
  }
}

module attributes {stable_mosaic.version = 11 : i64} {
  func.func @_ln_matmul_kernel(%arg0: i32, %arg1: i32, %arg2: memref<34x256xf32, #tpu.memory_space<vmem>>, %arg3: memref<1x256xf32, #tpu.memory_space<vmem>>, %arg4: memref<1x256xf32, #tpu.memory_space<vmem>>, %arg5: memref<256x256xbf16, #tpu.memory_space<vmem>>, %arg6: memref<1x256xf32, #tpu.memory_space<vmem>>, %arg7: memref<34x256xbf16, #tpu.memory_space<vmem>>, %arg8: memref<34x256xbf16, #tpu.memory_space<vmem>>) attributes {dimension_semantics = [#tpu.dimension_semantics<parallel>, #tpu.dimension_semantics<arbitrary>], iteration_bounds = array<i64: 1, 3>, scalar_prefetch = 0 : i64, scratch_operands = 1 : i64, tpu.core_type = #tpu.core_type<tc>, window_params = [{transform_indices = @transform_0, window_bounds = array<i64: 34, 256>}, {pipeline_mode = #tpu.pipeline_mode<synchronous>, transform_indices = @transform_1, window_bounds = array<i64: 1, 256>}, {pipeline_mode = #tpu.pipeline_mode<synchronous>, transform_indices = @transform_2, window_bounds = array<i64: 1, 256>}, {transform_indices = @transform_3, window_bounds = array<i64: 256, 256>}, {transform_indices = @transform_4, window_bounds = array<i64: 1, 256>}, {transform_indices = @transform_5, window_bounds = array<i64: 34, 256>}]} {
    %c0_i32 = arith.constant 0 : i32
    %0 = arith.cmpi eq, %arg1, %c0_i32 : i32
    %1 = arith.extui %0 : i1 to i32
    %c0_i32_0 = arith.constant 0 : i32
    %2 = arith.cmpi ne, %1, %c0_i32_0 : i32
    scf.if %2 {
      %c0_8 = arith.constant 0 : index
      %c0_9 = arith.constant 0 : index
      %11 = vector.load %arg2[%c0_8, %c0_9] : memref<34x256xf32, #tpu.memory_space<vmem>>, vector<34x256xf32>
      %cst_10 = arith.constant dense<0.000000e+00> : vector<34xf32>
      %12 = vector.multi_reduction <add>, %11, %cst_10 [1] : vector<34x256xf32> to vector<34xf32>
      %13 = vector.shape_cast %12 : vector<34xf32> to vector<34x1xf32>
      %cst_11 = arith.constant 2.560000e+02 : f32
      %14 = vector.broadcast %cst_11 : f32 to vector<34x1xf32>
      %15 = arith.divf %13, %14 : vector<34x1xf32>
      %16 = vector.broadcast %15 : vector<34x1xf32> to vector<34x256xf32>
      %17 = arith.subf %11, %16 : vector<34x256xf32>
      %18 = arith.mulf %17, %17 : vector<34x256xf32>
      %cst_12 = arith.constant dense<0.000000e+00> : vector<34xf32>
      %19 = vector.multi_reduction <add>, %18, %cst_12 [1] : vector<34x256xf32> to vector<34xf32>
      %20 = vector.shape_cast %19 : vector<34xf32> to vector<34x1xf32>
      %cst_13 = arith.constant 2.560000e+02 : f32
      %21 = vector.broadcast %cst_13 : f32 to vector<34x1xf32>
      %22 = arith.divf %20, %21 : vector<34x1xf32>
      %cst_14 = arith.constant 9.99999974E-6 : f32
      %23 = vector.broadcast %cst_14 : f32 to vector<34x1xf32>
      %24 = arith.addf %22, %23 : vector<34x1xf32>
      %25 = math.rsqrt %24 : vector<34x1xf32>
      %26 = vector.broadcast %25 : vector<34x1xf32> to vector<34x256xf32>
      %27 = arith.mulf %17, %26 : vector<34x256xf32>
      %c0_15 = arith.constant 0 : index
      %c0_16 = arith.constant 0 : index
      %28 = vector.load %arg3[%c0_15, %c0_16] : memref<1x256xf32, #tpu.memory_space<vmem>>, vector<1x256xf32>
      %29 = vector.broadcast %28 : vector<1x256xf32> to vector<34x256xf32>
      %30 = arith.mulf %27, %29 : vector<34x256xf32>
      %c0_17 = arith.constant 0 : index
      %c0_18 = arith.constant 0 : index
      %31 = vector.load %arg4[%c0_17, %c0_18] : memref<1x256xf32, #tpu.memory_space<vmem>>, vector<1x256xf32>
      %32 = vector.broadcast %31 : vector<1x256xf32> to vector<34x256xf32>
      %33 = arith.addf %30, %32 : vector<34x256xf32>
      %34 = arith.truncf %33 : vector<34x256xf32> to vector<34x256xbf16>
      %c0_19 = arith.constant 0 : index
      %c0_20 = arith.constant 0 : index
      %35 = vector.load %arg8[%c0_19, %c0_20] : memref<34x256xbf16, #tpu.memory_space<vmem>>, vector<34x256xbf16>
      tpu.vector_store %arg8[%c0_19, %c0_20], %34 {strides = array<i32>} : memref<34x256xbf16, #tpu.memory_space<vmem>>, vector<34x256xbf16>,
    } else {
    }
    %c0 = arith.constant 0 : index
    %c0_1 = arith.constant 0 : index
    %3 = vector.load %arg8[%c0, %c0_1] : memref<34x256xbf16, #tpu.memory_space<vmem>>, vector<34x256xbf16>
    %c0_2 = arith.constant 0 : index
    %c0_3 = arith.constant 0 : index
    %4 = vector.load %arg5[%c0_2, %c0_3] : memref<256x256xbf16, #tpu.memory_space<vmem>>, vector<256x256xbf16>
    %cst = arith.constant dense<0.000000e+00> : vector<34x256xf32>
    %5 = tpu.matmul %3, %4, %cst {dimension_numbers = #tpu.dot_dimension_numbers<[1], [0], [0], [1], [0, 0, 1, 1], [], []>} : vector<34x256xbf16>, vector<256x256xbf16>, vector<34x256xf32> -> vector<34x256xf32>
    %c0_4 = arith.constant 0 : index
    %c0_5 = arith.constant 0 : index
    %6 = vector.load %arg6[%c0_4, %c0_5] : memref<1x256xf32, #tpu.memory_space<vmem>>, vector<1x256xf32>
    %7 = vector.broadcast %6 : vector<1x256xf32> to vector<34x256xf32>
    %8 = arith.addf %5, %7 : vector<34x256xf32>
    %9 = arith.truncf %8 : vector<34x256xf32> to vector<34x256xbf16>
    %c0_6 = arith.constant 0 : index
    %c0_7 = arith.constant 0 : index
    %10 = vector.load %arg7[%c0_6, %c0_7] : memref<34x256xbf16, #tpu.memory_space<vmem>>, vector<34x256xbf16>
    tpu.vector_store %arg7[%c0_6, %c0_7], %9 {strides = array<i32>} : memref<34x256xbf16, #tpu.memory_space<vmem>>, vector<34x256xbf16>,
    return
  }
  func.func @transform_0(%arg0: i32, %arg1: i32) -> (i32, i32) {
    %c0_i32 = arith.constant 0 : i32
    %c0_i32_0 = arith.constant 0 : i32
    return %arg0, %c0_i32 : i32, i32
  }
  func.func @transform_1(%arg0: i32, %arg1: i32) -> (i32, i32) {
    %c0_i32 = arith.constant 0 : i32
    %c0_i32_0 = arith.constant 0 : i32
    %c0_i32_1 = arith.constant 0 : i32
    return %c0_i32, %c0_i32_0 : i32, i32
  }
  func.func @transform_2(%arg0: i32, %arg1: i32) -> (i32, i32) {
    %c0_i32 = arith.constant 0 : i32
    %c0_i32_0 = arith.constant 0 : i32
    %c0_i32_1 = arith.constant 0 : i32
    return %c0_i32, %c0_i32_0 : i32, i32
  }
  func.func @transform_3(%arg0: i32, %arg1: i32) -> (i32, i32) {
    %c0_i32 = arith.constant 0 : i32
    %c0_i32_0 = arith.constant 0 : i32
    return %c0_i32, %arg1 : i32, i32
  }
  func.func @transform_4(%arg0: i32, %arg1: i32) -> (i32, i32) {
    %c0_i32 = arith.constant 0 : i32
    %c0_i32_0 = arith.constant 0 : i32
    return %c0_i32, %arg1 : i32, i32
  }
  func.func @transform_5(%arg0: i32, %arg1: i32) -> (i32, i32) {
    %c0_i32 = arith.constant 0 : i32
    return %arg0, %arg1 : i32, i32
  }
}

module attributes {stable_mosaic.version = 11 : i64} {
  func.func @_attention_kernel(%arg0: i32, %arg1: i32, %arg2: memref<1x17x384xbf16, #tpu.memory_space<vmem>>, %arg3: memref<1x17x128xbf16, #tpu.memory_space<vmem>>) attributes {dimension_semantics = [#tpu.dimension_semantics<parallel>, #tpu.dimension_semantics<parallel>], iteration_bounds = array<i64: 2, 2>, scalar_prefetch = 0 : i64, scratch_operands = 0 : i64, tpu.core_type = #tpu.core_type<tc>, window_params = [{transform_indices = @transform_0, window_bounds = array<i64: 1, 17, 384>}, {transform_indices = @transform_1, window_bounds = array<i64: 1, 17, 128>}]} {
    %c0 = arith.constant 0 : index
    %c0_0 = arith.constant 0 : index
    %c0_1 = arith.constant 0 : index
    %0 = vector.load %arg2[%c0, %c0_0, %c0_1] : memref<1x17x384xbf16, #tpu.memory_space<vmem>>, vector<1x17x64xbf16>
    %1 = vector.shape_cast %0 : vector<1x17x64xbf16> to vector<17x64xbf16>
    %c0_2 = arith.constant 0 : index
    %c0_3 = arith.constant 0 : index
    %c128 = arith.constant 128 : index
    %2 = vector.load %arg2[%c0_2, %c0_3, %c128] : memref<1x17x384xbf16, #tpu.memory_space<vmem>>, vector<1x17x64xbf16>
    %3 = vector.shape_cast %2 : vector<1x17x64xbf16> to vector<17x64xbf16>
    %c0_4 = arith.constant 0 : index
    %c0_5 = arith.constant 0 : index
    %c256 = arith.constant 256 : index
    %4 = vector.load %arg2[%c0_4, %c0_5, %c256] : memref<1x17x384xbf16, #tpu.memory_space<vmem>>, vector<1x17x64xbf16>
    %5 = vector.shape_cast %4 : vector<1x17x64xbf16> to vector<17x64xbf16>
    %cst = arith.constant dense<0.000000e+00> : vector<17x17xf32>
    %6 = tpu.matmul %1, %3, %cst {dimension_numbers = #tpu.dot_dimension_numbers<[1], [1], [0], [0], [0, 0, 1, 0], [], []>} : vector<17x64xbf16>, vector<17x64xbf16>, vector<17x17xf32> -> vector<17x17xf32>
    %cst_6 = arith.constant dense<0xFF800000> : vector<17xf32>
    %7 = vector.multi_reduction <maximumf>, %6, %cst_6 [1] : vector<17x17xf32> to vector<17xf32>
    %8 = vector.shape_cast %7 : vector<17xf32> to vector<17x1xf32>
    %9 = vector.broadcast %8 : vector<17x1xf32> to vector<17x17xf32>
    %10 = arith.subf %6, %9 : vector<17x17xf32>
    %11 = math.exp %10 : vector<17x17xf32>
    %cst_7 = arith.constant dense<0.000000e+00> : vector<17xf32>
    %12 = vector.multi_reduction <add>, %11, %cst_7 [1] : vector<17x17xf32> to vector<17xf32>
    %13 = vector.shape_cast %12 : vector<17xf32> to vector<17x1xf32>
    %14 = arith.truncf %11 : vector<17x17xf32> to vector<17x17xbf16>
    %cst_8 = arith.constant dense<0.000000e+00> : vector<17x64xf32>
    %15 = tpu.matmul %14, %5, %cst_8 {dimension_numbers = #tpu.dot_dimension_numbers<[1], [0], [0], [1], [0, 0, 1, 1], [], []>} : vector<17x17xbf16>, vector<17x64xbf16>, vector<17x64xf32> -> vector<17x64xf32>
    %16 = tpu.reciprocal %13 {approx = true} : vector<17x1xf32> -> vector<17x1xf32>
    %17 = vector.broadcast %16 : vector<17x1xf32> to vector<17x64xf32>
    %18 = arith.mulf %15, %17 : vector<17x64xf32>
    %c0_9 = arith.constant 0 : index
    %c0_10 = arith.constant 0 : index
    %c64 = arith.constant 64 : index
    %19 = vector.load %arg2[%c0_9, %c0_10, %c64] : memref<1x17x384xbf16, #tpu.memory_space<vmem>>, vector<1x17x64xbf16>
    %20 = vector.shape_cast %19 : vector<1x17x64xbf16> to vector<17x64xbf16>
    %c0_11 = arith.constant 0 : index
    %c0_12 = arith.constant 0 : index
    %c192 = arith.constant 192 : index
    %21 = vector.load %arg2[%c0_11, %c0_12, %c192] : memref<1x17x384xbf16, #tpu.memory_space<vmem>>, vector<1x17x64xbf16>
    %22 = vector.shape_cast %21 : vector<1x17x64xbf16> to vector<17x64xbf16>
    %c0_13 = arith.constant 0 : index
    %c0_14 = arith.constant 0 : index
    %c320 = arith.constant 320 : index
    %23 = vector.load %arg2[%c0_13, %c0_14, %c320] : memref<1x17x384xbf16, #tpu.memory_space<vmem>>, vector<1x17x64xbf16>
    %24 = vector.shape_cast %23 : vector<1x17x64xbf16> to vector<17x64xbf16>
    %cst_15 = arith.constant dense<0.000000e+00> : vector<17x17xf32>
    %25 = tpu.matmul %20, %22, %cst_15 {dimension_numbers = #tpu.dot_dimension_numbers<[1], [1], [0], [0], [0, 0, 1, 0], [], []>} : vector<17x64xbf16>, vector<17x64xbf16>, vector<17x17xf32> -> vector<17x17xf32>
    %cst_16 = arith.constant dense<0xFF800000> : vector<17xf32>
    %26 = vector.multi_reduction <maximumf>, %25, %cst_16 [1] : vector<17x17xf32> to vector<17xf32>
    %27 = vector.shape_cast %26 : vector<17xf32> to vector<17x1xf32>
    %28 = vector.broadcast %27 : vector<17x1xf32> to vector<17x17xf32>
    %29 = arith.subf %25, %28 : vector<17x17xf32>
    %30 = math.exp %29 : vector<17x17xf32>
    %cst_17 = arith.constant dense<0.000000e+00> : vector<17xf32>
    %31 = vector.multi_reduction <add>, %30, %cst_17 [1] : vector<17x17xf32> to vector<17xf32>
    %32 = vector.shape_cast %31 : vector<17xf32> to vector<17x1xf32>
    %33 = arith.truncf %30 : vector<17x17xf32> to vector<17x17xbf16>
    %cst_18 = arith.constant dense<0.000000e+00> : vector<17x64xf32>
    %34 = tpu.matmul %33, %24, %cst_18 {dimension_numbers = #tpu.dot_dimension_numbers<[1], [0], [0], [1], [0, 0, 1, 1], [], []>} : vector<17x17xbf16>, vector<17x64xbf16>, vector<17x64xf32> -> vector<17x64xf32>
    %35 = tpu.reciprocal %32 {approx = true} : vector<17x1xf32> -> vector<17x1xf32>
    %36 = vector.broadcast %35 : vector<17x1xf32> to vector<17x64xf32>
    %37 = arith.mulf %34, %36 : vector<17x64xf32>
    %38 = tpu.concatenate %18, %37 in 1 : vector<17x64xf32>, vector<17x64xf32> -> vector<17x128xf32>
    %39 = arith.truncf %38 : vector<17x128xf32> to vector<17x128xbf16>
    %c0_19 = arith.constant 0 : index
    %c0_20 = arith.constant 0 : index
    %c0_21 = arith.constant 0 : index
    %40 = vector.load %arg3[%c0_19, %c0_20, %c0_21] : memref<1x17x128xbf16, #tpu.memory_space<vmem>>, vector<1x17x128xbf16>
    %41 = vector.shape_cast %40 : vector<1x17x128xbf16> to vector<17x128xbf16>
    %42 = vector.shape_cast %39 : vector<17x128xbf16> to vector<1x17x128xbf16>
    tpu.vector_store %arg3[%c0_19, %c0_20, %c0_21], %42 {strides = array<i32>} : memref<1x17x128xbf16, #tpu.memory_space<vmem>>, vector<1x17x128xbf16>,
    return
  }
  func.func @transform_0(%arg0: i32, %arg1: i32) -> (i32, i32, i32) {
    %c0_i32 = arith.constant 0 : i32
    %c0_i32_0 = arith.constant 0 : i32
    return %arg0, %c0_i32, %arg1 : i32, i32, i32
  }
  func.func @transform_1(%arg0: i32, %arg1: i32) -> (i32, i32, i32) {
    %c0_i32 = arith.constant 0 : i32
    %c0_i32_0 = arith.constant 0 : i32
    return %arg0, %c0_i32, %arg1 : i32, i32, i32
  }
}

module attributes {stable_mosaic.version = 11 : i64} {
  func.func @_matmul_kernel(%arg0: i32, %arg1: i32, %arg2: i32, %arg3: memref<34x256xbf16, #tpu.memory_space<vmem>>, %arg4: memref<256x256xbf16, #tpu.memory_space<vmem>>, %arg5: memref<1x256xf32, #tpu.memory_space<vmem>>, %arg6: memref<34x256xf32, #tpu.memory_space<vmem>>, %arg7: memref<34x256xf32, #tpu.memory_space<vmem>>, %arg8: memref<34x256xf32, #tpu.memory_space<vmem>>) attributes {dimension_semantics = [#tpu.dimension_semantics<parallel>, #tpu.dimension_semantics<parallel>, #tpu.dimension_semantics<arbitrary>], iteration_bounds = array<i64: 1, 1, 1>, scalar_prefetch = 0 : i64, scratch_operands = 1 : i64, tpu.core_type = #tpu.core_type<tc>, window_params = [{transform_indices = @transform_0, window_bounds = array<i64: 34, 256>}, {transform_indices = @transform_1, window_bounds = array<i64: 256, 256>}, {transform_indices = @transform_2, window_bounds = array<i64: 1, 256>}, {transform_indices = @transform_3, window_bounds = array<i64: 34, 256>}, {transform_indices = @transform_4, window_bounds = array<i64: 34, 256>}]} {
    %c0_i32 = arith.constant 0 : i32
    %0 = arith.cmpi eq, %arg2, %c0_i32 : i32
    %1 = arith.extui %0 : i1 to i32
    %c0_i32_0 = arith.constant 0 : i32
    %2 = arith.cmpi ne, %1, %c0_i32_0 : i32
    scf.if %2 {
      %cst_10 = arith.constant 0.000000e+00 : f32
      %12 = vector.broadcast %cst_10 : f32 to vector<34x256xf32>
      %c0_11 = arith.constant 0 : index
      %c0_12 = arith.constant 0 : index
      %13 = vector.load %arg8[%c0_11, %c0_12] : memref<34x256xf32, #tpu.memory_space<vmem>>, vector<34x256xf32>
      tpu.vector_store %arg8[%c0_11, %c0_12], %12 {strides = array<i32>} : memref<34x256xf32, #tpu.memory_space<vmem>>, vector<34x256xf32>,
    } else {
    }
    %c0 = arith.constant 0 : index
    %c0_1 = arith.constant 0 : index
    %3 = vector.load %arg8[%c0, %c0_1] : memref<34x256xf32, #tpu.memory_space<vmem>>, vector<34x256xf32>
    %c0_2 = arith.constant 0 : index
    %c0_3 = arith.constant 0 : index
    %4 = vector.load %arg3[%c0_2, %c0_3] : memref<34x256xbf16, #tpu.memory_space<vmem>>, vector<34x256xbf16>
    %c0_4 = arith.constant 0 : index
    %c0_5 = arith.constant 0 : index
    %5 = vector.load %arg4[%c0_4, %c0_5] : memref<256x256xbf16, #tpu.memory_space<vmem>>, vector<256x256xbf16>
    %cst = arith.constant dense<0.000000e+00> : vector<34x256xf32>
    %6 = tpu.matmul %4, %5, %cst {dimension_numbers = #tpu.dot_dimension_numbers<[1], [0], [0], [1], [0, 0, 1, 1], [], []>} : vector<34x256xbf16>, vector<256x256xbf16>, vector<34x256xf32> -> vector<34x256xf32>
    %7 = arith.addf %3, %6 : vector<34x256xf32>
    %c0_6 = arith.constant 0 : index
    %c0_7 = arith.constant 0 : index
    %8 = vector.load %arg8[%c0_6, %c0_7] : memref<34x256xf32, #tpu.memory_space<vmem>>, vector<34x256xf32>
    tpu.vector_store %arg8[%c0_6, %c0_7], %7 {strides = array<i32>} : memref<34x256xf32, #tpu.memory_space<vmem>>, vector<34x256xf32>,
    %c0_i32_8 = arith.constant 0 : i32
    %9 = arith.cmpi eq, %arg2, %c0_i32_8 : i32
    %10 = arith.extui %9 : i1 to i32
    %c0_i32_9 = arith.constant 0 : i32
    %11 = arith.cmpi ne, %10, %c0_i32_9 : i32
    scf.if %11 {
      %c0_10 = arith.constant 0 : index
      %c0_11 = arith.constant 0 : index
      %12 = vector.load %arg8[%c0_10, %c0_11] : memref<34x256xf32, #tpu.memory_space<vmem>>, vector<34x256xf32>
      %c0_12 = arith.constant 0 : index
      %c0_13 = arith.constant 0 : index
      %13 = vector.load %arg5[%c0_12, %c0_13] : memref<1x256xf32, #tpu.memory_space<vmem>>, vector<1x256xf32>
      %14 = vector.broadcast %13 : vector<1x256xf32> to vector<34x256xf32>
      %15 = arith.addf %12, %14 : vector<34x256xf32>
      %c0_14 = arith.constant 0 : index
      %c0_15 = arith.constant 0 : index
      %16 = vector.load %arg6[%c0_14, %c0_15] : memref<34x256xf32, #tpu.memory_space<vmem>>, vector<34x256xf32>
      %17 = arith.addf %15, %16 : vector<34x256xf32>
      %c0_16 = arith.constant 0 : index
      %c0_17 = arith.constant 0 : index
      %18 = vector.load %arg7[%c0_16, %c0_17] : memref<34x256xf32, #tpu.memory_space<vmem>>, vector<34x256xf32>
      tpu.vector_store %arg7[%c0_16, %c0_17], %17 {strides = array<i32>} : memref<34x256xf32, #tpu.memory_space<vmem>>, vector<34x256xf32>,
    } else {
    }
    return
  }
  func.func @transform_0(%arg0: i32, %arg1: i32, %arg2: i32) -> (i32, i32) {
    %c0_i32 = arith.constant 0 : i32
    return %arg0, %arg2 : i32, i32
  }
  func.func @transform_1(%arg0: i32, %arg1: i32, %arg2: i32) -> (i32, i32) {
    %c0_i32 = arith.constant 0 : i32
    return %arg2, %arg1 : i32, i32
  }
  func.func @transform_2(%arg0: i32, %arg1: i32, %arg2: i32) -> (i32, i32) {
    %c0_i32 = arith.constant 0 : i32
    %c0_i32_0 = arith.constant 0 : i32
    return %c0_i32, %arg1 : i32, i32
  }
  func.func @transform_3(%arg0: i32, %arg1: i32, %arg2: i32) -> (i32, i32) {
    %c0_i32 = arith.constant 0 : i32
    return %arg0, %arg1 : i32, i32
  }
  func.func @transform_4(%arg0: i32, %arg1: i32, %arg2: i32) -> (i32, i32) {
    %c0_i32 = arith.constant 0 : i32
    return %arg0, %arg1 : i32, i32
  }
}

module attributes {stable_mosaic.version = 11 : i64} {
  func.func @_ln_matmul_kernel(%arg0: i32, %arg1: i32, %arg2: memref<34x256xf32, #tpu.memory_space<vmem>>, %arg3: memref<1x256xf32, #tpu.memory_space<vmem>>, %arg4: memref<1x256xf32, #tpu.memory_space<vmem>>, %arg5: memref<256x512xbf16, #tpu.memory_space<vmem>>, %arg6: memref<1x512xf32, #tpu.memory_space<vmem>>, %arg7: memref<34x512xbf16, #tpu.memory_space<vmem>>, %arg8: memref<34x256xbf16, #tpu.memory_space<vmem>>) attributes {dimension_semantics = [#tpu.dimension_semantics<parallel>, #tpu.dimension_semantics<arbitrary>], iteration_bounds = array<i64: 1, 1>, scalar_prefetch = 0 : i64, scratch_operands = 1 : i64, tpu.core_type = #tpu.core_type<tc>, window_params = [{transform_indices = @transform_0, window_bounds = array<i64: 34, 256>}, {pipeline_mode = #tpu.pipeline_mode<synchronous>, transform_indices = @transform_1, window_bounds = array<i64: 1, 256>}, {pipeline_mode = #tpu.pipeline_mode<synchronous>, transform_indices = @transform_2, window_bounds = array<i64: 1, 256>}, {transform_indices = @transform_3, window_bounds = array<i64: 256, 512>}, {transform_indices = @transform_4, window_bounds = array<i64: 1, 512>}, {transform_indices = @transform_5, window_bounds = array<i64: 34, 512>}]} {
    %c0_i32 = arith.constant 0 : i32
    %0 = arith.cmpi eq, %arg1, %c0_i32 : i32
    %1 = arith.extui %0 : i1 to i32
    %c0_i32_0 = arith.constant 0 : i32
    %2 = arith.cmpi ne, %1, %c0_i32_0 : i32
    scf.if %2 {
      %c0_10 = arith.constant 0 : index
      %c0_11 = arith.constant 0 : index
      %19 = vector.load %arg2[%c0_10, %c0_11] : memref<34x256xf32, #tpu.memory_space<vmem>>, vector<34x256xf32>
      %cst_12 = arith.constant dense<0.000000e+00> : vector<34xf32>
      %20 = vector.multi_reduction <add>, %19, %cst_12 [1] : vector<34x256xf32> to vector<34xf32>
      %21 = vector.shape_cast %20 : vector<34xf32> to vector<34x1xf32>
      %cst_13 = arith.constant 2.560000e+02 : f32
      %22 = vector.broadcast %cst_13 : f32 to vector<34x1xf32>
      %23 = arith.divf %21, %22 : vector<34x1xf32>
      %24 = vector.broadcast %23 : vector<34x1xf32> to vector<34x256xf32>
      %25 = arith.subf %19, %24 : vector<34x256xf32>
      %26 = arith.mulf %25, %25 : vector<34x256xf32>
      %cst_14 = arith.constant dense<0.000000e+00> : vector<34xf32>
      %27 = vector.multi_reduction <add>, %26, %cst_14 [1] : vector<34x256xf32> to vector<34xf32>
      %28 = vector.shape_cast %27 : vector<34xf32> to vector<34x1xf32>
      %cst_15 = arith.constant 2.560000e+02 : f32
      %29 = vector.broadcast %cst_15 : f32 to vector<34x1xf32>
      %30 = arith.divf %28, %29 : vector<34x1xf32>
      %cst_16 = arith.constant 9.99999974E-6 : f32
      %31 = vector.broadcast %cst_16 : f32 to vector<34x1xf32>
      %32 = arith.addf %30, %31 : vector<34x1xf32>
      %33 = math.rsqrt %32 : vector<34x1xf32>
      %34 = vector.broadcast %33 : vector<34x1xf32> to vector<34x256xf32>
      %35 = arith.mulf %25, %34 : vector<34x256xf32>
      %c0_17 = arith.constant 0 : index
      %c0_18 = arith.constant 0 : index
      %36 = vector.load %arg3[%c0_17, %c0_18] : memref<1x256xf32, #tpu.memory_space<vmem>>, vector<1x256xf32>
      %37 = vector.broadcast %36 : vector<1x256xf32> to vector<34x256xf32>
      %38 = arith.mulf %35, %37 : vector<34x256xf32>
      %c0_19 = arith.constant 0 : index
      %c0_20 = arith.constant 0 : index
      %39 = vector.load %arg4[%c0_19, %c0_20] : memref<1x256xf32, #tpu.memory_space<vmem>>, vector<1x256xf32>
      %40 = vector.broadcast %39 : vector<1x256xf32> to vector<34x256xf32>
      %41 = arith.addf %38, %40 : vector<34x256xf32>
      %42 = arith.truncf %41 : vector<34x256xf32> to vector<34x256xbf16>
      %c0_21 = arith.constant 0 : index
      %c0_22 = arith.constant 0 : index
      %43 = vector.load %arg8[%c0_21, %c0_22] : memref<34x256xbf16, #tpu.memory_space<vmem>>, vector<34x256xbf16>
      tpu.vector_store %arg8[%c0_21, %c0_22], %42 {strides = array<i32>} : memref<34x256xbf16, #tpu.memory_space<vmem>>, vector<34x256xbf16>,
    } else {
    }
    %c0 = arith.constant 0 : index
    %c0_1 = arith.constant 0 : index
    %3 = vector.load %arg8[%c0, %c0_1] : memref<34x256xbf16, #tpu.memory_space<vmem>>, vector<34x256xbf16>
    %c0_2 = arith.constant 0 : index
    %c0_3 = arith.constant 0 : index
    %4 = vector.load %arg5[%c0_2, %c0_3] : memref<256x512xbf16, #tpu.memory_space<vmem>>, vector<256x512xbf16>
    %cst = arith.constant dense<0.000000e+00> : vector<34x512xf32>
    %5 = tpu.matmul %3, %4, %cst {dimension_numbers = #tpu.dot_dimension_numbers<[1], [0], [0], [1], [0, 0, 1, 1], [], []>} : vector<34x256xbf16>, vector<256x512xbf16>, vector<34x512xf32> -> vector<34x512xf32>
    %c0_4 = arith.constant 0 : index
    %c0_5 = arith.constant 0 : index
    %6 = vector.load %arg6[%c0_4, %c0_5] : memref<1x512xf32, #tpu.memory_space<vmem>>, vector<1x512xf32>
    %7 = vector.broadcast %6 : vector<1x512xf32> to vector<34x512xf32>
    %8 = arith.addf %5, %7 : vector<34x512xf32>
    %cst_6 = arith.constant 1.702000e+00 : f32
    %9 = vector.broadcast %cst_6 : f32 to vector<34x512xf32>
    %10 = arith.mulf %9, %8 : vector<34x512xf32>
    %11 = arith.negf %10 : vector<34x512xf32>
    %12 = math.exp %11 : vector<34x512xf32>
    %cst_7 = arith.constant 1.000000e+00 : f32
    %13 = vector.broadcast %cst_7 : f32 to vector<34x512xf32>
    %14 = arith.addf %13, %12 : vector<34x512xf32>
    %15 = arith.divf %13, %14 : vector<34x512xf32>
    %16 = arith.mulf %8, %15 : vector<34x512xf32>
    %17 = arith.truncf %16 : vector<34x512xf32> to vector<34x512xbf16>
    %c0_8 = arith.constant 0 : index
    %c0_9 = arith.constant 0 : index
    %18 = vector.load %arg7[%c0_8, %c0_9] : memref<34x512xbf16, #tpu.memory_space<vmem>>, vector<34x512xbf16>
    tpu.vector_store %arg7[%c0_8, %c0_9], %17 {strides = array<i32>} : memref<34x512xbf16, #tpu.memory_space<vmem>>, vector<34x512xbf16>,
    return
  }
  func.func @transform_0(%arg0: i32, %arg1: i32) -> (i32, i32) {
    %c0_i32 = arith.constant 0 : i32
    %c0_i32_0 = arith.constant 0 : i32
    return %arg0, %c0_i32 : i32, i32
  }
  func.func @transform_1(%arg0: i32, %arg1: i32) -> (i32, i32) {
    %c0_i32 = arith.constant 0 : i32
    %c0_i32_0 = arith.constant 0 : i32
    %c0_i32_1 = arith.constant 0 : i32
    return %c0_i32, %c0_i32_0 : i32, i32
  }
  func.func @transform_2(%arg0: i32, %arg1: i32) -> (i32, i32) {
    %c0_i32 = arith.constant 0 : i32
    %c0_i32_0 = arith.constant 0 : i32
    %c0_i32_1 = arith.constant 0 : i32
    return %c0_i32, %c0_i32_0 : i32, i32
  }
  func.func @transform_3(%arg0: i32, %arg1: i32) -> (i32, i32) {
    %c0_i32 = arith.constant 0 : i32
    %c0_i32_0 = arith.constant 0 : i32
    return %c0_i32, %arg1 : i32, i32
  }
  func.func @transform_4(%arg0: i32, %arg1: i32) -> (i32, i32) {
    %c0_i32 = arith.constant 0 : i32
    %c0_i32_0 = arith.constant 0 : i32
    return %c0_i32, %arg1 : i32, i32
  }
  func.func @transform_5(%arg0: i32, %arg1: i32) -> (i32, i32) {
    %c0_i32 = arith.constant 0 : i32
    return %arg0, %arg1 : i32, i32
  }
}

module attributes {stable_mosaic.version = 11 : i64} {
  func.func @_matmul_kernel(%arg0: i32, %arg1: i32, %arg2: i32, %arg3: memref<34x512xbf16, #tpu.memory_space<vmem>>, %arg4: memref<512x256xbf16, #tpu.memory_space<vmem>>, %arg5: memref<1x256xf32, #tpu.memory_space<vmem>>, %arg6: memref<34x256xf32, #tpu.memory_space<vmem>>, %arg7: memref<34x256xf32, #tpu.memory_space<vmem>>, %arg8: memref<34x256xf32, #tpu.memory_space<vmem>>) attributes {dimension_semantics = [#tpu.dimension_semantics<parallel>, #tpu.dimension_semantics<parallel>, #tpu.dimension_semantics<arbitrary>], iteration_bounds = array<i64: 1, 1, 1>, scalar_prefetch = 0 : i64, scratch_operands = 1 : i64, tpu.core_type = #tpu.core_type<tc>, window_params = [{transform_indices = @transform_0, window_bounds = array<i64: 34, 512>}, {transform_indices = @transform_1, window_bounds = array<i64: 512, 256>}, {transform_indices = @transform_2, window_bounds = array<i64: 1, 256>}, {transform_indices = @transform_3, window_bounds = array<i64: 34, 256>}, {transform_indices = @transform_4, window_bounds = array<i64: 34, 256>}]} {
    %c0_i32 = arith.constant 0 : i32
    %0 = arith.cmpi eq, %arg2, %c0_i32 : i32
    %1 = arith.extui %0 : i1 to i32
    %c0_i32_0 = arith.constant 0 : i32
    %2 = arith.cmpi ne, %1, %c0_i32_0 : i32
    scf.if %2 {
      %cst_10 = arith.constant 0.000000e+00 : f32
      %12 = vector.broadcast %cst_10 : f32 to vector<34x256xf32>
      %c0_11 = arith.constant 0 : index
      %c0_12 = arith.constant 0 : index
      %13 = vector.load %arg8[%c0_11, %c0_12] : memref<34x256xf32, #tpu.memory_space<vmem>>, vector<34x256xf32>
      tpu.vector_store %arg8[%c0_11, %c0_12], %12 {strides = array<i32>} : memref<34x256xf32, #tpu.memory_space<vmem>>, vector<34x256xf32>,
    } else {
    }
    %c0 = arith.constant 0 : index
    %c0_1 = arith.constant 0 : index
    %3 = vector.load %arg8[%c0, %c0_1] : memref<34x256xf32, #tpu.memory_space<vmem>>, vector<34x256xf32>
    %c0_2 = arith.constant 0 : index
    %c0_3 = arith.constant 0 : index
    %4 = vector.load %arg3[%c0_2, %c0_3] : memref<34x512xbf16, #tpu.memory_space<vmem>>, vector<34x512xbf16>
    %c0_4 = arith.constant 0 : index
    %c0_5 = arith.constant 0 : index
    %5 = vector.load %arg4[%c0_4, %c0_5] : memref<512x256xbf16, #tpu.memory_space<vmem>>, vector<512x256xbf16>
    %cst = arith.constant dense<0.000000e+00> : vector<34x256xf32>
    %6 = tpu.matmul %4, %5, %cst {dimension_numbers = #tpu.dot_dimension_numbers<[1], [0], [0], [1], [0, 0, 1, 1], [], []>} : vector<34x512xbf16>, vector<512x256xbf16>, vector<34x256xf32> -> vector<34x256xf32>
    %7 = arith.addf %3, %6 : vector<34x256xf32>
    %c0_6 = arith.constant 0 : index
    %c0_7 = arith.constant 0 : index
    %8 = vector.load %arg8[%c0_6, %c0_7] : memref<34x256xf32, #tpu.memory_space<vmem>>, vector<34x256xf32>
    tpu.vector_store %arg8[%c0_6, %c0_7], %7 {strides = array<i32>} : memref<34x256xf32, #tpu.memory_space<vmem>>, vector<34x256xf32>,
    %c0_i32_8 = arith.constant 0 : i32
    %9 = arith.cmpi eq, %arg2, %c0_i32_8 : i32
    %10 = arith.extui %9 : i1 to i32
    %c0_i32_9 = arith.constant 0 : i32
    %11 = arith.cmpi ne, %10, %c0_i32_9 : i32
    scf.if %11 {
      %c0_10 = arith.constant 0 : index
      %c0_11 = arith.constant 0 : index
      %12 = vector.load %arg8[%c0_10, %c0_11] : memref<34x256xf32, #tpu.memory_space<vmem>>, vector<34x256xf32>
      %c0_12 = arith.constant 0 : index
      %c0_13 = arith.constant 0 : index
      %13 = vector.load %arg5[%c0_12, %c0_13] : memref<1x256xf32, #tpu.memory_space<vmem>>, vector<1x256xf32>
      %14 = vector.broadcast %13 : vector<1x256xf32> to vector<34x256xf32>
      %15 = arith.addf %12, %14 : vector<34x256xf32>
      %c0_14 = arith.constant 0 : index
      %c0_15 = arith.constant 0 : index
      %16 = vector.load %arg6[%c0_14, %c0_15] : memref<34x256xf32, #tpu.memory_space<vmem>>, vector<34x256xf32>
      %17 = arith.addf %15, %16 : vector<34x256xf32>
      %c0_16 = arith.constant 0 : index
      %c0_17 = arith.constant 0 : index
      %18 = vector.load %arg7[%c0_16, %c0_17] : memref<34x256xf32, #tpu.memory_space<vmem>>, vector<34x256xf32>
      tpu.vector_store %arg7[%c0_16, %c0_17], %17 {strides = array<i32>} : memref<34x256xf32, #tpu.memory_space<vmem>>, vector<34x256xf32>,
    } else {
    }
    return
  }
  func.func @transform_0(%arg0: i32, %arg1: i32, %arg2: i32) -> (i32, i32) {
    %c0_i32 = arith.constant 0 : i32
    return %arg0, %arg2 : i32, i32
  }
  func.func @transform_1(%arg0: i32, %arg1: i32, %arg2: i32) -> (i32, i32) {
    %c0_i32 = arith.constant 0 : i32
    return %arg2, %arg1 : i32, i32
  }
  func.func @transform_2(%arg0: i32, %arg1: i32, %arg2: i32) -> (i32, i32) {
    %c0_i32 = arith.constant 0 : i32
    %c0_i32_0 = arith.constant 0 : i32
    return %c0_i32, %arg1 : i32, i32
  }
  func.func @transform_3(%arg0: i32, %arg1: i32, %arg2: i32) -> (i32, i32) {
    %c0_i32 = arith.constant 0 : i32
    return %arg0, %arg1 : i32, i32
  }
  func.func @transform_4(%arg0: i32, %arg1: i32, %arg2: i32) -> (i32, i32) {
    %c0_i32 = arith.constant 0 : i32
    return %arg0, %arg1 : i32, i32
  }
}

</mosaic_0001>

<bundles_post_ra>
// kernel: clip_vision_tower_forward.13
= control target key start
LH: loop header
LB: loop body
LE: loop exit
PB: predicated region body
PF: predicated region fallthrough
CT: control target
= control target key end

     0   :  { %s484_s18 = smov 0   ;;  %s544_s0 = inlined_call_operand.vmem [shape: bf16[2,16,256], index: 0, kind: input, shape index: {}]   ;;  %s545_s1 = inlined_call_operand.vmem [shape: f32[1,256], index: 1, kind: input, shape index: {}]   ;;  %s546_s2 = inlined_call_operand.vmem [shape: f32[16,256], index: 2, kind: input, shape index: {}]   ;;  %s547_s3 = inlined_call_operand.vmem [shape: f32[1,256], index: 3, kind: input, shape index: {}]   ;;  %s548_s4 = inlined_call_operand.vmem [shape: f32[1,256], index: 4, kind: input, shape index: {}]   ;;  %s549_s5 = inlined_call_operand.vmem [shape: f32[2,17,256], index: 5, kind: output, shape index: {}]  }
   0x1 LB: > { %s420_s19 = sadd.s32 4294967295, %s452_s18   ;;  %p424_p0 = scmp.ge.s32.totalorder %s452_s18, 1  ;;  %s452_s18 = sphi %s484_s18, %s15_s18  }
   0x2   : > { %p187_p1 = scmp.lt.s32.totalorder %s452_s18, 3 }
   0x4   : > { %p188_p2 = pnand %p424_p0, %p187_p1 }
   0x5   : > { %p215_p3 = scmp.lt.s32.totalorder (!%p188_p2), %s420_s19, 1 }
   0x6   : > { %191 = sbr.rel (%p188_p2) target bundleno = 341 (0x155), region = 40 }
   0xb   : > { %v241_v0 = vlaneseq  ;;  %s551_s19 = smov (!%p215_p3, %s420_s19), 1  ;;  %v234_v2 = vld [vmem:[%s546_s2 + $0x10] sm:$0xff]  ;;  %v235_v3 = vld [vmem:[%s546_s2 + $0x18] sm:$0xff]  ;;  %v232_v4 = vld [vmem:[%s546_s2] sm:$0xff]  ;;  %vm255_vm0 = vcmask 1040384  }
   0xc   : > { %s430_s20 = sshll.u32 %s551_s19, 4  ;;  %v233_v7 = vld [vmem:[%s546_s2 + $0x8] sm:$0xff]  ;;  %v225_v14 = vld [vmem:[%s545_s1] sm:$0x3]  ;;  %s431_s13 = smul.u32 48, %s551_s19 }
   0xd   : > { %v242_v1 = vshrl.u32 %v241_v0, 7  ;;  %s219_s23 = scalar_lea.vmem %s544_s0, %s430_s20 }
   0xe   : > { %v227_v5 = vld [vmem:[%s219_s23 + $0x8] sm:$0xff]  ;;  %v226_v6 = vld [vmem:[%s219_s23] sm:$0xff]  ;;  %s224_s16 = scalar_lea.vmem %s549_s5, %s431_s13 }
   0xf   : > { %v510_v8 = vsub.s32 0, %v242_v1  ;;  %v512_v9 = vsub.s32 1, %v242_v1  ;;  %v230_v10 = vunpack.c.l.bf16 %v227_v5  ;;  %v231_v11 = vunpack.c.h.bf16 %v227_v5 }
  0x10   : > { %v228_v12 = vunpack.c.l.bf16 %v226_v6  ;;  %v229_v13 = vunpack.c.h.bf16 %v226_v6 }
  0x11   : > { %v238_v15 = vadd.f32 %v234_v2, %v230_v10  ;;  %v239_v16 = vadd.f32 %v235_v3, %v231_v11  ;;  %v244_v19 = vrot.slane %v225_v14, %v510_v8  ;;  %v248_v20 = vrot.slane %v225_v14, %v512_v9  ;;  %v323_v2 = vld [vmem:[%s547_s3] sm:$0x3] }
  0x12   : > { %v236_v17 = vadd.f32 %v232_v4, %v228_v12  ;;  %v237_v18 = vadd.f32 %v233_v7, %v229_v13  ;;  %v341_v3 = vld [vmem:[%s548_s4] sm:$0x3]  ;;  %v328_v4 = vrot.slane %v323_v2, %v510_v8  ;;  %v332_v5 = vrot.slane %v323_v2, %v512_v9 }
  0x13   : > { %v258_v21 = vrot.slane %v238_v15, 7  ;;  %v260_v22 = vrot.slane %v239_v16, 7  ;;  %v346_v7 = vrot.slane %v341_v3, %v510_v8  ;;  %v350_v10 = vrot.slane %v341_v3, %v512_v9 }
  0x14   : > { %v256_v23 = vrot.slane %v236_v17, 7  ;;  %v257_v24 = vrot.slane %v237_v18, 7 }
  0x15   : > { %v276_v25 = vsel %vm255_vm0, %v258_v21, 0.0  ;;  %v277_v26 = vsel %vm255_vm0, %v260_v22, 0.0 }
  0x16   : > { %v259_v27 = vsel %vm255_vm0, %v256_v23, %v258_v21  ;;  %v261_v28 = vsel %vm255_vm0, %v257_v24, %v260_v22  ;;  %v278_v29 = vadd.f32 %v277_v26, %v276_v25  ;;  %v268_v31 = vsel %vm255_vm0, %v244_v19, %v256_v23 }
  0x17   : > { %v273_v30 = vadd.f32 %v261_v28, %v259_v27  ;;  %v269_v32 = vsel %vm255_vm0, %v248_v20, %v257_v24 }
  0x18   : > { %279 = vadd.xlane.f32.xlu0 %v278_v29  ;;  %v270_v33 = vadd.f32 %v269_v32, %v268_v31 }
  0x19   : > { %274 = vadd.xlane.f32.xlu1 %v273_v30 }
  0x1c   : > { %271 = vadd.xlane.f32.xlu0 %v270_v33 }
  0xa1   : > { %v280_v34 = vpop.xlane.xlu0 %279 }
  0xa2   : > { %v275_v35 = vpop.xlane.xlu1 %274  ;;  %v284_v36 = vmul.f32 0.00390625, %v280_v34 }
  0xa3   : > { %v283_v37 = vmul.f32 0.00390625, %v275_v35 }
  0xa4   : > { %v289_v40 = vsub.f32 %v258_v21, %v284_v36  ;;  %v290_v41 = vsub.f32 %v260_v22, %v284_v36 }
  0xa5   : > { %v287_v38 = vsub.f32 %v259_v27, %v283_v37  ;;  %v288_v39 = vsub.f32 %v261_v28, %v283_v37  ;;  %v272_v42 = vpop.xlane.xlu0 %271 }
  0xa6   : > { %v282_v43 = vmul.f32 0.00390625, %v272_v42  ;;  %v295_v49 = vmul.f32 %v289_v40, %v289_v40  ;;  %v296_v50 = vmul.f32 %v290_v41, %v290_v41 }
  0xa7   : > { %v293_v44 = vmul.f32 %v287_v38, %v287_v38  ;;  %v294_v45 = vmul.f32 %v288_v39, %v288_v39 }
  0xa8   : > { %v285_v46 = vsub.f32 %v268_v31, %v282_v43  ;;  %v286_v47 = vsub.f32 %v269_v32, %v282_v43  ;;  %v303_v54 = vsel %vm255_vm0, %v295_v49, 0.0  ;;  %v304_v55 = vsel %vm255_vm0, %v296_v50, 0.0 }
  0xa9   : > { %v300_v48 = vadd.f32 %v294_v45, %v293_v44  ;;  %v305_v56 = vadd.f32 %v304_v55, %v303_v54 }
  0xaa   : > { %v291_v51 = vmul.f32 %v285_v46, %v285_v46  ;;  %v292_v52 = vmul.f32 %v286_v47, %v286_v47 }
  0xab   : > { %301 = vadd.xlane.f32.xlu0 %v300_v48 }
  0xac   : > { %v297_v53 = vadd.f32 %v292_v52, %v291_v51 }
  0xae   : > { %298 = vadd.xlane.f32.xlu1 %v297_v53 }
  0xb2   : > { %306 = vadd.xlane.f32.xlu1 %v305_v56 }
 0x134   : > { %v302_v57 = vpop.xlane.xlu0 %301 }
 0x135   : > { %v309_v58 = vmul.f32 0.00390625, %v302_v57 }
 0x137   : > { %v312_v59 = vadd.f32 1e-05, %v309_v58  ;;  %v299_v60 = vpop.xlane.xlu1 %298 }
 0x138   : > { %v308_v61 = vmul.f32 0.00390625, %v299_v60 }
 0x139   : > { %440 = vrsqrt.f32 %v312_v59 }
 0x13a   : > { %v311_v62 = vadd.f32 1e-05, %v308_v61 }
 0x13b   : > { %v307_v63 = vpop.xlane.xlu1 %306 }
 0x13c   : > { %442 = vrsqrt.f32 %v311_v62  ;;  %v310_v0 = vmul.f32 0.00390625, %v307_v63 }
 0x13e   : > { %v313_v1 = vadd.f32 1e-05, %v310_v0 }
 0x140   : > { %444 = vrsqrt.f32 %v313_v1 }
 0x146   : > { %v441_v6 = vpop.eup %440 }
 0x147   : > { %v319_v11 = vmul.f32 %v441_v6, %v287_v38  ;;  %v320_v12 = vmul.f32 %v441_v6, %v288_v39 }
 0x149   : > { %v337_v13 = vmul.f32 %v328_v4, %v319_v11  ;;  %v338_v14 = vmul.f32 %v332_v5, %v320_v12  ;;  %v443_v15 = vpop.eup %442 }
 0x14a   : > { %v317_v18 = vmul.f32 %v443_v15, %v285_v46  ;;  %v318_v19 = vmul.f32 %v443_v15, %v286_v47 }
 0x14b   : > { %v355_v16 = vadd.f32 %v346_v7, %v337_v13  ;;  %v356_v17 = vadd.f32 %v350_v10, %v338_v14 }
 0x14c   : > { %v335_v20 = vmul.f32 %v328_v4, %v317_v18  ;;  %v336_v21 = vmul.f32 %v332_v5, %v318_v19 }
 0x14d   : > { %361 = vst [vmem:[%s224_s16 + $0x10] sm:$0xff] %v355_v16  ;;  %362 = vst [vmem:[%s224_s16 + $0x18] sm:$0xff] %v356_v17  ;;  %v445_v8 = vpop.eup %444 }
 0x14e   : > { %v353_v22 = vadd.f32 %v346_v7, %v335_v20  ;;  %v354_v9 = vadd.f32 %v350_v10, %v336_v21  ;;  %v321_v23 = vmul.f32 %v445_v8, %v289_v40  ;;  %v322_v24 = vmul.f32 %v445_v8, %v290_v41 }
 0x150   : > { %359 = vst [vmem:[%s224_s16] sm:$0xff] %v353_v22  ;;  %360 = vst [vmem:[%s224_s16 + $0x8] sm:$0xff] %v354_v9  ;;  %v339_v25 = vmul.f32 %v328_v4, %v321_v23  ;;  %v340_v26 = vmul.f32 %v332_v5, %v322_v24 }
 0x152   : > { %v357_v27 = vadd.f32 %v346_v7, %v339_v25  ;;  %v358_v28 = vadd.f32 %v350_v10, %v340_v26 }
 0x154   : > { %363 = vst [vmem:[%s224_s16 + $0x20] sm:$0x1] %v357_v27  ;;  %364 = vst [vmem:[%s224_s16 + $0x28] sm:$0x1] %v358_v28 }
 0x155 PF: > { %s15_s18 = sadd.s32 1, %s452_s18  }
 0x156   : > { %p12_p4 = scmp.ge.s32.totalorder %s15_s18, 4  }
 0x158   :  { %14 = sbr.rel (!%p12_p4) target bundleno = 1 (0x1), region = 70 }

// kernel: clip_vision_tower_forward.12
= control target key start
LH: loop header
LB: loop body
LE: loop exit
PB: predicated region body
PF: predicated region fallthrough
CT: control target
= control target key end

     0   :  { %vm201_vm0 = vcmask 523264   ;;  %v290_v28 = vlaneseq  ;;  %s563_s1 = inlined_call_operand.vmem [shape: bf16[192,256], index: 1, kind: input, shape index: {}]   ;;  %s564_s0 = inlined_call_operand.vmem [shape: bf16[32,192], index: 0, kind: input, shape index: {}]   ;;  %s565_s2 = inlined_call_operand.vmem [shape: f32[1,256], index: 2, kind: input, shape index: {}]   ;;  %s566_s3 = inlined_call_operand.vmem [shape: bf16[32,256], index: 3, kind: output, shape index: {}]  }
   0x1   :  { %v402_v0 = vld [vmem:[%s563_s1 + $0x74] ss:$8 sps:$4 sm:$0xff]   ;;  %v404_v1 = vld [vmem:[%s563_s1 + $0x70] ss:$8 sps:$4 sm:$0xff]   ;;  %v405_v2 = vld [vmem:[%s563_s1 + $0x64] ss:$8 sps:$4 sm:$0xff]  }
   0x2   :  { %208 = vmatprep.subr.bf16.mxu0 %v402_v0  ;;  %378 = vmatprep.subr.bf16.mxu1 %v402_v0  ;;  %v407_v3 = vld [vmem:[%s563_s1 + $0x60] ss:$8 sps:$4 sm:$0xff]   ;;  %v408_v4 = vld [vmem:[%s563_s1 + $0x54] ss:$8 sps:$4 sm:$0xff]   ;;  %v410_v5 = vld [vmem:[%s563_s1 + $0x50] ss:$8 sps:$4 sm:$0xff]  }
   0x3   :  { %209 = vmatpush1.bf16.msra.mxu0 %v404_v1  ;;  %390 = vmatpush1.bf16.msra.mxu1 %v404_v1  ;;  %v411_v6 = vld [vmem:[%s563_s1 + $0x44] ss:$8 sps:$4 sm:$0xff]   ;;  %v413_v7 = vld [vmem:[%s563_s1 + $0x40] ss:$8 sps:$4 sm:$0xff]   ;;  %v414_v8 = vld [vmem:[%s563_s1 + $0x34] ss:$8 sps:$4 sm:$0xff]  }
   0x4   :  { %210 = vmatprep.subr.bf16.mxu0 %v405_v2  ;;  %379 = vmatprep.subr.bf16.mxu1 %v405_v2  ;;  %v416_v9 = vld [vmem:[%s563_s1 + $0x30] ss:$8 sps:$4 sm:$0xff]   ;;  %v417_v10 = vld [vmem:[%s563_s1 + $0x24] ss:$8 sps:$4 sm:$0xff]   ;;  %v443_v12 = vld [vmem:[%s564_s0 + $0x14] ss:$8 sps:$4 sm:$0xff]  }
   0x5   :  { %v440_v11 = vld [vmem:[%s564_s0 + $0x4] ss:$8 sps:$4 sm:$0xff]   ;;  %v419_v13 = vld [vmem:[%s563_s1 + $0x20] ss:$8 sps:$4 sm:$0xff]   ;;  %v420_v14 = vld [vmem:[%s563_s1 + $0x14] ss:$8 sps:$4 sm:$0xff]   ;;  %369 = vmatprep.mubr.msk.bf16.mxu1 %vm201_vm0, %v443_v12 }
   0x6   :  { %368 = vmatprep.mubr.msk.bf16.mxu0 %vm201_vm0, %v440_v11  ;;  %v422_v15 = vld [vmem:[%s563_s1 + $0x10] ss:$8 sps:$4 sm:$0xff]   ;;  %v423_v16 = vld [vmem:[%s563_s1 + $0x4] ss:$8 sps:$4 sm:$0xff]   ;;  %v425_v17 = vld [vmem:[%s563_s1] ss:$8 sps:$4 sm:$0xff]  }
   0x7   :  { %211 = vmatpush1.bf16.msra.mxu0 %v407_v3  ;;  %391 = vmatpush1.bf16.msra.mxu1 %v407_v3  ;;  %v426_v18 = vld [vmem:[%s563_s1 + $0xb4] ss:$8 sps:$4 sm:$0xff]   ;;  %v428_v19 = vld [vmem:[%s563_s1 + $0xb0] ss:$8 sps:$4 sm:$0xff]   ;;  %v429_v20 = vld [vmem:[%s563_s1 + $0xa4] ss:$8 sps:$4 sm:$0xff]  }
   0x8   :  { %212 = vmatprep.subr.bf16.mxu0 %v408_v4  ;;  %380 = vmatprep.subr.bf16.mxu1 %v408_v4  ;;  %v431_v21 = vld [vmem:[%s563_s1 + $0xa0] ss:$8 sps:$4 sm:$0xff]   ;;  %v432_v22 = vld [vmem:[%s563_s1 + $0x94] ss:$8 sps:$4 sm:$0xff]   ;;  %v434_v23 = vld [vmem:[%s563_s1 + $0x90] ss:$8 sps:$4 sm:$0xff]  }
   0x9   :  { %v435_v24 = vld [vmem:[%s563_s1 + $0x84] ss:$8 sps:$4 sm:$0xff]   ;;  %v437_v25 = vld [vmem:[%s563_s1 + $0x80] ss:$8 sps:$4 sm:$0xff]   ;;  %v441_v27 = vld [vmem:[%s564_s0 + $0x10] ss:$8 sps:$4 sm:$0xff]  }
   0xa   :  { %v438_v26 = vld [vmem:[%s564_s0] ss:$8 sps:$4 sm:$0xff]   ;;  %v291_v29 = vshrl.u32 %v290_v28, 7 }
   0xb   :  { %213 = vmatpush1.bf16.msra.mxu0 %v410_v5  ;;  %392 = vmatpush1.bf16.msra.mxu1 %v410_v5  ;;  %v288_v32 = vld [vmem:[%s565_s2] sm:$0x3] }
   0xc   :  { %214 = vmatprep.subr.bf16.mxu0 %v411_v6  ;;  %381 = vmatprep.subr.bf16.mxu1 %v411_v6  ;;  %v292_v30 = vsub.s32 0, %v291_v29  ;;  %v296_v31 = vsub.s32 1, %v291_v29 }
   0xe   :  { %v293_v33 = vrot.slane %v288_v32, %v292_v30  ;;  %v297_v34 = vrot.slane %v288_v32, %v296_v31 }
   0xf   :  { %215 = vmatpush1.bf16.msra.mxu0 %v413_v7  ;;  %393 = vmatpush1.bf16.msra.mxu1 %v413_v7 }
  0x10   :  { %216 = vmatprep.subr.bf16.mxu0 %v414_v8  ;;  %382 = vmatprep.subr.bf16.mxu1 %v414_v8 }
  0x13   :  { %217 = vmatpush1.bf16.msra.mxu0 %v416_v9  ;;  %394 = vmatpush1.bf16.msra.mxu1 %v416_v9 }
  0x14   :  { %218 = vmatprep.subr.bf16.mxu0 %v417_v10  ;;  %383 = vmatprep.subr.bf16.mxu1 %v417_v10 }
  0x17   :  { %219 = vmatpush1.bf16.msra.mxu0 %v419_v13  ;;  %395 = vmatpush1.bf16.msra.mxu1 %v419_v13 }
  0x18   :  { %220 = vmatprep.subr.bf16.mxu0 %v420_v14  ;;  %384 = vmatprep.subr.bf16.mxu1 %v420_v14 }
  0x1b   :  { %221 = vmatpush1.bf16.msra.mxu0 %v422_v15  ;;  %396 = vmatpush1.bf16.msra.mxu1 %v422_v15 }
  0x1c   :  { %222 = vmatprep.subr.bf16.mxu0 %v423_v16  ;;  %385 = vmatprep.subr.bf16.mxu1 %v423_v16 }
  0x1f   :  { %223 = vmatpush1.bf16.msra.mxu0 %v425_v17  ;;  %397 = vmatpush1.bf16.msra.mxu1 %v425_v17 }
  0x20   :  { %232 = vmatprep.subr.bf16.mxu0 %v426_v18  ;;  %386 = vmatprep.subr.bf16.mxu1 %v426_v18 }
  0x23   :  { %233 = vmatpush2.bf16.msra.mxu0 %v428_v19  ;;  %398 = vmatpush2.bf16.msra.mxu1 %v428_v19 }
  0x24   :  { %234 = vmatprep.subr.bf16.mxu0 %v429_v20  ;;  %387 = vmatprep.subr.bf16.mxu1 %v429_v20 }
  0x27   :  { %235 = vmatpush2.bf16.msra.mxu0 %v431_v21  ;;  %399 = vmatpush2.bf16.msra.mxu1 %v431_v21 }
  0x28   :  { %236 = vmatprep.subr.bf16.mxu0 %v432_v22  ;;  %388 = vmatprep.subr.bf16.mxu1 %v432_v22 }
  0x2b   :  { %237 = vmatpush2.bf16.msra.mxu0 %v434_v23  ;;  %400 = vmatpush2.bf16.msra.mxu1 %v434_v23 }
  0x2c   :  { %238 = vmatprep.subr.bf16.mxu0 %v435_v24  ;;  %389 = vmatprep.subr.bf16.mxu1 %v435_v24 }
  0x2f   :  { %239 = vmatpush2.bf16.msra.mxu0 %v437_v25  ;;  %401 = vmatpush2.bf16.msra.mxu1 %v437_v25 }
  0x32   :  { %241 = vmatmul.mubr.bf16.vlgmr.msra.gmra.mxu0 %v438_v26  ;;  %251 = vmatmul.mubr.bf16.vlgmr.msra.gmra.mxu1 %v441_v27 }
  0xf2   :  { %v242_v35 = vpop.f32.mrf.mxu0  ;;  %v252_v36 = vpop.f32.mrf.mxu1 }
  0xf3   :  { %v300_v39 = vadd.f32 %v293_v33, %v242_v35  ;;  %v304_v40 = vadd.f32 %v293_v33, %v252_v36 }
  0xf4   :  { %v244_v37 = vpop.f32.mrf.mxu0  ;;  %v254_v38 = vpop.f32.mrf.mxu1 }
  0xf5   :  { %v301_v41 = vadd.f32 %v297_v34, %v244_v37  ;;  %v305_v42 = vadd.f32 %v297_v34, %v254_v38 }
  0xf6   :  { %v246_v43 = vpop.f32.mrf.mxu0  ;;  %v256_v44 = vpop.f32.mrf.mxu1 }
  0xf7   :  { %v374_v45 = vpack.c.bf16 %v301_v41, %v300_v39  ;;  %v376_v46 = vpack.c.bf16 %v305_v42, %v304_v40  ;;  %v302_v49 = vadd.f32 %v293_v33, %v246_v43  ;;  %v306_v50 = vadd.f32 %v293_v33, %v256_v44 }
  0xf8   :  { %v248_v47 = vpop.f32.mrf.mxu0  ;;  %v258_v48 = vpop.f32.mrf.mxu1 }
  0xf9   :  { %332 = vst [vmem:[%s566_s3] sm:$0xff] %v374_v45  ;;  %334 = vst [vmem:[%s566_s3 + $0x10] sm:$0xff] %v376_v46  ;;  %v303_v51 = vadd.f32 %v297_v34, %v248_v47  ;;  %v307_v52 = vadd.f32 %v297_v34, %v258_v48 }
  0xfb   :  { %v375_v53 = vpack.c.bf16 %v303_v51, %v302_v49  ;;  %v377_v54 = vpack.c.bf16 %v307_v52, %v306_v50 }
  0xfd   :  { %333 = vst [vmem:[%s566_s3 + $0x8] sm:$0xff] %v375_v53  ;;  %335 = vst [vmem:[%s566_s3 + $0x18] sm:$0xff] %v377_v54 }

// kernel: clip_vision_tower_forward.14
= control target key start
LH: loop header
LB: loop body
LE: loop exit
PB: predicated region body
PF: predicated region fallthrough
CT: control target
= control target key end

     0   :  { %s1394_s18 = smov 0   ;;  %s1396_s19 = smov 0   ;;  %s1683_s0 = inlined_call_operand.vmem [shape: f32[34,256], index: 0, kind: input, shape index: {}]   ;;  %s1684_s1 = inlined_call_operand.vmem [shape: f32[1,256], index: 1, kind: input, shape index: {}]   ;;  %s1685_s2 = inlined_call_operand.vmem [shape: f32[1,256], index: 2, kind: input, shape index: {}]   ;;  %s1686_s3 = inlined_call_operand.vmem [shape: bf16[256,768], index: 3, kind: input, shape index: {}]   ;;  %s1687_s4 = inlined_call_operand.vmem [shape: f32[1,768], index: 4, kind: input, shape index: {}]   ;;  %s1688_s5 = inlined_call_operand.vmem [shape: bf16[34,768], index: 5, kind: output, shape index: {}]  }
   0x1   :  { %s1398_s20 = smov 0   ;;  %s1400_s21 = smov 0  }
   0x2   :  { %s1402_s22 = smov 0  }
   0x3 LB: > { %s24_s23 = sadd.s32 1, %s1358_s21  ;;  %s1109_s24 = sadd.s32 4294967295, %s1362_s22   ;;  %s1362_s22 = sphi %s1402_s22, %s15_s22   ;;  %s1358_s21 = sphi %s1400_s21, %s1693_s21   ;;  %s1354_s20 = sphi %s1398_s20, %s1692_s20   ;;  %s1350_s19 = sphi %s1396_s19, %s1691_s19   ;;  %s1346_s18 = sphi %s1394_s18, %s1690_s18  }
   0x4   : > { %p25_p0 = scmp.ge.s32.totalorder %s24_s23, 3  ;;  %p109_p1 = scmp.ne.s32.totalorder %s1350_s19, %s1346_s18 }
   0x5   : > { %p110_p2 = scmp.eq.s32.totalorder %s1362_s22, 0  ;;  %p167_p4 = scmp.eq.s32.totalorder %s1109_s24, 2 }
   0x6   : > { %s1695_s23 = smov (%p25_p0, %s24_s23), 0  ;;  %s102_s26 = sadd.s32 1, %s1350_s19 }
   0x7   : > { %p111_p3 = por %p110_p2, %p109_p1  ;;  %s99_s25 = ssub.s32 %s1358_s21, %s1695_s23 }
   0x8   : > { %p100_p5 = scmp.eq.s32.totalorder %s99_s25, 0  ;;  %p1429_p6 = por %p167_p4, %p109_p1 }
   0x9   : > { %p1113_p7 = scmp.ge.s32.totalorder %s1362_s22, 3 }
   0xa   : > { %s1434_s28 = scalar_select %p100_p5, %s1350_s19, %s102_s26  }
   0xb   : > { %205 = sbr.rel (%p1113_p7) target bundleno = 36 (0x24), region = 28 }
  0x10   : > { %208 = sbr.rel (!%p111_p3) target bundleno = 36 (0x24), region = 32  ;;  %s210_s29 = sand.u32 (%p111_p3), 1, %s1350_s19  }
  0x11   : > { %s1173_s30 = sshll.u32 (%p111_p3), %s1358_s21, 3  ;;  %s1114_s6 = sshll.u32 (%p111_p3), %s210_s29, 8 }
  0x12   : > { %s1442_s9 = scalar_lea.vmem (%p111_p3), %s1686_s3, %s1173_s30  ;;  %s1447_s10 = scalar_lea.vmem (%p111_p3), [#allocation3], %s1114_s6 }
  0x13   : > { %v306_v0 = vld [vmem:[%s1442_s9] sm:$0xff] (%p111_p3)  ;;  %v308_v1 = vld [vmem:[%s1442_s9 + $0x18] sm:$0xff] (%p111_p3)  ;;  %v310_v2 = vld [vmem:[%s1442_s9 + $0x30] sm:$0xff] (%p111_p3) }
  0x14   : > { %307 = vst [vmem:[%s1447_s10] sm:$0xff] (%p111_p3), %v306_v0  ;;  %309 = vst [vmem:[%s1447_s10 + $0x8] sm:$0xff] (%p111_p3), %v308_v1  ;;  %v312_v3 = vld [vmem:[%s1442_s9 + $0x48] sm:$0xff] (%p111_p3)  ;;  %v314_v4 = vld [vmem:[%s1442_s9 + $0x60] sm:$0xff] (%p111_p3) }
  0x15   : > { %311 = vst [vmem:[%s1447_s10 + $0x10] sm:$0xff] %v310_v2  ;;  %v316_v5 = vld [vmem:[%s1442_s9 + $0x78] sm:$0xff]  ;;  %313 = vst [vmem:[%s1447_s10 + $0x18] sm:$0xff] %v312_v3  ;;  %v318_v6 = vld [vmem:[%s1442_s9 + $0x90] sm:$0xff] }
  0x16   : > { %315 = vst [vmem:[%s1447_s10 + $0x20] sm:$0xff] %v314_v4  ;;  %317 = vst [vmem:[%s1447_s10 + $0x28] sm:$0xff] %v316_v5  ;;  %v320_v7 = vld [vmem:[%s1442_s9 + $0xa8] sm:$0xff]  ;;  %v322_v8 = vld [vmem:[%s1442_s9 + $0xc0] sm:$0xff] }
  0x17   : > { %319 = vst [vmem:[%s1447_s10 + $0x30] sm:$0xff] %v318_v6  ;;  %321 = vst [vmem:[%s1447_s10 + $0x38] sm:$0xff] %v320_v7  ;;  %v324_v9 = vld [vmem:[%s1442_s9 + $0xd8] sm:$0xff]  ;;  %v326_v10 = vld [vmem:[%s1442_s9 + $0xf0] sm:$0xff] }
  0x18   : > { %323 = vst [vmem:[%s1447_s10 + $0x40] sm:$0xff] %v322_v8  ;;  %v328_v11 = vld [vmem:[%s1442_s9 + $0x108] sm:$0xff]  ;;  %325 = vst [vmem:[%s1447_s10 + $0x48] sm:$0xff] %v324_v9  ;;  %v330_v12 = vld [vmem:[%s1442_s9 + $0x120] sm:$0xff] }
  0x19   : > { %327 = vst [vmem:[%s1447_s10 + $0x50] sm:$0xff] %v326_v10  ;;  %329 = vst [vmem:[%s1447_s10 + $0x58] sm:$0xff] %v328_v11  ;;  %v332_v13 = vld [vmem:[%s1442_s9 + $0x138] sm:$0xff]  ;;  %v334_v14 = vld [vmem:[%s1442_s9 + $0x150] sm:$0xff] }
  0x1a   : > { %331 = vst [vmem:[%s1447_s10 + $0x60] sm:$0xff] %v330_v12  ;;  %333 = vst [vmem:[%s1447_s10 + $0x68] sm:$0xff] %v332_v13  ;;  %v336_v15 = vld [vmem:[%s1442_s9 + $0x168] sm:$0xff]  ;;  %v338_v16 = vld [vmem:[%s1442_s9 + $0x180] sm:$0xff] }
  0x1b   : > { %335 = vst [vmem:[%s1447_s10 + $0x70] sm:$0xff] %v334_v14  ;;  %v340_v17 = vld [vmem:[%s1442_s9 + $0x198] sm:$0xff]  ;;  %337 = vst [vmem:[%s1447_s10 + $0x78] sm:$0xff] %v336_v15  ;;  %v342_v18 = vld [vmem:[%s1442_s9 + $0x1b0] sm:$0xff] }
  0x1c   : > { %339 = vst [vmem:[%s1447_s10 + $0x80] sm:$0xff] %v338_v16  ;;  %341 = vst [vmem:[%s1447_s10 + $0x88] sm:$0xff] %v340_v17  ;;  %v344_v19 = vld [vmem:[%s1442_s9 + $0x1c8] sm:$0xff]  ;;  %v346_v20 = vld [vmem:[%s1442_s9 + $0x1e0] sm:$0xff] }
  0x1d   : > { %343 = vst [vmem:[%s1447_s10 + $0x90] sm:$0xff] %v342_v18  ;;  %345 = vst [vmem:[%s1447_s10 + $0x98] sm:$0xff] %v344_v19  ;;  %v348_v21 = vld [vmem:[%s1442_s9 + $0x1f8] sm:$0xff]  ;;  %v350_v22 = vld [vmem:[%s1442_s9 + $0x210] sm:$0xff] }
  0x1e   : > { %347 = vst [vmem:[%s1447_s10 + $0xa0] sm:$0xff] %v346_v20  ;;  %v352_v23 = vld [vmem:[%s1442_s9 + $0x228] sm:$0xff]  ;;  %349 = vst [vmem:[%s1447_s10 + $0xa8] sm:$0xff] %v348_v21  ;;  %v354_v24 = vld [vmem:[%s1442_s9 + $0x240] sm:$0xff] }
  0x1f   : > { %351 = vst [vmem:[%s1447_s10 + $0xb0] sm:$0xff] %v350_v22  ;;  %353 = vst [vmem:[%s1447_s10 + $0xb8] sm:$0xff] %v352_v23  ;;  %v356_v25 = vld [vmem:[%s1442_s9 + $0x258] sm:$0xff]  ;;  %v358_v26 = vld [vmem:[%s1442_s9 + $0x270] sm:$0xff] }
  0x20   : > { %355 = vst [vmem:[%s1447_s10 + $0xc0] sm:$0xff] %v354_v24  ;;  %357 = vst [vmem:[%s1447_s10 + $0xc8] sm:$0xff] %v356_v25  ;;  %v360_v27 = vld [vmem:[%s1442_s9 + $0x288] sm:$0xff]  ;;  %v362_v28 = vld [vmem:[%s1442_s9 + $0x2a0] sm:$0xff] }
  0x21   : > { %359 = vst [vmem:[%s1447_s10 + $0xd0] sm:$0xff] %v358_v26  ;;  %v364_v29 = vld [vmem:[%s1442_s9 + $0x2b8] sm:$0xff]  ;;  %361 = vst [vmem:[%s1447_s10 + $0xd8] sm:$0xff] %v360_v27  ;;  %v366_v30 = vld [vmem:[%s1442_s9 + $0x2d0] sm:$0xff] }
  0x22   : > { %363 = vst [vmem:[%s1447_s10 + $0xe0] sm:$0xff] %v362_v28  ;;  %365 = vst [vmem:[%s1447_s10 + $0xe8] sm:$0xff] %v364_v29  ;;  %v368_v31 = vld [vmem:[%s1442_s9 + $0x2e8] sm:$0xff] }
  0x23   : > { %367 = vst [vmem:[%s1447_s10 + $0xf0] sm:$0xff] %v366_v30  ;;  %369 = vst [vmem:[%s1447_s10 + $0xf8] sm:$0xff] %v368_v31 }
  0x24 PF: > { %p1117_p8 = scmp.ge.s32.totalorder %s1362_s22, 1  ;;  %p382_p9 = scmp.lt.s32.totalorder %s1362_s22, 4 }
  0x26   : > { %p383_p10 = pnand %p1117_p8, %p382_p9 }
  0x27   : > { %s389_s11 = sand.u32 (!%p383_p10), 1, %s1346_s18   ;;  %s1119_s12 = sshll.u32 (!%p383_p10), %s1354_s20, 1 }
  0x28   : > { %386 = sbr.rel (%p383_p10) target bundleno = 655 (0x28f), region = 74  ;;  %s1118_s13 = sshll.u32 (!%p383_p10), %s389_s11, 8 }
  0x29   : > { %s1217_s14 = smul.u32 (!%p383_p10), 40, %s389_s11  ;;  %p434_p11 = scmp.lt.s32.totalorder (!%p383_p10), %s1119_s12, 5 }
  0x2a   : > { %s1520_s24 = scalar_lea.vmem (!%p383_p10), [#allocation3], %s1118_s13  ;;  %p1120_p12 = scmp.ne.s32.totalorder (!%p383_p10), %s1354_s20, 0 }
  0x2b   : > { %s1522_s25 = scalar_lea.vmem (!%p383_p10), [#allocation4], %s1217_s14 }
  0x2d   : > { %s1697_s12 = smov (!%p434_p11, %s1119_s12), 5  ;;  %443 = sbr.rel (%p1120_p12) target bundleno = 374 (0x176), region = 82 }
  0x2e   : > { %s436_s17 = scalar_lea.vmem %s1687_s4, %s1697_s12 }
  0x32   : > { %v446_v32 = vld [vmem:[%s1683_s0 + $0x10] sm:$0xff]  ;;  %v447_v33 = vld [vmem:[%s1683_s0 + $0x18] sm:$0xff]  ;;  %v444_v34 = vld [vmem:[%s1683_s0] sm:$0xff]  ;;  %vm466_vm0 = vcmask 1041408   ;;  %v542_v28 = vlaneseq }
  0x33   : > { %v457_v35 = vadd.f32 %v447_v33, %v446_v32  ;;  %v445_v36 = vld [vmem:[%s1683_s0 + $0x8] sm:$0xff]  ;;  %v448_v37 = vld [vmem:[%s1683_s0 + $0x20] sm:$0xff]  ;;  %v450_v46 = vld [vmem:[%s1683_s0 + $0x30] sm:$0xff] }
  0x34   : > { %v449_v38 = vld [vmem:[%s1683_s0 + $0x28] sm:$0xff]  ;;  %v454_v39 = vadd.f32 %v445_v36, %v444_v34  ;;  %v452_v40 = vld [vmem:[%s1683_s0 + $0x40] sm:$0x3]  ;;  %v451_v47 = vld [vmem:[%s1683_s0 + $0x38] sm:$0xff] }
  0x35   : > { %v453_v41 = vld [vmem:[%s1683_s0 + $0x48] sm:$0x3]  ;;  %458 = vadd.xlane.f32.xlu1 %v457_v35  ;;  %v460_v42 = vadd.f32 %v449_v38, %v448_v37  ;;  %v467_v43 = vsel %vm466_vm0, %v452_v40, 0.0  ;;  %v463_v48 = vadd.f32 %v451_v47, %v450_v46 }
  0x36   : > { %v468_v44 = vsel %vm466_vm0, %v453_v41, 0.0  ;;  %455 = vadd.xlane.f32.xlu0 %v454_v39 }
  0x37   : > { %v469_v45 = vadd.f32 %v468_v44, %v467_v43 }
  0x39   : > { %461 = vadd.xlane.f32.xlu1 %v460_v42  ;;  %v562_v42 = vld [vmem:[%s1685_s2] sm:$0x3] }
  0x3a   : > { %470 = vadd.xlane.f32.xlu0 %v469_v45 }
  0x3e   : > { %464 = vadd.xlane.f32.xlu0 %v463_v48 }
  0xbe   : > { %v459_v49 = vpop.xlane.xlu1 %458 }
  0xbf   : > { %v474_v50 = vmul.f32 0.00390625, %v459_v49  ;;  %v456_v51 = vpop.xlane.xlu0 %455 }
  0xc0   : > { %v473_v52 = vmul.f32 0.00390625, %v456_v51 }
  0xc1   : > { %v1557_v53 = vsub.f32 %v446_v32, %v474_v50  ;;  %v1559_v54 = vsub.f32 %v447_v33, %v474_v50  ;;  %v543_v32 = vshrl.u32 %v542_v28, 7 }
  0xc2   : > { %v1561_v55 = vsub.f32 %v444_v34, %v473_v52  ;;  %v1563_v56 = vsub.f32 %v445_v36, %v473_v52  ;;  %v462_v57 = vpop.xlane.xlu1 %461 }
  0xc3   : > { %v475_v58 = vmul.f32 0.00390625, %v462_v57  ;;  %v471_v59 = vpop.xlane.xlu0 %470  ;;  %v490_v60 = vmul.f32 %v1557_v53, %v1557_v53  ;;  %v491_v61 = vmul.f32 %v1559_v54, %v1559_v54  ;;  %v544_v39 = vsub.s32 0, %v543_v32 }
  0xc4   : > { %v477_v62 = vmul.f32 0.00390625, %v471_v59  ;;  %v488_v63 = vmul.f32 %v1561_v55, %v1561_v55  ;;  %v489_v0 = vmul.f32 %v1563_v56, %v1563_v56 }
  0xc5   : > { %v1573_v1 = vsub.f32 %v448_v37, %v475_v58  ;;  %v1575_v2 = vsub.f32 %v449_v38, %v475_v58  ;;  %v501_v3 = vadd.f32 %v491_v61, %v490_v60 }
  0xc6   : > { %v1577_v4 = vsub.f32 %v452_v40, %v477_v62  ;;  %v1579_v5 = vsub.f32 %v453_v41, %v477_v62  ;;  %v498_v6 = vadd.f32 %v489_v0, %v488_v63  ;;  %v548_v40 = vsub.s32 1, %v543_v32  ;;  %v540_v41 = vld [vmem:[%s1684_s1] sm:$0x3] }
  0xc7   : > { %v465_v7 = vpop.xlane.xlu0 %464  ;;  %502 = vadd.xlane.f32.xlu0 %v501_v3  ;;  %v492_v8 = vmul.f32 %v1573_v1, %v1573_v1  ;;  %v493_v9 = vmul.f32 %v1575_v2, %v1575_v2  ;;  %v545_v43 = vrot.slane %v540_v41, %v544_v39 }
  0xc8   : > { %v476_v10 = vmul.f32 0.00390625, %v465_v7  ;;  %499 = vadd.xlane.f32.xlu1 %v498_v6  ;;  %v496_v11 = vmul.f32 %v1577_v4, %v1577_v4  ;;  %v497_v12 = vmul.f32 %v1579_v5, %v1579_v5  ;;  %v549_v44 = vrot.slane %v540_v41, %v548_v40 }
  0xc9   : > { %v504_v13 = vadd.f32 %v493_v9, %v492_v8  ;;  %v571_v48 = vrot.slane %v562_v42, %v548_v40 }
  0xca   : > { %v1589_v14 = vsub.f32 %v450_v46, %v476_v10  ;;  %v1591_v15 = vsub.f32 %v451_v47, %v476_v10  ;;  %v510_v16 = vsel %vm466_vm0, %v496_v11, 0.0  ;;  %v511_v17 = vsel %vm466_vm0, %v497_v12, 0.0 }
  0xcb   : > { %v512_v20 = vadd.f32 %v511_v17, %v510_v16  ;;  %v567_v47 = vrot.slane %v562_v42, %v544_v39 }
  0xcc   : > { %505 = vadd.xlane.f32.xlu1 %v504_v13  ;;  %v494_v18 = vmul.f32 %v1589_v14, %v1589_v14  ;;  %v495_v19 = vmul.f32 %v1591_v15, %v1591_v15 }
  0xce   : > { %v507_v21 = vadd.f32 %v495_v19, %v494_v18 }
  0xd0   : > { %513 = vadd.xlane.f32.xlu1 %v512_v20  ;;  %508 = vadd.xlane.f32.xlu0 %v507_v21 }
 0x150   : > { %v503_v22 = vpop.xlane.xlu0 %502 }
 0x151   : > { %v500_v23 = vpop.xlane.xlu1 %499  ;;  %v516_v24 = vmul.f32 0.00390625, %v503_v22 }
 0x152   : > { %v515_v25 = vmul.f32 0.00390625, %v500_v23 }
 0x153   : > { %v521_v26 = vadd.f32 1e-05, %v516_v24 }
 0x154   : > { %v520_v27 = vadd.f32 1e-05, %v515_v25 }
 0x155   : > { %1258 = vrsqrt.f32 %v521_v26  ;;  %v506_v29 = vpop.xlane.xlu1 %505 }
 0x156   : > { %1260 = vrsqrt.f32 %v520_v27  ;;  %v517_v30 = vmul.f32 0.00390625, %v506_v29 }
 0x158   : > { %v522_v31 = vadd.f32 1e-05, %v517_v30 }
 0x159   : > { %v514_v33 = vpop.xlane.xlu1 %513  ;;  %v509_v34 = vpop.xlane.xlu0 %508 }
 0x15a   : > { %1262 = vrsqrt.f32 %v522_v31  ;;  %v519_v35 = vmul.f32 0.00390625, %v514_v33  ;;  %v518_v36 = vmul.f32 0.00390625, %v509_v34 }
 0x15c   : > { %v524_v37 = vadd.f32 1e-05, %v519_v35  ;;  %v523_v38 = vadd.f32 1e-05, %v518_v36 }
 0x15e   : > { %1264 = vrsqrt.f32 %v524_v37 }
 0x15f   : > { %1266 = vrsqrt.f32 %v523_v38 }
 0x162   : > { %v1259_v45 = vpop.eup %1258 }
 0x163   : > { %v1261_v46 = vpop.eup %1260  ;;  %v532_v49 = vmul.f32 %v1259_v45, %v1557_v53  ;;  %v533_v50 = vmul.f32 %v1259_v45, %v1559_v54 }
 0x164   : > { %v530_v51 = vmul.f32 %v1261_v46, %v1561_v55  ;;  %v531_v52 = vmul.f32 %v1261_v46, %v1563_v56 }
 0x165   : > { %v554_v57 = vmul.f32 %v545_v43, %v532_v49  ;;  %v555_v58 = vmul.f32 %v549_v44, %v533_v50 }
 0x166   : > { %v552_v59 = vmul.f32 %v545_v43, %v530_v51  ;;  %v553_v60 = vmul.f32 %v549_v44, %v531_v52 }
 0x167   : > { %v1263_v61 = vpop.eup %1262  ;;  %v576_v62 = vadd.f32 %v567_v47, %v554_v57  ;;  %v577_v63 = vadd.f32 %v571_v48, %v555_v58 }
 0x168   : > { %v574_v0 = vadd.f32 %v567_v47, %v552_v59  ;;  %v575_v3 = vadd.f32 %v571_v48, %v553_v60  ;;  %v534_v6 = vmul.f32 %v1263_v61, %v1573_v1  ;;  %v535_v7 = vmul.f32 %v1263_v61, %v1575_v2 }
 0x169   : > { %v1175_v53 = vpack.c.bf16 %v577_v63, %v576_v62 }
 0x16a   : > { %v1174_v8 = vpack.c.bf16 %v575_v3, %v574_v0  ;;  %v556_v54 = vmul.f32 %v545_v43, %v534_v6  ;;  %v557_v9 = vmul.f32 %v549_v44, %v535_v7 }
 0x16b   : > { %v1265_v55 = vpop.eup %1264  ;;  %617 = vst [vmem:[#allocation2] sm:$0xff] %v1175_v53 }
 0x16c   : > { %v1267_v56 = vpop.eup %1266  ;;  %616 = vst [vmem:[#allocation2 + $0x8] sm:$0xff] %v1174_v8  ;;  %v578_v10 = vadd.f32 %v567_v47, %v556_v54  ;;  %v579_v11 = vadd.f32 %v571_v48, %v557_v9  ;;  %v538_v12 = vmul.f32 %v1265_v55, %v1577_v4  ;;  %v539_v13 = vmul.f32 %v1265_v55, %v1579_v5 }
 0x16d   : > { %v536_v16 = vmul.f32 %v1267_v56, %v1589_v14  ;;  %v537_v1 = vmul.f32 %v1267_v56, %v1591_v15 }
 0x16e   : > { %v1176_v17 = vpack.c.bf16 %v579_v11, %v578_v10  ;;  %v560_v2 = vmul.f32 %v545_v43, %v538_v12  ;;  %v561_v18 = vmul.f32 %v549_v44, %v539_v13 }
 0x16f   : > { %v558_v19 = vmul.f32 %v545_v43, %v536_v16  ;;  %v559_v20 = vmul.f32 %v549_v44, %v537_v1 }
 0x170   : > { %618 = vst [vmem:[#allocation2 + $0x20] sm:$0xff] %v1176_v17  ;;  %v582_v21 = vadd.f32 %v567_v47, %v560_v2  ;;  %v583_v22 = vadd.f32 %v571_v48, %v561_v18 }
 0x171   : > { %v580_v23 = vadd.f32 %v567_v47, %v558_v19  ;;  %v581_v24 = vadd.f32 %v571_v48, %v559_v20 }
 0x172   : > { %v1178_v25 = vpack.c.bf16 %v583_v22, %v582_v21 }
 0x173   : > { %v1177_v26 = vpack.c.bf16 %v581_v24, %v580_v23 }
 0x174   : > { %620 = vst [vmem:[#allocation2 + $0x18] sm:$0x11] %v1178_v25 }
 0x175   : > { %619 = vst [vmem:[#allocation2 + $0x10] sm:$0xff] %v1177_v26 }
 0x176 PF: > { %v1268_v4 = vld [vmem:[%s1520_s24 + $0x74] ss:$8 sps:$4 sm:$0xff]   ;;  %v1270_v5 = vld [vmem:[%s1520_s24 + $0x70] ss:$8 sps:$4 sm:$0xff]   ;;  %v1271_v14 = vld [vmem:[%s1520_s24 + $0x64] ss:$8 sps:$4 sm:$0xff]   ;;  %v660_v6 = vlaneseq }
 0x177   : > { %857 = vmatprep.subr.bf16.mxu0 %v1268_v4  ;;  %1185 = vmatprep.subr.bf16.mxu1 %v1268_v4  ;;  %v1273_v15 = vld [vmem:[%s1520_s24 + $0x60] ss:$8 sps:$4 sm:$0xff]   ;;  %v1274_v27 = vld [vmem:[%s1520_s24 + $0x54] ss:$8 sps:$4 sm:$0xff]   ;;  %v1276_v28 = vld [vmem:[%s1520_s24 + $0x50] ss:$8 sps:$4 sm:$0xff]  }
 0x178   : > { %858 = vmatpush1.bf16.msra.mxu0 %v1270_v5  ;;  %1201 = vmatpush1.bf16.msra.mxu1 %v1270_v5  ;;  %v1277_v29 = vld [vmem:[%s1520_s24 + $0x44] ss:$8 sps:$4 sm:$0xff]   ;;  %v1279_v30 = vld [vmem:[%s1520_s24 + $0x40] ss:$8 sps:$4 sm:$0xff]   ;;  %v1280_v31 = vld [vmem:[%s1520_s24 + $0x34] ss:$8 sps:$4 sm:$0xff]  }
 0x179   : > { %859 = vmatprep.subr.bf16.mxu0 %v1271_v14  ;;  %1186 = vmatprep.subr.bf16.mxu1 %v1271_v14  ;;  %v1282_v32 = vld [vmem:[%s1520_s24 + $0x30] ss:$8 sps:$4 sm:$0xff]   ;;  %v1283_v33 = vld [vmem:[%s1520_s24 + $0x24] ss:$8 sps:$4 sm:$0xff]   ;;  %v1285_v34 = vld [vmem:[%s1520_s24 + $0x20] ss:$8 sps:$4 sm:$0xff]  }
 0x17a   : > { %v1286_v35 = vld [vmem:[%s1520_s24 + $0x14] ss:$8 sps:$4 sm:$0xff]   ;;  %v1288_v37 = vld [vmem:[%s1520_s24 + $0x10] ss:$8 sps:$4 sm:$0xff]   ;;  %v1289_v39 = vld [vmem:[%s1520_s24 + $0x4] ss:$8 sps:$4 sm:$0xff]  }
 0x17b   : > { %v1318_v36 = vld [vmem:[#allocation2 + $0xc] ss:$-8 sps:$4 sm:$0xff]   ;;  %v1291_v40 = vld [vmem:[%s1520_s24] ss:$8 sps:$4 sm:$0xff]   ;;  %v1294_v42 = vld [vmem:[%s1520_s24 + $0xf0] ss:$8 sps:$4 sm:$0xff]  }
 0x17c   : > { %860 = vmatpush1.bf16.msra.mxu0 %v1273_v15  ;;  %1202 = vmatpush1.bf16.msra.mxu1 %v1273_v15  ;;  %v1321_v38 = vld [vmem:[#allocation2 + $0x24] ss:$-16 sps:$4 sm:$0xff]   ;;  %v1297_v44 = vld [vmem:[%s1520_s24 + $0xe0] ss:$8 sps:$4 sm:$0xff]   ;;  %v1300_v46 = vld [vmem:[%s1520_s24 + $0xd0] ss:$8 sps:$4 sm:$0xff]  }
 0x17d   : > { %861 = vmatprep.subr.bf16.mxu0 %v1274_v27  ;;  %1187 = vmatprep.subr.bf16.mxu1 %v1274_v27  ;;  %v1292_v41 = vld [vmem:[%s1520_s24 + $0xf4] ss:$8 sps:$4 sm:$0xff]   ;;  %v1295_v43 = vld [vmem:[%s1520_s24 + $0xe4] ss:$8 sps:$4 sm:$0xff]   ;;  %v1303_v48 = vld [vmem:[%s1520_s24 + $0xc0] ss:$8 sps:$4 sm:$0xff]  }
 0x17e   : > { %889 = vmatprep.mubr.bf16.mxu0 %v1318_v36  ;;  %899 = vmatprep.mubr.bf16.mxu1 %v1321_v38  ;;  %v1298_v45 = vld [vmem:[%s1520_s24 + $0xd4] ss:$8 sps:$4 sm:$0xff]   ;;  %v1301_v47 = vld [vmem:[%s1520_s24 + $0xc4] ss:$8 sps:$4 sm:$0xff]   ;;  %v1306_v50 = vld [vmem:[%s1520_s24 + $0xb0] ss:$8 sps:$4 sm:$0xff]  }
 0x17f   : > { %v1304_v49 = vld [vmem:[%s1520_s24 + $0xb4] ss:$8 sps:$4 sm:$0xff]   ;;  %v1307_v51 = vld [vmem:[%s1520_s24 + $0xa4] ss:$8 sps:$4 sm:$0xff]   ;;  %v1309_v52 = vld [vmem:[%s1520_s24 + $0xa0] ss:$8 sps:$4 sm:$0xff]  }
 0x180   : > { %862 = vmatpush1.bf16.msra.mxu0 %v1276_v28  ;;  %1203 = vmatpush1.bf16.msra.mxu1 %v1276_v28  ;;  %v1310_v57 = vld [vmem:[%s1520_s24 + $0x94] ss:$8 sps:$4 sm:$0xff]   ;;  %v1312_v58 = vld [vmem:[%s1520_s24 + $0x90] ss:$8 sps:$4 sm:$0xff]   ;;  %v1313_v59 = vld [vmem:[%s1520_s24 + $0x84] ss:$8 sps:$4 sm:$0xff]  }
 0x181   : > { %863 = vmatprep.subr.bf16.mxu0 %v1277_v29  ;;  %1188 = vmatprep.subr.bf16.mxu1 %v1277_v29  ;;  %v1315_v60 = vld [vmem:[%s1520_s24 + $0x80] ss:$8 sps:$4 sm:$0xff]   ;;  %v625_v61 = vld [vmem:[#allocation2 + $0x18] sm:$0x11]  ;;  %v661_v7 = vshrl.u32 %v660_v6, 7  ;;  %s1184_s12 = sshll.u32 (%p1429_p6), %s1354_s20, 3 }
 0x182   : > { %v1316_v62 = vld [vmem:[#allocation2 + $0x8] ss:$-8 sps:$4 sm:$0xff]   ;;  %v1131_v0 = vcombine.high %v625_v61, %v625_v61  ;;  %v1130_v3 = vcombine.low %v625_v61, %v625_v61  ;;  %s967_s15 = scalar_lea.vmem (%p1429_p6), %s1688_s5, %s1184_s12 }
 0x183   : > { %v1319_v63 = vld [vmem:[#allocation2 + $0x20] ss:$-16 sps:$4 sm:$0xff]   ;;  %v662_v53 = vsub.s32 0, %v661_v7  ;;  %v666_v8 = vsub.s32 1, %v661_v7 }
 0x184   : > { %864 = vmatpush1.bf16.msra.mxu0 %v1279_v30  ;;  %1204 = vmatpush1.bf16.msra.mxu1 %v1279_v30  ;;  %v658_v54 = vld [vmem:[%s436_s17] sm:$0x3] }
 0x185   : > { %865 = vmatprep.subr.bf16.mxu0 %v1280_v31  ;;  %1189 = vmatprep.subr.bf16.mxu1 %v1280_v31  ;;  %v663_v9 = vrot.slane %v658_v54, %v662_v53  ;;  %v667_v55 = vrot.slane %v658_v54, %v666_v8 }
 0x188   : > { %866 = vmatpush1.bf16.msra.mxu0 %v1282_v32  ;;  %1205 = vmatpush1.bf16.msra.mxu1 %v1282_v32 }
 0x189   : > { %867 = vmatprep.subr.bf16.mxu0 %v1283_v33  ;;  %1190 = vmatprep.subr.bf16.mxu1 %v1283_v33 }
 0x18c   : > { %868 = vmatpush1.bf16.msra.mxu0 %v1285_v34  ;;  %1206 = vmatpush1.bf16.msra.mxu1 %v1285_v34 }
 0x18d   : > { %869 = vmatprep.subr.bf16.mxu0 %v1286_v35  ;;  %1191 = vmatprep.subr.bf16.mxu1 %v1286_v35 }
 0x190   : > { %870 = vmatpush1.bf16.msra.mxu0 %v1288_v37  ;;  %1207 = vmatpush1.bf16.msra.mxu1 %v1288_v37 }
 0x191   : > { %871 = vmatprep.subr.bf16.mxu0 %v1289_v39  ;;  %1192 = vmatprep.subr.bf16.mxu1 %v1289_v39 }
 0x194   : > { %872 = vmatpush1.bf16.msra.mxu0 %v1291_v40  ;;  %1208 = vmatpush1.bf16.msra.mxu1 %v1291_v40 }
 0x195   : > { %873 = vmatprep.subr.bf16.mxu0 %v1292_v41  ;;  %1193 = vmatprep.subr.bf16.mxu1 %v1292_v41 }
 0x198   : > { %874 = vmatpush2.bf16.msra.mxu0 %v1294_v42  ;;  %1209 = vmatpush2.bf16.msra.mxu1 %v1294_v42 }
 0x199   : > { %875 = vmatprep.subr.bf16.mxu0 %v1295_v43  ;;  %1194 = vmatprep.subr.bf16.mxu1 %v1295_v43 }
 0x19c   : > { %876 = vmatpush2.bf16.msra.mxu0 %v1297_v44  ;;  %1210 = vmatpush2.bf16.msra.mxu1 %v1297_v44 }
 0x19d   : > { %877 = vmatprep.subr.bf16.mxu0 %v1298_v45  ;;  %1195 = vmatprep.subr.bf16.mxu1 %v1298_v45 }
 0x1a0   : > { %878 = vmatpush2.bf16.msra.mxu0 %v1300_v46  ;;  %1211 = vmatpush2.bf16.msra.mxu1 %v1300_v46 }
 0x1a1   : > { %879 = vmatprep.subr.bf16.mxu0 %v1301_v47  ;;  %1196 = vmatprep.subr.bf16.mxu1 %v1301_v47 }
 0x1a4   : > { %880 = vmatpush2.bf16.msra.mxu0 %v1303_v48  ;;  %1212 = vmatpush2.bf16.msra.mxu1 %v1303_v48 }
 0x1a5   : > { %881 = vmatprep.subr.bf16.mxu0 %v1304_v49  ;;  %1197 = vmatprep.subr.bf16.mxu1 %v1304_v49 }
 0x1a8   : > { %882 = vmatpush2.bf16.msra.mxu0 %v1306_v50  ;;  %1213 = vmatpush2.bf16.msra.mxu1 %v1306_v50 }
 0x1a9   : > { %883 = vmatprep.subr.bf16.mxu0 %v1307_v51  ;;  %1198 = vmatprep.subr.bf16.mxu1 %v1307_v51 }
 0x1ac   : > { %884 = vmatpush2.bf16.msra.mxu0 %v1309_v52  ;;  %1214 = vmatpush2.bf16.msra.mxu1 %v1309_v52 }
 0x1ad   : > { %885 = vmatprep.subr.bf16.mxu0 %v1310_v57  ;;  %1199 = vmatprep.subr.bf16.mxu1 %v1310_v57 }
 0x1b0   : > { %886 = vmatpush2.bf16.msra.mxu0 %v1312_v58  ;;  %1215 = vmatpush2.bf16.msra.mxu1 %v1312_v58 }
 0x1b1   : > { %887 = vmatprep.subr.bf16.mxu0 %v1313_v59  ;;  %1200 = vmatprep.subr.bf16.mxu1 %v1313_v59 }
 0x1b4   : > { %888 = vmatpush2.bf16.msra.mxu0 %v1315_v60  ;;  %1216 = vmatpush2.bf16.msra.mxu1 %v1315_v60 }
 0x1b7   : > { %890 = vmatmul.mubr.bf16.vlgmr.msra.gmra.mxu0 %v1316_v62  ;;  %900 = vmatmul.mubr.bf16.vlgmr.msra.gmra.mxu1 %v1319_v63 }
 0x1b8   : > { %909 = vmatprep.mubr.bf16.mxu1 %v1131_v0 }
 0x1bf   : > { %910 = vmatmul.mubr.bf16.gmra.mxu1 %v1130_v3 }
 0x277   : > { %v891_v56 = vpop.f32.mrf.mxu0  ;;  %v901_v10 = vpop.f32.mrf.mxu1 }
 0x278   : > { %v892_v11 = vadd.f32 %v891_v56, %v663_v9  ;;  %v902_v16 = vadd.f32 %v901_v10, %v663_v9 }
 0x279   : > { %v893_v12 = vpop.f32.mrf.mxu0  ;;  %v903_v13 = vpop.f32.mrf.mxu1 }
 0x27a   : > { %v894_v1 = vadd.f32 %v893_v12, %v667_v55  ;;  %v904_v17 = vadd.f32 %v903_v13, %v667_v55 }
 0x27b   : > { %v895_v2 = vpop.f32.mrf.mxu0  ;;  %v905_v18 = vpop.f32.mrf.mxu1 }
 0x27c   : > { %v1179_v19 = vpack.c.bf16 %v894_v1, %v892_v11  ;;  %v1181_v20 = vpack.c.bf16 %v904_v17, %v902_v16  ;;  %v896_v23 = vadd.f32 %v895_v2, %v663_v9  ;;  %v906_v24 = vadd.f32 %v905_v18, %v663_v9 }
 0x27d   : > { %v897_v21 = vpop.f32.mrf.mxu0  ;;  %v907_v22 = vpop.f32.mrf.mxu1 }
 0x27e   : > { %950 = vst [vmem:[%s1522_s25] sm:$0xff] %v1179_v19  ;;  %952 = vst [vmem:[%s1522_s25 + $0x10] sm:$0xff] %v1181_v20  ;;  %v898_v25 = vadd.f32 %v897_v21, %v667_v55  ;;  %v908_v26 = vadd.f32 %v907_v22, %v667_v55 }
 0x27f   : > { %v911_v4 = vpop.f32.mrf.mxu1 }
 0x280   : > { %v1180_v5 = vpack.c.bf16 %v898_v25, %v896_v23  ;;  %v1182_v14 = vpack.c.bf16 %v908_v26, %v906_v24  ;;  %v912_v27 = vadd.f32 %v911_v4, %v663_v9 }
 0x281   : > { %v913_v15 = vpop.f32.mrf.mxu1 }
 0x282   : > { %951 = vst [vmem:[%s1522_s25 + $0x8] sm:$0xff] %v1180_v5  ;;  %953 = vst [vmem:[%s1522_s25 + $0x18] sm:$0xff] %v1182_v14  ;;  %v914_v28 = vadd.f32 %v913_v15, %v667_v55  ;;  %961 = sbr.rel (!%p1429_p6) target bundleno = 655 (0x28f), region = 86 }
 0x283   : > { %v915_v29 = vpop.f32.mrf.mxu1 }
 0x284   : > { %v1183_v30 = vpack.c.bf16 %v914_v28, %v912_v27 }
 0x285   : > { %v916_v31 = vpop.f32.mrf.mxu1  ;;  %v1004_v32 = vld [vmem:[%s1522_s25] sm:$0xff] (%p1429_p6)  ;;  %v1008_v34 = vld [vmem:[%s1522_s25 + $0x10] sm:$0xff] (%p1429_p6) }
 0x286   : > { %954 = vst [vmem:[%s1522_s25 + $0x20] sm:$0x11] %v1183_v30  ;;  %1005 = vst [vmem:[%s967_s15] sm:$0xff] (%p1429_p6), %v1004_v32 }
 0x287   : > { %1009 = vst [vmem:[%s967_s15 + $0x30] sm:$0xff] %v1008_v34 }
 0x289   : > { %v1006_v33 = vld [vmem:[%s1522_s25 + $0x8] sm:$0xff]  ;;  %v1010_v35 = vld [vmem:[%s1522_s25 + $0x18] sm:$0xff] }
 0x28a   : > { %1007 = vst [vmem:[%s967_s15 + $0x18] sm:$0xff] %v1006_v33  ;;  %1011 = vst [vmem:[%s967_s15 + $0x48] sm:$0xff] %v1010_v35 }
 0x28d   : > { %v1012_v36 = vld [vmem:[%s1522_s25 + $0x20] sm:$0xff] }
 0x28e   : > { %1013 = vst [vmem:[%s967_s15 + $0x60] sm:$0xff] %v1012_v36 }
 0x28f PF: > { %s15_s22 = sadd.s32 1, %s1362_s22   ;;  %s1690_s18 = smov %s1350_s19 }
 0x290   : > { %p12_p13 = scmp.ge.s32.totalorder %s15_s22, 5   ;;  %s1691_s19 = smov %s1434_s28 }
 0x291   : > { %s1692_s20 = smov %s1358_s21  ;;  %s1693_s21 = smov %s1695_s23 }
 0x292   :  { %14 = sbr.rel (!%p12_p13) target bundleno = 3 (0x3), region = 161 }

// kernel: clip_vision_tower_forward.15
= control target key start
LH: loop header
LB: loop body
LE: loop exit
PB: predicated region body
PF: predicated region fallthrough
CT: control target
= control target key end

     0   :  { %s959_s6 = smov 0   ;;  %s961_s7 = smov 0   ;;  %s1129_s0 = inlined_call_operand.vmem [shape: bf16[2,17,768], index: 0, kind: input, shape index: {}]   ;;  %s1130_s1 = inlined_call_operand.vmem [shape: bf16[2,17,256], index: 1, kind: output, shape index: {}]  }
   0x1   :  { %s963_s8 = smov 0   ;;  %s965_s9 = smov 0  }
   0x2   :  { %s967_s10 = smov 0   ;;  %s969_s11 = smov 0  }
   0x3   :  { %s971_s12 = smov 0  }
   0x4 LB: > { %s20_s13 = sadd.s32 1, %s937_s10  ;;  %s23_s14 = sadd.s32 1, %s941_s11  ;;  %s945_s12 = sphi %s971_s12, %s11_s12   ;;  %s941_s11 = sphi %s969_s11, %s1137_s11   ;;  %s937_s10 = sphi %s967_s10, %s1136_s10   ;;  %s933_s9 = sphi %s965_s9, %s1135_s9   ;;  %s929_s8 = sphi %s963_s8, %s1134_s8   ;;  %s925_s7 = sphi %s961_s7, %s1133_s7   ;;  %s921_s6 = sphi %s959_s6, %s1132_s6  }
   0x5   : > { %p21_p0 = scmp.ge.s32.totalorder %s20_s13, 2  ;;  %s701_s15 = sadd.s32 4294967295, %s945_s12  }
   0x6   : > { %p39_p1 = scmp.ne.s32.totalorder %s925_s7, %s921_s6  ;;  %p40_p2 = scmp.eq.s32.totalorder %s945_s12, 0 }
   0x7   : > { %s1139_s13 = smov (%p21_p0, %s20_s13), 0  ;;  %s1141_s14 = smov (!%p21_p0, %s23_s14), %s941_s11 }
   0x8   : > { %p25_p3 = scmp.ge.s32.totalorder %s1141_s14, 2  ;;  %p71_p4 = scmp.eq.s32.totalorder %s701_s15, 3 }
   0x9   : > { %s28_s16 = ssub.s32 %s937_s10, %s1139_s13  ;;  %p41_p5 = por %p40_p2, %p39_p1 }
   0xa   : > { %s1143_s14 = smov (%p25_p3, %s1141_s14), 0  ;;  %p1007_p6 = por %p71_p4, %p39_p1 }
   0xb   : > { %s27_s18 = ssub.s32 %s941_s11, %s1143_s14  ;;  %s32_s20 = sadd.s32 1, %s925_s7 }
   0xc   : > { %s29_s19 = sor.u32 %s28_s16, %s27_s18  ;;  %p704_p8 = scmp.ge.s32.totalorder %s945_s12, 4 }
   0xd   : > { %p30_p7 = scmp.eq.s32.totalorder %s29_s19, 0 }
   0xe   : > { %93 = sbr.rel (%p704_p8) target bundleno = 31 (0x1f), region = 16 }
   0xf   : > { %s1015_s21 = scalar_select %p30_p7, %s925_s7, %s32_s20  }
  0x13   : > { %96 = sbr.rel (!%p41_p5) target bundleno = 31 (0x1f), region = 20  ;;  %s98_s22 = sand.u32 (%p41_p5), 1, %s925_s7  }
  0x14   : > { %s101_s23 = smul.u32 (%p41_p5), 3, %s937_s10 }
  0x15   : > { %s793_s24 = smul.u32 (%p41_p5), 36, %s98_s22 }
  0x16   : > { %s794_s25 = smul.u32 (%p41_p5), 18, %s941_s11 }
  0x17   : > { %s100_s2 = scalar_lea.vmem (%p41_p5), [#allocation2], %s793_s24 }
  0x18   : > { %s103_s26 = sadd.s32 %s794_s25, %s101_s23 }
  0x19   : > { %s705_s27 = sshll.u32 %s103_s26, 2 }
  0x1a   : > { %s105_s30 = scalar_lea.vmem %s1129_s0, %s705_s27 }
  0x1b   : > { %v120_v0 = vld [vmem:[%s105_s30] sm:$0xff]  ;;  %v122_v1 = vld [vmem:[%s105_s30 + $0x18] sm:$0xff]  ;;  %v124_v2 = vld [vmem:[%s105_s30 + $0x30] sm:$0xff] }
  0x1c   : > { %121 = vst [vmem:[%s100_s2] sm:$0xff] %v120_v0  ;;  %123 = vst [vmem:[%s100_s2 + $0xc] sm:$0xff] %v122_v1  ;;  %v706_v3 = vld [vmem:[%s105_s30 + $0x8] sm:$0xf]  ;;  %v708_v4 = vld [vmem:[%s105_s30 + $0x20] sm:$0xf] }
  0x1d   : > { %125 = vst [vmem:[%s100_s2 + $0x18] sm:$0xff] %v124_v2  ;;  %v710_v5 = vld [vmem:[%s105_s30 + $0x38] sm:$0xf]  ;;  %707 = vst [vmem:[%s100_s2 + $0x8] sm:$0xf] %v706_v3 }
  0x1e   : > { %709 = vst [vmem:[%s100_s2 + $0x14] sm:$0xf] %v708_v4  ;;  %711 = vst [vmem:[%s100_s2 + $0x20] sm:$0xf] %v710_v5 }
  0x1f PF: > { %p712_p9 = scmp.ge.s32.totalorder %s945_s12, 1  ;;  %p144_p10 = scmp.lt.s32.totalorder %s945_s12, 5 }
  0x21   : > { %p145_p11 = pnand %p712_p9, %p144_p10 }
  0x22   : > { %s151_s3 = sand.u32 (!%p145_p11), 1, %s921_s6   ;;  %s947_s15 = smov (!%p145_p11), 64  }
  0x23   : > { %148 = sbr.rel (%p145_p11) target bundleno = 1120 (0x460), region = 46 }
  0x24   : > { %s795_s4 = smul.u32 (!%p145_p11), 36, %s151_s3 }
  0x25   : > { %s796_s16 = smul.u32 (!%p145_p11), 12, %s151_s3 }
  0x26   : > { %s1029_s5 = scalar_lea.vmem (!%p145_p11), [#allocation2], %s795_s4 }
  0x27   : > { %s168_s18 = scalar_lea.vmem (!%p145_p11), [#allocation3], %s796_s16 }
  0x28   : > { %vm196_vm0 = vcmask 523264   ;;  %v861_v6 = vld [vmem:[%s1029_s5 + $0x1c] ss:$0 sps:$4 sm:$0x11]   ;;  %v862_v7 = vld [vmem:[%s1029_s5 + $0x4] ss:$12 sps:$4 sm:$0xff]  }
  0x29   : > { %789 = vmatprep.subr.msk.bf16.mxu0 %vm196_vm0, %v861_v6  ;;  %v207_v8 = vsel %vm196_vm0, %v861_v6, 0  ;;  %v863_v9 = vld [vmem:[%s1029_s5] ss:$12 sps:$4 sm:$0xff]   ;;  %v204_v10 = vsel %vm196_vm0, %v862_v7, 0  ;;  %vm264_vm1 = vcmask 131072   ;;  %vm257_vm2 = vcmask 138240  }
  0x2a   : > { %758 = vmatpush3.bf16.xpose.msra.mxu0 %v207_v8  ;;  %761 = vmatprep.mubr.msk.bf16.mxu0 %vm196_vm0, %v863_v9  ;;  %v864_v11 = vld [vmem:[%s1029_s5 + $0x18] ss:$0 sps:$4 sm:$0x11]   ;;  %v865_v19 = vld [vmem:[%s1029_s5 + $0x20] ss:$0 sps:$4 sm:$0x11]  }
  0x2b   : > { %790 = vmatprep.subr.msk.bf16.mxu0 %vm196_vm0, %v862_v7  ;;  %vm303_vm3 = vcmask 1040384   ;;  %v948_v20 = vmov 0   ;;  %v866_v23 = vld [vmem:[%s1029_s5 + $0x8] ss:$12 sps:$4 sm:$0xff]   ;;  %vm559_vm4 = vsmask.f32 256 }
  0x2c   : > { %v1048_v21 = vsel %vm303_vm3, 65535, %v948_v20  ;;  %vm560_vm5 = vmand %vm303_vm3, %vm559_vm4  ;;  %s797_s6 = smul.u32 (%p1007_p6), 6, %s933_s9 }
  0x2d   : > { %v307_v22 = vand.u32 %v865_v19, %v1048_v21 }
  0x2e   : > { %s572_s19 = sadd.s32 (%p1007_p6), %s929_s8, %s797_s6 }
  0x2f   : > { %765 = vmatprep.subr.bf16.mxu1 %v307_v22  ;;  %s730_s20 = sshll.u32 (%p1007_p6), %s572_s19, 2 }
  0x30   : > { %766 = vmatpush3.bf16.msra.mxu1 %v307_v22  ;;  %s574_s24 = scalar_lea.vmem (%p1007_p6), %s1130_s1, %s730_s20 }
  0x31   : > { %767 = vmatprep.subr.bf16.mxu1 %v866_v23 }
  0x32   : > { %760 = vmatpush3.bf16.xpose.msra.mxu0 %v204_v10 }
  0x34   : > { %768 = vmatpush3.bf16.msra.mxu1 %v866_v23 }
  0x39   : > { %762 = vmatmul.mubr.msk.bf16.vlgmr.msra.gmra.mxu0 %vm196_vm0, %v864_v11 }
  0xf9   : > { %v763_v12 = vpop.f32.mrf.mxu0 }
  0xfa   : > { %v265_v13 = vsel %vm264_vm1, %v763_v12, -inf }
  0xfb   : > { %266 = vmax.xlane.f32.xlu1 %v265_v13  ;;  %v243_v14 = vpop.f32.mrf.mxu0 }
  0xfc   : > { %v258_v15 = vsel %vm257_vm2, %v243_v14, -inf }
  0xfd   : > { %259 = vmax.xlane.f32.xlu0 %v258_v15  ;;  %v764_v16 = vpop.f32.mrf.mxu0 }
  0xff   : > { %v246_v17 = vpop.f32.mrf.mxu0 }
 0x100   : > { %v261_v18 = vsel %vm257_vm2, %v246_v17, -inf }
 0x101   : > { %262 = vmax.xlane.f32.xlu0 %v261_v18 }
 0x10c   : > { %369 = vrot.lane.b32.xlu1 %v861_v6, %s947_s15 }
 0x110   : > { %363 = vrot.lane.b32.xlu1 %v863_v9, %s947_s15 }
 0x114   : > { %365 = vrot.lane.b32.xlu1 %v864_v11, %s947_s15 }
 0x117   : > { %367 = vrot.lane.b32.xlu0 %v862_v7, %s947_s15 }
 0x184   : > { %v267_v24 = vpop.xlane.xlu1 %266 }
 0x185   : > { %v270_v25 = vsub.f32 %v763_v12, %v267_v24 }
 0x186   : > { %v260_v26 = vpop.xlane.xlu0 %259 }
 0x187   : > { %v268_v27 = vsub.f32 %v243_v14, %v260_v26  ;;  %v275_v29 = vmul.f32 1.442695, %v270_v25 }
 0x188   : > { %v370_v28 = vpop.permute.xlu1 %369 }
 0x189   : > { %791 = vmatprep.subr.msk.bf16.mxu1 %vm196_vm0, %v370_v28  ;;  %v271_v30 = vmul.f32 1.442695, %v268_v27  ;;  %867 = vpow2.f32 %v275_v29  ;;  %v381_v38 = vsel %vm196_vm0, %v370_v28, 0 }
 0x18a   : > { %v263_v31 = vpop.xlane.xlu0 %262 }
 0x18b   : > { %v269_v32 = vsub.f32 %v246_v17, %v263_v31  ;;  %869 = vpow2.f32 %v271_v30 }
 0x18c   : > { %v364_v40 = vpop.permute.xlu1 %363 }
 0x18d   : > { %v273_v33 = vmul.f32 1.442695, %v269_v32 }
 0x18e   : > { %v368_v41 = vpop.permute.xlu0 %367 }
 0x18f   : > { %871 = vpow2.f32 %v273_v33  ;;  %v378_v42 = vsel %vm196_vm0, %v368_v41, 0 }
 0x190   : > { %v366_v43 = vpop.permute.xlu1 %365 }
 0x196   : > { %v868_v34 = vpop.eup %867 }
 0x197   : > { %v287_v39 = vpack.c.bf16 %v868_v34, %v868_v34  ;;  %v283_v7 = vsel %vm264_vm1, %v868_v34, 0.0 }
 0x198   : > { %v1055_v35 = vpop.eup %869 }
 0x199   : > { %v277_v13 = vsel %vm257_vm2, %v1055_v35, 0.0 }
 0x19c   : > { %v1057_v36 = vpop.eup %871 }
 0x19d   : > { %v286_v37 = vpack.c.bf16 %v1057_v36, %v1055_v35  ;;  %v280_v12 = vsel %vm257_vm2, %v1057_v36, 0.0 }
 0x19f   : > { %769 = vmatprep.mubr.msk.bf16.mxu1 %vm257_vm2, %v286_v37 }
 0x1a0   : > { %770 = vmatmul.mubr.msk.bf16.vlgmr.msra.gmra.mxu1 %vm257_vm2, %v287_v39 }
 0x1a1   : > { %774 = vmatpush3.bf16.xpose.msra.mxu1 %v381_v38  ;;  %777 = vmatprep.mubr.msk.bf16.mxu1 %vm196_vm0, %v364_v40 }
 0x1a2   : > { %792 = vmatprep.subr.msk.bf16.mxu1 %vm196_vm0, %v368_v41 }
 0x1a9   : > { %776 = vmatpush3.bf16.xpose.msra.mxu1 %v378_v42  ;;  %v561_v42 = vld [vmem:[%s168_s18 + $0x8] sm:$0x1] }
 0x1b0   : > { %778 = vmatmul.mubr.msk.bf16.vlgmr.msra.gmra.mxu1 %vm196_vm0, %v366_v43 }
 0x260   : > { %v1068_v44 = vpop.f32.mrf.mxu1 }
 0x262   : > { %v1070_v45 = vpop.f32.mrf.mxu1 }
 0x264   : > { %v772_v46 = vpop.f32.mrf.mxu1 }
 0x266   : > { %v1072_v47 = vpop.f32.mrf.mxu1 }
 0x270   : > { %v779_v48 = vpop.f32.mrf.mxu1 }
 0x271   : > { %v437_v49 = vsel %vm264_vm1, %v779_v48, -inf }
 0x272   : > { %438 = vmax.xlane.f32.xlu0 %v437_v49  ;;  %v417_v50 = vpop.f32.mrf.mxu1 }
 0x273   : > { %v431_v51 = vsel %vm257_vm2, %v417_v50, -inf }
 0x274   : > { %432 = vmax.xlane.f32.xlu1 %v431_v51  ;;  %v780_v52 = vpop.f32.mrf.mxu1 }
 0x276   : > { %v420_v53 = vpop.f32.mrf.mxu1 }
 0x277   : > { %v434_v54 = vsel %vm257_vm2, %v420_v53, -inf }
 0x278   : > { %435 = vmax.xlane.f32.xlu0 %v434_v54 }
 0x285   : > { %460 = vrot.lane.b32.xlu1 %v866_v23, %s947_s15 }
 0x28e   : > { %462 = vrot.lane.b32.xlu0 %v865_v19, %s947_s15 }
 0x2fb   : > { %v439_v55 = vpop.xlane.xlu0 %438 }
 0x2fc   : > { %v442_v56 = vsub.f32 %v779_v48, %v439_v55 }
 0x2fd   : > { %v433_v57 = vpop.xlane.xlu1 %432 }
 0x2fe   : > { %v447_v58 = vmul.f32 1.442695, %v442_v56  ;;  %v440_v59 = vsub.f32 %v417_v50, %v433_v57 }
 0x300   : > { %873 = vpow2.f32 %v447_v58  ;;  %v443_v60 = vmul.f32 1.442695, %v440_v59 }
 0x301   : > { %v436_v61 = vpop.xlane.xlu0 %435  ;;  %v461_v2 = vpop.permute.xlu1 %460 }
 0x302   : > { %875 = vpow2.f32 %v443_v60  ;;  %v441_v62 = vsub.f32 %v420_v53, %v436_v61 }
 0x304   : > { %v445_v63 = vmul.f32 1.442695, %v441_v62 }
 0x305   : > { %v463_v0 = vpop.permute.xlu0 %462 }
 0x306   : > { %877 = vpow2.f32 %v445_v63  ;;  %v472_v1 = vand.u32 %v463_v0, %v1048_v21 }
 0x308   : > { %781 = vmatprep.subr.bf16.mxu0 %v472_v1 }
 0x309   : > { %782 = vmatpush3.bf16.msra.mxu0 %v472_v1 }
 0x30a   : > { %783 = vmatprep.subr.bf16.mxu0 %v461_v2 }
 0x30d   : > { %v874_v3 = vpop.eup %873  ;;  %784 = vmatpush3.bf16.msra.mxu0 %v461_v2 }
 0x30e   : > { %v455_v4 = vsel %vm264_vm1, %v874_v3, 0.0  ;;  %v459_v11 = vpack.c.bf16 %v874_v3, %v874_v3 }
 0x30f   : > { %v876_v5 = vpop.eup %875  ;;  %456 = vadd.xlane.f32.xlu1 %v455_v4 }
 0x310   : > { %v449_v6 = vsel %vm257_vm2, %v876_v5, 0.0 }
 0x311   : > { %450 = vadd.xlane.f32.xlu0 %v449_v6 }
 0x313   : > { %v878_v8 = vpop.eup %877  ;;  %284 = vadd.xlane.f32.xlu1 %v283_v7 }
 0x314   : > { %v452_v9 = vsel %vm257_vm2, %v878_v8, 0.0  ;;  %v458_v10 = vpack.c.bf16 %v878_v8, %v876_v5 }
 0x315   : > { %453 = vadd.xlane.f32.xlu0 %v452_v9 }
 0x316   : > { %785 = vmatprep.mubr.msk.bf16.mxu0 %vm257_vm2, %v458_v10 }
 0x317   : > { %281 = vadd.xlane.f32.xlu1 %v280_v12  ;;  %786 = vmatmul.mubr.msk.bf16.vlgmr.msra.gmra.mxu0 %vm257_vm2, %v459_v11 }
 0x319   : > { %278 = vadd.xlane.f32.xlu0 %v277_v13 }
 0x398   : > { %v457_v15 = vpop.xlane.xlu1 %456 }
 0x399   : > { %879 = vrcp.f32 %v457_v15 }
 0x39a   : > { %v451_v14 = vpop.xlane.xlu0 %450 }
 0x39b   : > { %881 = vrcp.f32 %v451_v14 }
 0x39c   : > { %v285_v28 = vpop.xlane.xlu1 %284 }
 0x39e   : > { %v454_v16 = vpop.xlane.xlu0 %453 }
 0x39f   : > { %883 = vrcp.f32 %v454_v16 }
 0x3a0   : > { %v282_v29 = vpop.xlane.xlu1 %281  ;;  %885 = vrcp.f32 %v285_v28 }
 0x3a1   : > { %887 = vrcp.f32 %v282_v29 }
 0x3a2   : > { %v279_v30 = vpop.xlane.xlu0 %278 }
 0x3a3   : > { %889 = vrcp.f32 %v279_v30 }
 0x3a6   : > { %v880_v18 = vpop.eup %879 }
 0x3a8   : > { %v882_v19 = vpop.eup %881 }
 0x3ac   : > { %v884_v25 = vpop.eup %883 }
 0x3ad   : > { %v886_v31 = vpop.eup %885 }
 0x3ae   : > { %v888_v32 = vpop.eup %887  ;;  %v362_v34 = vmul.f32 %v886_v31, %v1068_v44 }
 0x3af   : > { %v361_v38 = vmul.f32 %v888_v32, %v1072_v47 }
 0x3b0   : > { %v890_v33 = vpop.eup %889 }
 0x3b1   : > { %v360_v39 = vmul.f32 %v890_v33, %v1070_v45 }
 0x3d7   : > { %v787_v17 = vpop.f32.mrf.mxu0 }
 0x3d8   : > { %v527_v21 = vmul.f32 %v880_v18, %v787_v17 }
 0x3d9   : > { %v508_v20 = vpop.f32.mrf.mxu0 }
 0x3da   : > { %v525_v22 = vmul.f32 %v882_v19, %v508_v20 }
 0x3db   : > { %v788_v23 = vpop.f32.mrf.mxu0 }
 0x3dc   : > { %v856_v24 = vpack.i.bf16 %v525_v22, %v527_v21 }
 0x3dd   : > { %v511_v26 = vpop.f32.mrf.mxu0 }
 0x3de   : > { %v526_v27 = vmul.f32 %v884_v25, %v511_v26  ;;  %857 = vrot.lane.b32.xlu0 %v856_v24, %s947_s15 }
 0x3e0   : > { %533 = vrot.lane.b32.xlu1 %v526_v27, %s947_s15 }
 0x450   : > { %v858_v35 = vpop.permute.xlu0 %857 }
 0x451   : > { %v860_v36 = vunpack.i.h.bf16 %v858_v35  ;;  %v859_v37 = vunpack.i.l.bf16 %v858_v35 }
 0x452   : > { %v534_v40 = vpop.permute.xlu1 %533 }
 0x453   : > { %v542_v41 = vsel %vm196_vm0, %v362_v34, %v859_v37  ;;  %v540_v43 = vsel %vm196_vm0, %v360_v39, %v860_v36  ;;  %v541_v46 = vsel %vm196_vm0, %v361_v38, %v534_v40  ;;  %570 = sbr.rel (!%p1007_p6) target bundleno = 1120 (0x460), region = 54 }
 0x454   : > { %v735_v48 = vpack.c.bf16 %v542_v41, %v542_v41  ;;  %v739_v44 = vpack.c.bf16 %v541_v46, %v540_v43 }
 0x456   : > { %740 = vst [vmem:[%s168_s18] sm:$0xff] %v739_v44   ;;  %v562_v49 = vsel %vm560_vm5, %v735_v48, %v561_v42 }
 0x457   : > { %563 = vst [vmem:[%s168_s18 + $0x8] sm:$0x1] %v562_v49 }
 0x45d   : > { %v591_v45 = vld [vmem:[%s168_s18] sm:$0xf]  ;;  %v593_v47 = vld [vmem:[%s168_s18 + $0x4] sm:$0xf] }
 0x45e   : > { %v595_v50 = vld [vmem:[%s168_s18 + $0x8] sm:$0xf]  ;;  %592 = vst [vmem:[%s574_s24] sm:$0xf] %v591_v45  ;;  %594 = vst [vmem:[%s574_s24 + $0x8] sm:$0xf] %v593_v47 }
 0x45f   : > { %596 = vst [vmem:[%s574_s24 + $0x10] sm:$0xf] %v595_v50 }
 0x460 PF: > { %s11_s12 = sadd.s32 1, %s945_s12   ;;  %s1132_s6 = smov %s925_s7 }
 0x461   : > { %p8_p12 = scmp.ge.s32.totalorder %s11_s12, 6   ;;  %s1133_s7 = smov %s1015_s21 }
 0x462   : > { %s1134_s8 = smov %s937_s10  ;;  %s1135_s9 = smov %s941_s11 }
 0x463   : > { %s1136_s10 = smov %s1139_s13  ;;  %s1137_s11 = smov %s1143_s14 }
 0x464   :  { %10 = sbr.rel (!%p8_p12) target bundleno = 4 (0x4), region = 132 }

// kernel: clip_vision_tower_forward.16
= control target key start
LH: loop header
LB: loop body
LE: loop exit
PB: predicated region body
PF: predicated region fallthrough
CT: control target
= control target key end

     0   :  { %v542_v1 = vmov 0.0   ;;  %v361_v40 = vlaneseq  ;;  %s742_s1 = inlined_call_operand.vmem [shape: bf16[256,256], index: 1, kind: input, shape index: {}]   ;;  %s743_s0 = inlined_call_operand.vmem [shape: bf16[34,256], index: 0, kind: input, shape index: {}]   ;;  %s744_s2 = inlined_call_operand.vmem [shape: f32[1,256], index: 2, kind: input, shape index: {}]   ;;  %s745_s3 = inlined_call_operand.vmem [shape: f32[34,256], index: 3, kind: input, shape index: {}]   ;;  %s746_s4 = inlined_call_operand.vmem [shape: f32[34,256], index: 4, kind: output, shape index: {}]  }
   0x1   :  { %v486_v0 = vld [vmem:[%s742_s1 + $0x74] ss:$8 sps:$4 sm:$0xff]   ;;  %29 = vst [vmem:[#allocation2 + $0x40] sm:$0x3] %v542_v1  ;;  %30 = vst [vmem:[#allocation2 + $0x38] sm:$0x3] %v542_v1 }
   0x2   :  { %v488_v2 = vld [vmem:[%s742_s1 + $0x70] ss:$8 sps:$4 sm:$0xff]   ;;  %265 = vmatprep.subr.bf16.mxu0 %v486_v0  ;;  %453 = vmatprep.subr.bf16.mxu1 %v486_v0  ;;  %v489_v3 = vld [vmem:[%s742_s1 + $0x64] ss:$8 sps:$4 sm:$0xff]   ;;  %v491_v4 = vld [vmem:[%s742_s1 + $0x60] ss:$8 sps:$4 sm:$0xff]  }
   0x3   :  { %266 = vmatpush1.bf16.msra.mxu0 %v488_v2  ;;  %469 = vmatpush1.bf16.msra.mxu1 %v488_v2  ;;  %v492_v5 = vld [vmem:[%s742_s1 + $0x54] ss:$8 sps:$4 sm:$0xff]   ;;  %v494_v6 = vld [vmem:[%s742_s1 + $0x50] ss:$8 sps:$4 sm:$0xff]   ;;  %v495_v7 = vld [vmem:[%s742_s1 + $0x44] ss:$8 sps:$4 sm:$0xff]  }
   0x4   :  { %267 = vmatprep.subr.bf16.mxu0 %v489_v3  ;;  %454 = vmatprep.subr.bf16.mxu1 %v489_v3  ;;  %v497_v8 = vld [vmem:[%s742_s1 + $0x40] ss:$8 sps:$4 sm:$0xff]   ;;  %v498_v9 = vld [vmem:[%s742_s1 + $0x34] ss:$8 sps:$4 sm:$0xff]   ;;  %v500_v10 = vld [vmem:[%s742_s1 + $0x30] ss:$8 sps:$4 sm:$0xff]  }
   0x5   :  { %v501_v11 = vld [vmem:[%s742_s1 + $0x24] ss:$8 sps:$4 sm:$0xff]   ;;  %v503_v12 = vld [vmem:[%s742_s1 + $0x20] ss:$8 sps:$4 sm:$0xff]   ;;  %v504_v13 = vld [vmem:[%s742_s1 + $0x14] ss:$8 sps:$4 sm:$0xff]  }
   0x6   :  { %v536_v14 = vld [vmem:[%s743_s0 + $0x4] ss:$8 sps:$4 sm:$0xff]   ;;  %v506_v15 = vld [vmem:[%s742_s1 + $0x10] ss:$8 sps:$4 sm:$0xff]   ;;  %v539_v16 = vld [vmem:[%s743_s0 + $0x14] ss:$8 sps:$4 sm:$0xff]  }
   0x7   :  { %268 = vmatpush1.bf16.msra.mxu0 %v491_v4  ;;  %470 = vmatpush1.bf16.msra.mxu1 %v491_v4  ;;  %v507_v17 = vld [vmem:[%s742_s1 + $0x4] ss:$8 sps:$4 sm:$0xff]   ;;  %v509_v18 = vld [vmem:[%s742_s1] ss:$8 sps:$4 sm:$0xff]   ;;  %v510_v19 = vld [vmem:[%s742_s1 + $0xf4] ss:$8 sps:$4 sm:$0xff]  }
   0x8   :  { %269 = vmatprep.subr.bf16.mxu0 %v492_v5  ;;  %455 = vmatprep.subr.bf16.mxu1 %v492_v5  ;;  %v512_v20 = vld [vmem:[%s742_s1 + $0xf0] ss:$8 sps:$4 sm:$0xff]   ;;  %v513_v21 = vld [vmem:[%s742_s1 + $0xe4] ss:$8 sps:$4 sm:$0xff]   ;;  %v515_v22 = vld [vmem:[%s742_s1 + $0xe0] ss:$8 sps:$4 sm:$0xff]  }
   0x9   :  { %297 = vmatprep.mubr.bf16.mxu0 %v536_v14  ;;  %307 = vmatprep.mubr.bf16.mxu1 %v539_v16  ;;  %v516_v23 = vld [vmem:[%s742_s1 + $0xd4] ss:$8 sps:$4 sm:$0xff]   ;;  %v518_v24 = vld [vmem:[%s742_s1 + $0xd0] ss:$8 sps:$4 sm:$0xff]   ;;  %v519_v25 = vld [vmem:[%s742_s1 + $0xc4] ss:$8 sps:$4 sm:$0xff]  }
   0xa   :  { %v521_v26 = vld [vmem:[%s742_s1 + $0xc0] ss:$8 sps:$4 sm:$0xff]   ;;  %v522_v27 = vld [vmem:[%s742_s1 + $0xb4] ss:$8 sps:$4 sm:$0xff]   ;;  %v524_v28 = vld [vmem:[%s742_s1 + $0xb0] ss:$8 sps:$4 sm:$0xff]  }
   0xb   :  { %270 = vmatpush1.bf16.msra.mxu0 %v494_v6  ;;  %471 = vmatpush1.bf16.msra.mxu1 %v494_v6  ;;  %v525_v29 = vld [vmem:[%s742_s1 + $0xa4] ss:$8 sps:$4 sm:$0xff]   ;;  %v527_v30 = vld [vmem:[%s742_s1 + $0xa0] ss:$8 sps:$4 sm:$0xff]   ;;  %v528_v31 = vld [vmem:[%s742_s1 + $0x94] ss:$8 sps:$4 sm:$0xff]  }
   0xc   :  { %271 = vmatprep.subr.bf16.mxu0 %v495_v7  ;;  %456 = vmatprep.subr.bf16.mxu1 %v495_v7  ;;  %v530_v32 = vld [vmem:[%s742_s1 + $0x90] ss:$8 sps:$4 sm:$0xff]   ;;  %v531_v33 = vld [vmem:[%s742_s1 + $0x84] ss:$8 sps:$4 sm:$0xff]   ;;  %v533_v34 = vld [vmem:[%s742_s1 + $0x80] ss:$8 sps:$4 sm:$0xff]  }
   0xd   :  { %v45_v35 = vld [vmem:[%s743_s0 + $0x20] sm:$0x11]  ;;  %v537_v37 = vld [vmem:[%s743_s0 + $0x10] ss:$8 sps:$4 sm:$0xff]   ;;  %v362_v41 = vshrl.u32 %v361_v40, 7  ;;  %v382_v55 = vld [vmem:[%s745_s3 + $0x8] sm:$0xff] }
   0xe   :  { %v534_v36 = vld [vmem:[%s743_s0] ss:$8 sps:$4 sm:$0xff]   ;;  %v420_v38 = vcombine.high %v45_v35, %v45_v35  ;;  %v419_v39 = vcombine.low %v45_v35, %v45_v35  ;;  %v383_v4 = vld [vmem:[%s745_s3 + $0x10] sm:$0xff] }
   0xf   :  { %272 = vmatpush1.bf16.msra.mxu0 %v497_v8  ;;  %472 = vmatpush1.bf16.msra.mxu1 %v497_v8  ;;  %v363_v42 = vsub.s32 0, %v362_v41  ;;  %v359_v43 = vld [vmem:[%s744_s2] sm:$0x3]  ;;  %v367_v44 = vsub.s32 1, %v362_v41  ;;  %v386_v56 = vld [vmem:[%s745_s3 + $0x28] sm:$0xff]  ;;  %v387_v5 = vld [vmem:[%s745_s3 + $0x30] sm:$0xff] }
  0x10   :  { %273 = vmatprep.subr.bf16.mxu0 %v498_v9  ;;  %457 = vmatprep.subr.bf16.mxu1 %v498_v9  ;;  %v381_v49 = vld [vmem:[%s745_s3] sm:$0xff]  ;;  %v384_v8 = vld [vmem:[%s745_s3 + $0x18] sm:$0xff] }
  0x11   :  { %v364_v45 = vrot.slane %v359_v43, %v363_v42  ;;  %v368_v48 = vrot.slane %v359_v43, %v367_v44  ;;  %v385_v50 = vld [vmem:[%s745_s3 + $0x20] sm:$0xff]  ;;  %v388_v9 = vld [vmem:[%s745_s3 + $0x38] sm:$0xff] }
  0x12   :  { %v39_v1 = vld [vmem:[#allocation2 + $0x40] sm:$0x3] }
  0x13   :  { %274 = vmatpush1.bf16.msra.mxu0 %v500_v10  ;;  %473 = vmatpush1.bf16.msra.mxu1 %v500_v10 }
  0x14   :  { %275 = vmatprep.subr.bf16.mxu0 %v501_v11  ;;  %458 = vmatprep.subr.bf16.mxu1 %v501_v11  ;;  %v40_v11 = vld [vmem:[#allocation2 + $0x38] sm:$0x3] }
  0x17   :  { %276 = vmatpush1.bf16.msra.mxu0 %v503_v12  ;;  %474 = vmatpush1.bf16.msra.mxu1 %v503_v12 }
  0x18   :  { %277 = vmatprep.subr.bf16.mxu0 %v504_v13  ;;  %459 = vmatprep.subr.bf16.mxu1 %v504_v13 }
  0x1b   :  { %278 = vmatpush1.bf16.msra.mxu0 %v506_v15  ;;  %475 = vmatpush1.bf16.msra.mxu1 %v506_v15 }
  0x1c   :  { %279 = vmatprep.subr.bf16.mxu0 %v507_v17  ;;  %460 = vmatprep.subr.bf16.mxu1 %v507_v17 }
  0x1f   :  { %280 = vmatpush1.bf16.msra.mxu0 %v509_v18  ;;  %476 = vmatpush1.bf16.msra.mxu1 %v509_v18 }
  0x20   :  { %281 = vmatprep.subr.bf16.mxu0 %v510_v19  ;;  %461 = vmatprep.subr.bf16.mxu1 %v510_v19 }
  0x23   :  { %282 = vmatpush2.bf16.msra.mxu0 %v512_v20  ;;  %477 = vmatpush2.bf16.msra.mxu1 %v512_v20 }
  0x24   :  { %283 = vmatprep.subr.bf16.mxu0 %v513_v21  ;;  %462 = vmatprep.subr.bf16.mxu1 %v513_v21 }
  0x27   :  { %284 = vmatpush2.bf16.msra.mxu0 %v515_v22  ;;  %478 = vmatpush2.bf16.msra.mxu1 %v515_v22 }
  0x28   :  { %285 = vmatprep.subr.bf16.mxu0 %v516_v23  ;;  %463 = vmatprep.subr.bf16.mxu1 %v516_v23 }
  0x2b   :  { %286 = vmatpush2.bf16.msra.mxu0 %v518_v24  ;;  %479 = vmatpush2.bf16.msra.mxu1 %v518_v24  ;;  %v389_v24 = vld [vmem:[%s745_s3 + $0x40] sm:$0x3] }
  0x2c   :  { %287 = vmatprep.subr.bf16.mxu0 %v519_v25  ;;  %464 = vmatprep.subr.bf16.mxu1 %v519_v25 }
  0x2f   :  { %288 = vmatpush2.bf16.msra.mxu0 %v521_v26  ;;  %480 = vmatpush2.bf16.msra.mxu1 %v521_v26 }
  0x30   :  { %289 = vmatprep.subr.bf16.mxu0 %v522_v27  ;;  %465 = vmatprep.subr.bf16.mxu1 %v522_v27  ;;  %v390_v27 = vld [vmem:[%s745_s3 + $0x48] sm:$0x3] }
  0x33   :  { %290 = vmatpush2.bf16.msra.mxu0 %v524_v28  ;;  %481 = vmatpush2.bf16.msra.mxu1 %v524_v28 }
  0x34   :  { %291 = vmatprep.subr.bf16.mxu0 %v525_v29  ;;  %466 = vmatprep.subr.bf16.mxu1 %v525_v29 }
  0x37   :  { %292 = vmatpush2.bf16.msra.mxu0 %v527_v30  ;;  %482 = vmatpush2.bf16.msra.mxu1 %v527_v30 }
  0x38   :  { %293 = vmatprep.subr.bf16.mxu0 %v528_v31  ;;  %467 = vmatprep.subr.bf16.mxu1 %v528_v31 }
  0x3b   :  { %294 = vmatpush2.bf16.msra.mxu0 %v530_v32  ;;  %483 = vmatpush2.bf16.msra.mxu1 %v530_v32 }
  0x3c   :  { %295 = vmatprep.subr.bf16.mxu0 %v531_v33  ;;  %468 = vmatprep.subr.bf16.mxu1 %v531_v33 }
  0x3f   :  { %296 = vmatpush2.bf16.msra.mxu0 %v533_v34  ;;  %484 = vmatpush2.bf16.msra.mxu1 %v533_v34 }
  0x42   :  { %298 = vmatmul.mubr.bf16.vlgmr.msra.gmra.mxu0 %v534_v36  ;;  %308 = vmatmul.mubr.bf16.vlgmr.msra.gmra.mxu1 %v537_v37 }
  0x43   :  { %317 = vmatprep.mubr.bf16.mxu1 %v420_v38 }
  0x4a   :  { %318 = vmatmul.mubr.bf16.gmra.mxu1 %v419_v39 }
 0x102   :  { %v299_v46 = vpop.f32.mrf.mxu0  ;;  %v309_v47 = vpop.f32.mrf.mxu1 }
 0x103   :  { %v371_v53 = vadd.f32 %v364_v45, %v299_v46  ;;  %v375_v54 = vadd.f32 %v364_v45, %v309_v47 }
 0x104   :  { %v301_v51 = vpop.f32.mrf.mxu0  ;;  %v311_v52 = vpop.f32.mrf.mxu1 }
 0x105   :  { %v391_v59 = vadd.f32 %v381_v49, %v371_v53  ;;  %v395_v60 = vadd.f32 %v385_v50, %v375_v54  ;;  %v372_v61 = vadd.f32 %v368_v48, %v301_v51  ;;  %v376_v62 = vadd.f32 %v368_v48, %v311_v52 }
 0x106   :  { %v303_v57 = vpop.f32.mrf.mxu0  ;;  %v313_v58 = vpop.f32.mrf.mxu1 }
 0x107   :  { %401 = vst [vmem:[%s746_s4] sm:$0xff] %v391_v59  ;;  %405 = vst [vmem:[%s746_s4 + $0x20] sm:$0xff] %v395_v60  ;;  %v392_v2 = vadd.f32 %v382_v55, %v372_v61  ;;  %v396_v3 = vadd.f32 %v386_v56, %v376_v62  ;;  %v373_v6 = vadd.f32 %v364_v45, %v303_v57 }
 0x108   :  { %v305_v63 = vpop.f32.mrf.mxu0  ;;  %v315_v0 = vpop.f32.mrf.mxu1  ;;  %v377_v7 = vadd.f32 %v364_v45, %v313_v58 }
 0x109   :  { %402 = vst [vmem:[%s746_s4 + $0x8] sm:$0xff] %v392_v2  ;;  %406 = vst [vmem:[%s746_s4 + $0x28] sm:$0xff] %v396_v3  ;;  %v374_v12 = vadd.f32 %v368_v48, %v305_v63  ;;  %v378_v13 = vadd.f32 %v368_v48, %v315_v0  ;;  %v393_v15 = vadd.f32 %v383_v4, %v373_v6 }
 0x10a   :  { %v319_v10 = vpop.f32.mrf.mxu1  ;;  %v397_v16 = vadd.f32 %v387_v5, %v377_v7 }
 0x10b   :  { %v334_v14 = vadd.f32 %v319_v10, %v39_v1  ;;  %v394_v18 = vadd.f32 %v384_v8, %v374_v12  ;;  %v398_v19 = vadd.f32 %v388_v9, %v378_v13  ;;  %403 = vst [vmem:[%s746_s4 + $0x10] sm:$0xff] %v393_v15 }
 0x10c   :  { %v321_v17 = vpop.f32.mrf.mxu1  ;;  %407 = vst [vmem:[%s746_s4 + $0x30] sm:$0xff] %v397_v16 }
 0x10d   :  { %344 = vst [vmem:[#allocation2 + $0x40] sm:$0x3] %v334_v14  ;;  %v335_v20 = vadd.f32 %v321_v17, %v40_v11  ;;  %404 = vst [vmem:[%s746_s4 + $0x18] sm:$0xff] %v394_v18 }
 0x10e   :  { %v323_v21 = vpop.f32.mrf.mxu1  ;;  %408 = vst [vmem:[%s746_s4 + $0x38] sm:$0xff] %v398_v19 }
 0x10f   :  { %345 = vst [vmem:[#allocation2 + $0x38] sm:$0x3] %v335_v20 }
 0x110   :  { %v324_v22 = vpop.f32.mrf.mxu1 }
 0x114   :  { %v357_v23 = vld [vmem:[#allocation2 + $0x40] sm:$0x3] }
 0x115   :  { %v379_v25 = vadd.f32 %v364_v45, %v357_v23 }
 0x116   :  { %v358_v26 = vld [vmem:[#allocation2 + $0x38] sm:$0x3] }
 0x117   :  { %v399_v28 = vadd.f32 %v389_v24, %v379_v25  ;;  %v380_v29 = vadd.f32 %v368_v48, %v358_v26 }
 0x119   :  { %409 = vst [vmem:[%s746_s4 + $0x40] sm:$0x3] %v399_v28  ;;  %v400_v30 = vadd.f32 %v390_v27, %v380_v29 }
 0x11b   :  { %410 = vst [vmem:[%s746_s4 + $0x48] sm:$0x3] %v400_v30 }

// kernel: clip_vision_tower_forward.17
= control target key start
LH: loop header
LB: loop body
LE: loop exit
PB: predicated region body
PF: predicated region fallthrough
CT: control target
= control target key end

     0   :  { %vm46_vm0 = vcmask 1041408   ;;  %s1820_s0 = inlined_call_operand.vmem [shape: f32[34,256], index: 0, kind: input, shape index: {}]   ;;  %s1821_s3 = inlined_call_operand.vmem [shape: bf16[256,512], index: 3, kind: input, shape index: {}]   ;;  %s1822_s1 = inlined_call_operand.vmem [shape: f32[1,256], index: 1, kind: input, shape index: {}]   ;;  %s1823_s2 = inlined_call_operand.vmem [shape: f32[1,256], index: 2, kind: input, shape index: {}]   ;;  %s1824_s4 = inlined_call_operand.vmem [shape: f32[1,512], index: 4, kind: input, shape index: {}]   ;;  %s1825_s5 = inlined_call_operand.vmem [shape: bf16[34,512], index: 5, kind: output, shape index: {}]  }
   0x1   :  { %v1344_v0 = vld [vmem:[%s1820_s0] sm:$0xff]  ;;  %v1349_v1 = vld [vmem:[%s1820_s0 + $0x8] sm:$0xff]  ;;  %v1366_v5 = vld [vmem:[%s1820_s0 + $0x10] sm:$0xff] }
   0x2   :  { %v1354_v2 = vld [vmem:[%s1820_s0 + $0x20] sm:$0xff]  ;;  %v34_v3 = vadd.f32 %v1349_v1, %v1344_v0  ;;  %v1361_v4 = vld [vmem:[%s1820_s0 + $0x28] sm:$0xff]  ;;  %v1371_v6 = vld [vmem:[%s1820_s0 + $0x18] sm:$0xff] }
   0x3   :  { %v40_v7 = vadd.f32 %v1361_v4, %v1354_v2  ;;  %v1378_v8 = vld [vmem:[%s1820_s0 + $0x30] sm:$0xff]  ;;  %v1383_v9 = vld [vmem:[%s1820_s0 + $0x38] sm:$0xff]  ;;  %v1388_v10 = vld [vmem:[%s1820_s0 + $0x40] sm:$0x3]  ;;  %v37_v11 = vadd.f32 %v1371_v6, %v1366_v5 }
   0x4   :  { %35 = vadd.xlane.f32.xlu0 %v34_v3  ;;  %v1395_v12 = vld [vmem:[%s1820_s0 + $0x48] sm:$0x3]  ;;  %v43_v13 = vadd.f32 %v1383_v9, %v1378_v8  ;;  %v47_v14 = vsel %vm46_vm0, %v1388_v10, 0.0  ;;  %v1119_v17 = vld [vmem:[%s1821_s3 + $0xe4] ss:$16 sps:$4 sm:$0xff]  }
   0x5   :  { %41 = vadd.xlane.f32.xlu1 %v40_v7  ;;  %v48_v15 = vsel %vm46_vm0, %v1395_v12, 0.0  ;;  %v1121_v18 = vld [vmem:[%s1821_s3 + $0xec] ss:$16 sps:$4 sm:$0xff]   ;;  %639 = vmatprep.subr.bf16.mxu0 %v1119_v17  ;;  %v1123_v19 = vld [vmem:[%s1821_s3 + $0xe0] ss:$16 sps:$4 sm:$0xff]  }
   0x6   :  { %v49_v16 = vadd.f32 %v48_v15, %v47_v14  ;;  %v1124_v20 = vld [vmem:[%s1821_s3 + $0xe8] ss:$16 sps:$4 sm:$0xff]   ;;  %700 = vmatprep.subr.bf16.mxu1 %v1121_v18  ;;  %v1125_v21 = vld [vmem:[%s1821_s3 + $0xc4] ss:$16 sps:$4 sm:$0xff]   ;;  %640 = vmatpush1.bf16.msra.mxu0 %v1123_v19  ;;  %v1127_v22 = vld [vmem:[%s1821_s3 + $0xcc] ss:$16 sps:$4 sm:$0xff]  }
   0x7   :  { %701 = vmatpush1.bf16.msra.mxu1 %v1124_v20  ;;  %v1129_v23 = vld [vmem:[%s1821_s3 + $0xc0] ss:$16 sps:$4 sm:$0xff]   ;;  %641 = vmatprep.subr.bf16.mxu0 %v1125_v21  ;;  %v1130_v24 = vld [vmem:[%s1821_s3 + $0xc8] ss:$16 sps:$4 sm:$0xff]   ;;  %v1131_v25 = vld [vmem:[%s1821_s3 + $0xa4] ss:$16 sps:$4 sm:$0xff]  }
   0x8   :  { %38 = vadd.xlane.f32.xlu0 %v37_v11  ;;  %702 = vmatprep.subr.bf16.mxu1 %v1127_v22  ;;  %v1133_v26 = vld [vmem:[%s1821_s3 + $0xac] ss:$16 sps:$4 sm:$0xff]   ;;  %v1135_v27 = vld [vmem:[%s1821_s3 + $0xa0] ss:$16 sps:$4 sm:$0xff]   ;;  %v1136_v28 = vld [vmem:[%s1821_s3 + $0xa8] ss:$16 sps:$4 sm:$0xff]  }
   0x9   :  { %44 = vadd.xlane.f32.xlu1 %v43_v13  ;;  %v1137_v29 = vld [vmem:[%s1821_s3 + $0x84] ss:$16 sps:$4 sm:$0xff]   ;;  %v1139_v30 = vld [vmem:[%s1821_s3 + $0x8c] ss:$16 sps:$4 sm:$0xff]   ;;  %v1141_v31 = vld [vmem:[%s1821_s3 + $0x80] ss:$16 sps:$4 sm:$0xff]  }
   0xa   :  { %642 = vmatpush1.bf16.msra.mxu0 %v1129_v23  ;;  %v1142_v32 = vld [vmem:[%s1821_s3 + $0x88] ss:$16 sps:$4 sm:$0xff]   ;;  %v1143_v33 = vld [vmem:[%s1821_s3 + $0x64] ss:$16 sps:$4 sm:$0xff]   ;;  %v1145_v34 = vld [vmem:[%s1821_s3 + $0x6c] ss:$16 sps:$4 sm:$0xff]  }
   0xb   :  { %703 = vmatpush1.bf16.msra.mxu1 %v1130_v24  ;;  %643 = vmatprep.subr.bf16.mxu0 %v1131_v25  ;;  %v1147_v35 = vld [vmem:[%s1821_s3 + $0x60] ss:$16 sps:$4 sm:$0xff]   ;;  %v1148_v36 = vld [vmem:[%s1821_s3 + $0x68] ss:$16 sps:$4 sm:$0xff]   ;;  %v1149_v37 = vld [vmem:[%s1821_s3 + $0x44] ss:$16 sps:$4 sm:$0xff]  }
   0xc   :  { %50 = vadd.xlane.f32.xlu0 %v49_v16  ;;  %704 = vmatprep.subr.bf16.mxu1 %v1133_v26  ;;  %v1151_v38 = vld [vmem:[%s1821_s3 + $0x4c] ss:$16 sps:$4 sm:$0xff]   ;;  %v1153_v39 = vld [vmem:[%s1821_s3 + $0x40] ss:$16 sps:$4 sm:$0xff]   ;;  %v1154_v40 = vld [vmem:[%s1821_s3 + $0x48] ss:$16 sps:$4 sm:$0xff]  }
   0xd   :  { %v1159_v11 = vld [vmem:[%s1821_s3 + $0x20] ss:$16 sps:$4 sm:$0xff]   ;;  %v1160_v13 = vld [vmem:[%s1821_s3 + $0x28] ss:$16 sps:$4 sm:$0xff]   ;;  %v1161_v17 = vld [vmem:[%s1821_s3 + $0x4] ss:$16 sps:$4 sm:$0xff]  }
   0xe   :  { %644 = vmatpush1.bf16.msra.mxu0 %v1135_v27  ;;  %v1163_v18 = vld [vmem:[%s1821_s3 + $0xc] ss:$16 sps:$4 sm:$0xff]   ;;  %v1165_v20 = vld [vmem:[%s1821_s3] ss:$16 sps:$4 sm:$0xff]   ;;  %v1166_v21 = vld [vmem:[%s1821_s3 + $0x8] ss:$16 sps:$4 sm:$0xff]  }
   0xf   :  { %705 = vmatpush1.bf16.msra.mxu1 %v1136_v28  ;;  %645 = vmatprep.subr.bf16.mxu0 %v1137_v29  ;;  %v1167_v22 = vld [vmem:[%s1821_s3 + $0x1e4] ss:$16 sps:$4 sm:$0xff]   ;;  %v1169_v23 = vld [vmem:[%s1821_s3 + $0x1ec] ss:$16 sps:$4 sm:$0xff]   ;;  %v1171_v24 = vld [vmem:[%s1821_s3 + $0x1e0] ss:$16 sps:$4 sm:$0xff]  }
  0x10   :  { %706 = vmatprep.subr.bf16.mxu1 %v1139_v30  ;;  %v1172_v25 = vld [vmem:[%s1821_s3 + $0x1e8] ss:$16 sps:$4 sm:$0xff]   ;;  %v1173_v26 = vld [vmem:[%s1821_s3 + $0x1c4] ss:$16 sps:$4 sm:$0xff]   ;;  %v1175_v27 = vld [vmem:[%s1821_s3 + $0x1cc] ss:$16 sps:$4 sm:$0xff]  }
  0x11   :  { %v1177_v28 = vld [vmem:[%s1821_s3 + $0x1c0] ss:$16 sps:$4 sm:$0xff]   ;;  %v1178_v29 = vld [vmem:[%s1821_s3 + $0x1c8] ss:$16 sps:$4 sm:$0xff]   ;;  %v1179_v30 = vld [vmem:[%s1821_s3 + $0x1a4] ss:$16 sps:$4 sm:$0xff]  }
  0x12   :  { %646 = vmatpush1.bf16.msra.mxu0 %v1141_v31  ;;  %v1181_v31 = vld [vmem:[%s1821_s3 + $0x1ac] ss:$16 sps:$4 sm:$0xff]  }
  0x13   :  { %707 = vmatpush1.bf16.msra.mxu1 %v1142_v32  ;;  %647 = vmatprep.subr.bf16.mxu0 %v1143_v33  ;;  %v1183_v32 = vld [vmem:[%s1821_s3 + $0x1a0] ss:$16 sps:$4 sm:$0xff]   ;;  %v1184_v33 = vld [vmem:[%s1821_s3 + $0x1a8] ss:$16 sps:$4 sm:$0xff]  }
  0x14   :  { %708 = vmatprep.subr.bf16.mxu1 %v1145_v34  ;;  %v1185_v34 = vld [vmem:[%s1821_s3 + $0x184] ss:$16 sps:$4 sm:$0xff]  }
  0x16   :  { %648 = vmatpush1.bf16.msra.mxu0 %v1147_v35  ;;  %v1187_v35 = vld [vmem:[%s1821_s3 + $0x18c] ss:$16 sps:$4 sm:$0xff]  }
  0x17   :  { %709 = vmatpush1.bf16.msra.mxu1 %v1148_v36  ;;  %649 = vmatprep.subr.bf16.mxu0 %v1149_v37  ;;  %v1189_v36 = vld [vmem:[%s1821_s3 + $0x180] ss:$16 sps:$4 sm:$0xff]   ;;  %v1190_v37 = vld [vmem:[%s1821_s3 + $0x188] ss:$16 sps:$4 sm:$0xff]  }
  0x18   :  { %710 = vmatprep.subr.bf16.mxu1 %v1151_v38  ;;  %v1191_v38 = vld [vmem:[%s1821_s3 + $0x164] ss:$16 sps:$4 sm:$0xff]  }
  0x1a   :  { %650 = vmatpush1.bf16.msra.mxu0 %v1153_v39  ;;  %v1193_v39 = vld [vmem:[%s1821_s3 + $0x16c] ss:$16 sps:$4 sm:$0xff]  }
  0x1b   :  { %711 = vmatpush1.bf16.msra.mxu1 %v1154_v40  ;;  %v1195_v40 = vld [vmem:[%s1821_s3 + $0x160] ss:$16 sps:$4 sm:$0xff]  }
  0x8d   :  { %v36_v41 = vpop.xlane.xlu0 %35 }
  0x8e   :  { %v53_v42 = vmul.f32 0.00390625, %v36_v41  ;;  %v42_v43 = vpop.xlane.xlu1 %41  ;;  %v1196_v41 = vld [vmem:[%s1821_s3 + $0x168] ss:$16 sps:$4 sm:$0xff]  }
  0x8f   :  { %v55_v44 = vmul.f32 0.00390625, %v42_v43  ;;  %v1199_v43 = vld [vmem:[%s1821_s3 + $0x14c] ss:$16 sps:$4 sm:$0xff]  }
  0x90   :  { %v1476_v45 = vsub.f32 %v1344_v0, %v53_v42  ;;  %v1479_v46 = vsub.f32 %v1349_v1, %v53_v42  ;;  %v1197_v42 = vld [vmem:[%s1821_s3 + $0x144] ss:$16 sps:$4 sm:$0xff]  }
  0x91   :  { %v1482_v47 = vsub.f32 %v1354_v2, %v55_v44  ;;  %v1485_v48 = vsub.f32 %v1361_v4, %v55_v44  ;;  %v39_v49 = vpop.xlane.xlu0 %38  ;;  %v1201_v44 = vld [vmem:[%s1821_s3 + $0x140] ss:$16 sps:$4 sm:$0xff]  }
  0x92   :  { %v54_v50 = vmul.f32 0.00390625, %v39_v49  ;;  %v45_v51 = vpop.xlane.xlu1 %44  ;;  %v68_v52 = vmul.f32 %v1476_v45, %v1476_v45  ;;  %v69_v53 = vmul.f32 %v1479_v46, %v1479_v46  ;;  %v1202_v49 = vld [vmem:[%s1821_s3 + $0x148] ss:$16 sps:$4 sm:$0xff]  }
  0x93   :  { %v56_v54 = vmul.f32 0.00390625, %v45_v51  ;;  %v72_v55 = vmul.f32 %v1482_v47, %v1482_v47  ;;  %v73_v56 = vmul.f32 %v1485_v48, %v1485_v48  ;;  %v1205_v51 = vld [vmem:[%s1821_s3 + $0x12c] ss:$16 sps:$4 sm:$0xff]  }
  0x94   :  { %v1496_v57 = vsub.f32 %v1366_v5, %v54_v50  ;;  %v1499_v58 = vsub.f32 %v1371_v6, %v54_v50  ;;  %v78_v59 = vadd.f32 %v69_v53, %v68_v52  ;;  %v1155_v5 = vld [vmem:[%s1821_s3 + $0x24] ss:$16 sps:$4 sm:$0xff]   ;;  %v1157_v6 = vld [vmem:[%s1821_s3 + $0x2c] ss:$16 sps:$4 sm:$0xff]   ;;  %v1207_v52 = vld [vmem:[%s1821_s3 + $0x120] ss:$16 sps:$4 sm:$0xff]  }
  0x95   :  { %v1502_v60 = vsub.f32 %v1378_v8, %v56_v54  ;;  %v1505_v61 = vsub.f32 %v1383_v9, %v56_v54  ;;  %v51_v62 = vpop.xlane.xlu0 %50  ;;  %v84_v0 = vadd.f32 %v73_v56, %v72_v55  ;;  %651 = vmatprep.subr.bf16.mxu0 %v1155_v5  ;;  %712 = vmatprep.subr.bf16.mxu1 %v1157_v6  ;;  %v1203_v50 = vld [vmem:[%s1821_s3 + $0x124] ss:$16 sps:$4 sm:$0xff]   ;;  %v1208_v53 = vld [vmem:[%s1821_s3 + $0x128] ss:$16 sps:$4 sm:$0xff]   ;;  %v1211_v55 = vld [vmem:[%s1821_s3 + $0x10c] ss:$16 sps:$4 sm:$0xff]  }
  0x96   :  { %v57_v63 = vmul.f32 0.00390625, %v51_v62  ;;  %79 = vadd.xlane.f32.xlu1 %v78_v59  ;;  %v70_v1 = vmul.f32 %v1496_v57, %v1496_v57  ;;  %v71_v2 = vmul.f32 %v1499_v58, %v1499_v58  ;;  %652 = vmatpush1.bf16.msra.mxu0 %v1159_v11  ;;  %v1209_v54 = vld [vmem:[%s1821_s3 + $0x104] ss:$16 sps:$4 sm:$0xff]   ;;  %v1213_v56 = vld [vmem:[%s1821_s3 + $0x100] ss:$16 sps:$4 sm:$0xff]  }
  0x97   :  { %v74_v3 = vmul.f32 %v1502_v60, %v1502_v60  ;;  %v75_v4 = vmul.f32 %v1505_v61, %v1505_v61  ;;  %713 = vmatpush1.bf16.msra.mxu1 %v1160_v13  ;;  %653 = vmatprep.subr.bf16.mxu0 %v1161_v17  ;;  %v1214_v59 = vld [vmem:[%s1821_s3 + $0x108] ss:$16 sps:$4 sm:$0xff]  }
  0x98   :  { %v1522_v7 = vsub.f32 %v1388_v10, %v57_v63  ;;  %v1525_v8 = vsub.f32 %v1395_v12, %v57_v63  ;;  %v81_v9 = vadd.f32 %v71_v2, %v70_v1  ;;  %714 = vmatprep.subr.bf16.mxu1 %v1163_v18 }
  0x99   :  { %v87_v14 = vadd.f32 %v75_v4, %v74_v3  ;;  %v122_v3 = vlaneseq }
  0x9a   :  { %85 = vadd.xlane.f32.xlu1 %v84_v0  ;;  %82 = vadd.xlane.f32.xlu0 %v81_v9  ;;  %v76_v10 = vmul.f32 %v1522_v7, %v1522_v7  ;;  %v77_v12 = vmul.f32 %v1525_v8, %v1525_v8 }
  0x9b   :  { %654 = vmatpush1.bf16.msra.mxu0 %v1165_v20  ;;  %715 = vmatpush1.bf16.msra.mxu1 %v1166_v21  ;;  %v1647_v13 = vshrl.u32 %v122_v3, 7  ;;  %v142_v20 = vld [vmem:[%s1823_s2] sm:$0x3] }
  0x9c   :  { %v90_v15 = vsel %vm46_vm0, %v76_v10, 0.0  ;;  %v91_v16 = vsel %vm46_vm0, %v77_v12, 0.0  ;;  %655 = vmatprep.subr.bf16.mxu0 %v1167_v22  ;;  %716 = vmatprep.subr.bf16.mxu1 %v1169_v23  ;;  %v270_v3 = vld [vmem:[%s1824_s4] sm:$0xf] }
  0x9d   :  { %v92_v19 = vadd.f32 %v91_v16, %v90_v15  ;;  %v1650_v17 = vsub.s32 0, %v1647_v13  ;;  %v1653_v18 = vsub.s32 1, %v1647_v13 }
  0x9e   :  { %88 = vadd.xlane.f32.xlu0 %v87_v14 }
  0x9f   :  { %93 = vadd.xlane.f32.xlu1 %v92_v19  ;;  %656 = vmatpush2.bf16.msra.mxu0 %v1171_v24  ;;  %v120_v19 = vld [vmem:[%s1822_s1] sm:$0x3]  ;;  %v147_v24 = vrot.slane %v142_v20, %v1650_v17 }
  0xa0   :  { %717 = vmatpush2.bf16.msra.mxu1 %v1172_v25  ;;  %657 = vmatprep.subr.bf16.mxu0 %v1173_v26  ;;  %v125_v21 = vrot.slane %v120_v19, %v1650_v17  ;;  %v129_v22 = vrot.slane %v120_v19, %v1653_v18  ;;  %v151_v25 = vrot.slane %v142_v20, %v1653_v18 }
  0xa1   :  { %718 = vmatprep.subr.bf16.mxu1 %v1175_v27 }
  0xa3   :  { %658 = vmatpush2.bf16.msra.mxu0 %v1177_v28 }
  0xa4   :  { %719 = vmatpush2.bf16.msra.mxu1 %v1178_v29  ;;  %659 = vmatprep.subr.bf16.mxu0 %v1179_v30 }
  0xa5   :  { %720 = vmatprep.subr.bf16.mxu1 %v1181_v31 }
  0xa7   :  { %660 = vmatpush2.bf16.msra.mxu0 %v1183_v32 }
  0xa8   :  { %721 = vmatpush2.bf16.msra.mxu1 %v1184_v33  ;;  %661 = vmatprep.subr.bf16.mxu0 %v1185_v34 }
  0xa9   :  { %722 = vmatprep.subr.bf16.mxu1 %v1187_v35 }
  0xab   :  { %662 = vmatpush2.bf16.msra.mxu0 %v1189_v36 }
  0xac   :  { %723 = vmatpush2.bf16.msra.mxu1 %v1190_v37  ;;  %663 = vmatprep.subr.bf16.mxu0 %v1191_v38 }
  0xad   :  { %724 = vmatprep.subr.bf16.mxu1 %v1193_v39 }
  0xaf   :  { %664 = vmatpush2.bf16.msra.mxu0 %v1195_v40 }
  0xb0   :  { %725 = vmatpush2.bf16.msra.mxu1 %v1196_v41  ;;  %665 = vmatprep.subr.bf16.mxu0 %v1197_v42 }
  0xb1   :  { %726 = vmatprep.subr.bf16.mxu1 %v1199_v43 }
  0xb3   :  { %666 = vmatpush2.bf16.msra.mxu0 %v1201_v44 }
  0xb4   :  { %727 = vmatpush2.bf16.msra.mxu1 %v1202_v49  ;;  %667 = vmatprep.subr.bf16.mxu0 %v1203_v50 }
  0xb5   :  { %728 = vmatprep.subr.bf16.mxu1 %v1205_v51 }
  0xb7   :  { %668 = vmatpush2.bf16.msra.mxu0 %v1207_v52 }
  0xb8   :  { %729 = vmatpush2.bf16.msra.mxu1 %v1208_v53  ;;  %669 = vmatprep.subr.bf16.mxu0 %v1209_v54 }
  0xb9   :  { %730 = vmatprep.subr.bf16.mxu1 %v1211_v55 }
  0xbb   :  { %670 = vmatpush2.bf16.msra.mxu0 %v1213_v56 }
  0xbc   :  { %731 = vmatpush2.bf16.msra.mxu1 %v1214_v59 }
 0x11f   :  { %v80_v62 = vpop.xlane.xlu1 %79 }
 0x120   :  { %v95_v63 = vmul.f32 0.00390625, %v80_v62 }
 0x122   :  { %v100_v0 = vadd.f32 1e-05, %v95_v63 }
 0x123   :  { %v86_v1 = vpop.xlane.xlu1 %85  ;;  %v83_v2 = vpop.xlane.xlu0 %82 }
 0x124   :  { %1217 = vrsqrt.f32 %v100_v0  ;;  %v97_v4 = vmul.f32 0.00390625, %v86_v1  ;;  %v96_v5 = vmul.f32 0.00390625, %v83_v2  ;;  %v282_v2 = vsub.s32 2, %v1647_v13 }
 0x126   :  { %v102_v6 = vadd.f32 1e-05, %v97_v4  ;;  %v101_v9 = vadd.f32 1e-05, %v96_v5  ;;  %v286_v4 = vsub.s32 3, %v1647_v13  ;;  %v1681_v5 = vrot.slane %v270_v3, %v1650_v17 }
 0x127   :  { %v89_v11 = vpop.xlane.xlu0 %88 }
 0x128   :  { %1219 = vrsqrt.f32 %v102_v6  ;;  %v98_v14 = vmul.f32 0.00390625, %v89_v11  ;;  %v94_v10 = vpop.xlane.xlu1 %93  ;;  %v1683_v6 = vrot.slane %v270_v3, %v282_v2  ;;  %v1688_v11 = vrot.slane %v270_v3, %v286_v4 }
 0x129   :  { %1221 = vrsqrt.f32 %v101_v9  ;;  %v99_v12 = vmul.f32 0.00390625, %v94_v10  ;;  %v1686_v9 = vrot.slane %v270_v3, %v1653_v18 }
 0x12a   :  { %v103_v15 = vadd.f32 1e-05, %v98_v14 }
 0x12b   :  { %v104_v16 = vadd.f32 1e-05, %v99_v12 }
 0x12c   :  { %1223 = vrsqrt.f32 %v103_v15 }
 0x12d   :  { %1225 = vrsqrt.f32 %v104_v16 }
 0x131   :  { %v1218_v23 = vpop.eup %1217 }
 0x132   :  { %v110_v26 = vmul.f32 %v1218_v23, %v1476_v45  ;;  %v111_v27 = vmul.f32 %v1218_v23, %v1479_v46 }
 0x134   :  { %v132_v28 = vmul.f32 %v125_v21, %v110_v26  ;;  %v133_v29 = vmul.f32 %v129_v22, %v111_v27 }
 0x135   :  { %v1220_v30 = vpop.eup %1219 }
 0x136   :  { %v1222_v31 = vpop.eup %1221  ;;  %v154_v32 = vadd.f32 %v147_v24, %v132_v28  ;;  %v155_v33 = vadd.f32 %v151_v25, %v133_v29  ;;  %v114_v34 = vmul.f32 %v1220_v30, %v1482_v47  ;;  %v115_v35 = vmul.f32 %v1220_v30, %v1485_v48 }
 0x137   :  { %v112_v36 = vmul.f32 %v1222_v31, %v1496_v57  ;;  %v113_v37 = vmul.f32 %v1222_v31, %v1499_v58 }
 0x138   :  { %v136_v38 = vmul.f32 %v125_v21, %v114_v34  ;;  %v137_v39 = vmul.f32 %v129_v22, %v115_v35 }
 0x139   :  { %v1224_v40 = vpop.eup %1223  ;;  %v134_v45 = vmul.f32 %v125_v21, %v112_v36  ;;  %v135_v41 = vmul.f32 %v129_v22, %v113_v37 }
 0x13a   :  { %v1226_v46 = vpop.eup %1225  ;;  %v158_v42 = vadd.f32 %v147_v24, %v136_v38  ;;  %v159_v43 = vadd.f32 %v151_v25, %v137_v39  ;;  %v116_v44 = vmul.f32 %v1224_v40, %v1502_v60  ;;  %v117_v49 = vmul.f32 %v1224_v40, %v1505_v61 }
 0x13b   :  { %v156_v50 = vadd.f32 %v147_v24, %v134_v45  ;;  %v157_v47 = vadd.f32 %v151_v25, %v135_v41  ;;  %v118_v48 = vmul.f32 %v1226_v46, %v1522_v7  ;;  %v119_v57 = vmul.f32 %v1226_v46, %v1525_v8 }
 0x13c   :  { %v138_v51 = vmul.f32 %v125_v21, %v116_v44  ;;  %v139_v58 = vmul.f32 %v129_v22, %v117_v49 }
 0x13d   :  { %v140_v52 = vmul.f32 %v125_v21, %v118_v48  ;;  %v141_v53 = vmul.f32 %v129_v22, %v119_v57  ;;  %v1307_v62 = vpack.c.bf16 %v156_v50, %v154_v32  ;;  %v1308_v63 = vpack.c.bf16 %v157_v47, %v155_v33 }
 0x13e   :  { %v160_v54 = vadd.f32 %v147_v24, %v138_v51  ;;  %v161_v55 = vadd.f32 %v151_v25, %v139_v58 }
 0x13f   :  { %v162_v56 = vadd.f32 %v147_v24, %v140_v52  ;;  %v163_v59 = vadd.f32 %v151_v25, %v141_v53  ;;  %671 = vmatprep.mubr.bf16.mxu0 %v1308_v63  ;;  %732 = vmatprep.mubr.bf16.mxu1 %v1308_v63 }
 0x140   :  { %672 = vmatmul.mubr.bf16.vlgmr.msra.gmra.mxu0 %v1307_v62  ;;  %733 = vmatmul.mubr.bf16.vlgmr.msra.gmra.mxu1 %v1307_v62  ;;  %v1309_v60 = vpack.c.bf16 %v161_v55, %v159_v43  ;;  %v1310_v61 = vpack.c.bf16 %v160_v54, %v158_v42 }
 0x141   :  { %v1108_v0 = vpack.c.bf16 %v163_v59, %v162_v56 }
 0x142   :  { %681 = vmatprep.mubr.bf16.mxu0 %v1309_v60  ;;  %742 = vmatprep.mubr.bf16.mxu1 %v1309_v60 }
 0x143   :  { %200 = vst [vmem:[#allocation2 + $0x18] sm:$0x11] %v1108_v0 }
 0x148   :  { %682 = vmatmul.mubr.bf16.gmra.mxu0 %v1310_v61  ;;  %743 = vmatmul.mubr.bf16.gmra.mxu1 %v1310_v61 }
 0x14a   :  { %v205_v7 = vld [vmem:[#allocation2 + $0x18] sm:$0x11] }
 0x14b   :  { %v1009_v8 = vcombine.high %v205_v7, %v205_v7  ;;  %v1008_v1 = vcombine.low %v205_v7, %v205_v7 }
 0x14d   :  { %691 = vmatprep.mubr.bf16.mxu0 %v1009_v8  ;;  %752 = vmatprep.mubr.bf16.mxu1 %v1009_v8 }
 0x150   :  { %692 = vmatmul.mubr.bf16.gmra.mxu0 %v1008_v1  ;;  %753 = vmatmul.mubr.bf16.gmra.mxu1 %v1008_v1 }
 0x200   :  { %v673_v14 = vpop.f32.mrf.mxu0  ;;  %v734_v10 = vpop.f32.mrf.mxu1 }
 0x201   :  { %v1691_v12 = vadd.f32 %v673_v14, %v1681_v5  ;;  %v1694_v15 = vadd.f32 %v734_v10, %v1683_v6 }
 0x202   :  { %v675_v16 = vpop.f32.mrf.mxu0  ;;  %v736_v13 = vpop.f32.mrf.mxu1 }
 0x203   :  { %v1074_v17 = vmul.f32 -1.702, %v1691_v12  ;;  %v1076_v19 = vmul.f32 -1.702, %v1694_v15  ;;  %v1699_v20 = vadd.f32 %v675_v16, %v1686_v9  ;;  %v1702_v18 = vadd.f32 %v736_v13, %v1688_v11 }
 0x204   :  { %v677_v21 = vpop.f32.mrf.mxu0  ;;  %v738_v22 = vpop.f32.mrf.mxu1 }
 0x205   :  { %v801_v23 = vmul.f32 1.442695, %v1074_v17  ;;  %v805_v24 = vmul.f32 1.442695, %v1076_v19  ;;  %v1075_v25 = vmul.f32 -1.702, %v1699_v20  ;;  %v1706_v26 = vadd.f32 %v677_v21, %v1681_v5 }
 0x206   :  { %v1077_v27 = vmul.f32 -1.702, %v1702_v18  ;;  %v1710_v28 = vadd.f32 %v738_v22, %v1683_v6  ;;  %v679_v29 = vpop.f32.mrf.mxu0  ;;  %v740_v30 = vpop.f32.mrf.mxu1 }
 0x207   :  { %1227 = vpow2.f32 %v801_v23  ;;  %v803_v31 = vmul.f32 1.442695, %v1075_v25  ;;  %v1078_v32 = vmul.f32 -1.702, %v1706_v26  ;;  %v1714_v33 = vadd.f32 %v679_v29, %v1686_v9 }
 0x208   :  { %1229 = vpow2.f32 %v805_v24  ;;  %v807_v34 = vmul.f32 1.442695, %v1077_v27  ;;  %v1080_v35 = vmul.f32 -1.702, %v1710_v28  ;;  %v1718_v36 = vadd.f32 %v740_v30, %v1688_v11  ;;  %v683_v37 = vpop.f32.mrf.mxu0  ;;  %v744_v38 = vpop.f32.mrf.mxu1 }
 0x209   :  { %1231 = vpow2.f32 %v803_v31  ;;  %v809_v39 = vmul.f32 1.442695, %v1078_v32  ;;  %v1079_v40 = vmul.f32 -1.702, %v1714_v33  ;;  %v1722_v45 = vadd.f32 %v683_v37, %v1681_v5 }
 0x20a   :  { %1233 = vpow2.f32 %v807_v34  ;;  %v813_v41 = vmul.f32 1.442695, %v1080_v35  ;;  %v1081_v46 = vmul.f32 -1.702, %v1718_v36  ;;  %v1726_v42 = vadd.f32 %v744_v38, %v1683_v6  ;;  %v685_v43 = vpop.f32.mrf.mxu0  ;;  %v746_v44 = vpop.f32.mrf.mxu1 }
 0x20b   :  { %1235 = vpow2.f32 %v809_v39  ;;  %v811_v49 = vmul.f32 1.442695, %v1079_v40  ;;  %v1082_v50 = vmul.f32 -1.702, %v1722_v45  ;;  %v1730_v47 = vadd.f32 %v685_v43, %v1686_v9 }
 0x20c   :  { %1237 = vpow2.f32 %v813_v41  ;;  %v815_v48 = vmul.f32 1.442695, %v1081_v46  ;;  %v1084_v57 = vmul.f32 -1.702, %v1726_v42  ;;  %v1734_v51 = vadd.f32 %v746_v44, %v1688_v11  ;;  %v687_v58 = vpop.f32.mrf.mxu0  ;;  %v748_v52 = vpop.f32.mrf.mxu1 }
 0x20d   :  { %1239 = vpow2.f32 %v811_v49  ;;  %v817_v53 = vmul.f32 1.442695, %v1082_v50  ;;  %v1083_v54 = vmul.f32 -1.702, %v1730_v47  ;;  %v1738_v55 = vadd.f32 %v687_v58, %v1681_v5 }
 0x20e   :  { %1241 = vpow2.f32 %v815_v48  ;;  %v821_v56 = vmul.f32 1.442695, %v1084_v57  ;;  %v1085_v59 = vmul.f32 -1.702, %v1734_v51  ;;  %v1742_v62 = vadd.f32 %v748_v52, %v1683_v6  ;;  %v689_v63 = vpop.f32.mrf.mxu0  ;;  %v750_v0 = vpop.f32.mrf.mxu1 }
 0x20f   :  { %1243 = vpow2.f32 %v817_v53  ;;  %v819_v60 = vmul.f32 1.442695, %v1083_v54  ;;  %v1086_v61 = vmul.f32 -1.702, %v1738_v55  ;;  %v1746_v7 = vadd.f32 %v689_v63, %v1686_v9 }
 0x210   :  { %1245 = vpow2.f32 %v821_v56  ;;  %v823_v8 = vmul.f32 1.442695, %v1085_v59  ;;  %v1088_v1 = vmul.f32 -1.702, %v1742_v62  ;;  %v1750_v2 = vadd.f32 %v750_v0, %v1688_v11  ;;  %v693_v3 = vpop.f32.mrf.mxu0  ;;  %v754_v4 = vpop.f32.mrf.mxu1 }
 0x211   :  { %1247 = vpow2.f32 %v819_v60  ;;  %v825_v14 = vmul.f32 1.442695, %v1086_v61  ;;  %v1087_v10 = vmul.f32 -1.702, %v1746_v7  ;;  %v1755_v50 = vadd.f32 %v693_v3, %v1681_v5 }
 0x212   :  { %1249 = vpow2.f32 %v823_v8  ;;  %v829_v16 = vmul.f32 1.442695, %v1088_v1  ;;  %v1089_v13 = vmul.f32 -1.702, %v1750_v2  ;;  %v695_v17 = vpop.f32.mrf.mxu0  ;;  %v756_v19 = vpop.f32.mrf.mxu1  ;;  %v1758_v58 = vadd.f32 %v754_v4, %v1683_v6 }
 0x213   :  { %1251 = vpow2.f32 %v825_v14  ;;  %v827_v21 = vmul.f32 1.442695, %v1087_v10  ;;  %v1761_v54 = vadd.f32 %v695_v17, %v1686_v9  ;;  %v1764_v63 = vadd.f32 %v756_v19, %v1688_v11 }
 0x214   :  { %v1228_v22 = vpop.eup %1227  ;;  %1253 = vpow2.f32 %v829_v16  ;;  %v831_v23 = vmul.f32 1.442695, %v1089_v13  ;;  %v697_v24 = vpop.f32.mrf.mxu0  ;;  %v1090_v60 = vmul.f32 -1.702, %v1755_v50  ;;  %v1092_v8 = vmul.f32 -1.702, %v1758_v58 }
 0x215   :  { %v758_v25 = vpop.f32.mrf.mxu1  ;;  %v1230_v27 = vpop.eup %1229  ;;  %v841_v29 = vadd.f32 1.0, %v1228_v22  ;;  %1255 = vpow2.f32 %v827_v21  ;;  %v1091_v3 = vmul.f32 -1.702, %v1761_v54  ;;  %v1093_v11 = vmul.f32 -1.702, %v1764_v63 }
 0x216   :  { %v1232_v30 = vpop.eup %1231  ;;  %v843_v31 = vadd.f32 1.0, %v1230_v27  ;;  %1257 = vpow2.f32 %v831_v23  ;;  %v698_v32 = vpop.f32.mrf.mxu0  ;;  %v833_v13 = vmul.f32 1.442695, %v1090_v60  ;;  %v837_v21 = vmul.f32 1.442695, %v1092_v8 }
 0x217   :  { %v759_v34 = vpop.f32.mrf.mxu1  ;;  %v1234_v35 = vpop.eup %1233  ;;  %1259 = vrcp.f32 %v841_v29  ;;  %v842_v37 = vadd.f32 1.0, %v1232_v30  ;;  %v835_v23 = vmul.f32 1.442695, %v1091_v3  ;;  %v839_v25 = vmul.f32 1.442695, %v1093_v11 }
 0x218   :  { %v1236_v38 = vpop.eup %1235  ;;  %1261 = vrcp.f32 %v843_v31  ;;  %v844_v39 = vadd.f32 1.0, %v1234_v35 }
 0x219   :  { %v1238_v40 = vpop.eup %1237  ;;  %1263 = vrcp.f32 %v842_v37  ;;  %v845_v41 = vadd.f32 1.0, %v1236_v38 }
 0x21a   :  { %v1240_v46 = vpop.eup %1239  ;;  %1265 = vrcp.f32 %v844_v39  ;;  %v847_v43 = vadd.f32 1.0, %v1238_v40 }
 0x21b   :  { %v1242_v44 = vpop.eup %1241  ;;  %1267 = vrcp.f32 %v845_v41  ;;  %v846_v49 = vadd.f32 1.0, %v1240_v46 }
 0x21c   :  { %v1244_v48 = vpop.eup %1243  ;;  %1269 = vrcp.f32 %v847_v43  ;;  %v848_v57 = vadd.f32 1.0, %v1242_v44 }
 0x21d   :  { %v1246_v52 = vpop.eup %1245  ;;  %1271 = vrcp.f32 %v846_v49  ;;  %v849_v53 = vadd.f32 1.0, %v1244_v48 }
 0x21e   :  { %v1248_v56 = vpop.eup %1247  ;;  %1273 = vrcp.f32 %v848_v57  ;;  %v851_v59 = vadd.f32 1.0, %v1246_v52 }
 0x21f   :  { %v1250_v5 = vpop.eup %1249  ;;  %1275 = vrcp.f32 %v849_v53  ;;  %v850_v0 = vadd.f32 1.0, %v1248_v56 }
 0x220   :  { %v1252_v61 = vpop.eup %1251  ;;  %1277 = vrcp.f32 %v851_v59  ;;  %v852_v6 = vadd.f32 1.0, %v1250_v5 }
 0x221   :  { %v1254_v1 = vpop.eup %1253  ;;  %1279 = vrcp.f32 %v850_v0  ;;  %v853_v9 = vadd.f32 1.0, %v1252_v61 }
 0x222   :  { %v1256_v4 = vpop.eup %1255  ;;  %1281 = vrcp.f32 %v852_v6  ;;  %v855_v14 = vadd.f32 1.0, %v1254_v1 }
 0x223   :  { %v1258_v10 = vpop.eup %1257  ;;  %1283 = vrcp.f32 %v853_v9  ;;  %v854_v16 = vadd.f32 1.0, %v1256_v4 }
 0x224   :  { %v1260_v17 = vpop.eup %1259  ;;  %1285 = vrcp.f32 %v855_v14  ;;  %v856_v19 = vadd.f32 1.0, %v1258_v10 }
 0x225   :  { %v1262_v22 = vpop.eup %1261  ;;  %1287 = vrcp.f32 %v854_v16  ;;  %v901_v29 = vmul.f32 %v1260_v17, %v1691_v12 }
 0x226   :  { %v1264_v24 = vpop.eup %1263  ;;  %1289 = vrcp.f32 %v856_v19  ;;  %v903_v32 = vmul.f32 %v1262_v22, %v1694_v15 }
 0x227   :  { %v1266_v27 = vpop.eup %1265  ;;  %v902_v30 = vmul.f32 %v1264_v24, %v1699_v20  ;;  %1291 = vpow2.f32 %v833_v13 }
 0x228   :  { %v1268_v31 = vpop.eup %1267  ;;  %v904_v34 = vmul.f32 %v1266_v27, %v1702_v18  ;;  %1293 = vpow2.f32 %v837_v21 }
 0x229   :  { %v1270_v35 = vpop.eup %1269  ;;  %v1109_v37 = vpack.c.bf16 %v902_v30, %v901_v29  ;;  %1295 = vpow2.f32 %v835_v23  ;;  %v905_v12 = vmul.f32 %v1268_v31, %v1706_v26 }
 0x22a   :  { %v1272_v38 = vpop.eup %1271  ;;  %v1110_v39 = vpack.c.bf16 %v904_v34, %v903_v32  ;;  %1297 = vpow2.f32 %v839_v25  ;;  %v907_v15 = vmul.f32 %v1270_v35, %v1710_v28 }
 0x22b   :  { %v1274_v40 = vpop.eup %1273  ;;  %985 = vst [vmem:[%s1825_s5] sm:$0xff] %v1109_v37  ;;  %v906_v20 = vmul.f32 %v1272_v38, %v1714_v33 }
 0x22c   :  { %v1276_v41 = vpop.eup %1275  ;;  %986 = vst [vmem:[%s1825_s5 + $0x8] sm:$0xff] %v1110_v39  ;;  %v908_v18 = vmul.f32 %v1274_v40, %v1718_v36 }
 0x22d   :  { %v1278_v46 = vpop.eup %1277  ;;  %v1111_v43 = vpack.c.bf16 %v906_v20, %v905_v12  ;;  %v909_v26 = vmul.f32 %v1276_v41, %v1722_v45 }
 0x22e   :  { %v1280_v44 = vpop.eup %1279  ;;  %v1112_v49 = vpack.c.bf16 %v908_v18, %v907_v15  ;;  %v911_v28 = vmul.f32 %v1278_v46, %v1726_v42 }
 0x22f   :  { %v1282_v48 = vpop.eup %1281  ;;  %987 = vst [vmem:[%s1825_s5 + $0x10] sm:$0xff] %v1111_v43  ;;  %v910_v33 = vmul.f32 %v1280_v44, %v1730_v47 }
 0x230   :  { %v1284_v57 = vpop.eup %1283  ;;  %988 = vst [vmem:[%s1825_s5 + $0x18] sm:$0xff] %v1112_v49  ;;  %v912_v36 = vmul.f32 %v1282_v48, %v1734_v51 }
 0x231   :  { %v1286_v52 = vpop.eup %1285  ;;  %v1113_v53 = vpack.c.bf16 %v910_v33, %v909_v26  ;;  %v913_v45 = vmul.f32 %v1284_v57, %v1738_v55 }
 0x232   :  { %v1288_v56 = vpop.eup %1287  ;;  %v1114_v59 = vpack.c.bf16 %v912_v36, %v911_v28  ;;  %v915_v42 = vmul.f32 %v1286_v52, %v1742_v62 }
 0x233   :  { %v1290_v5 = vpop.eup %1289  ;;  %989 = vst [vmem:[%s1825_s5 + $0x20] sm:$0xff] %v1113_v53  ;;  %v914_v47 = vmul.f32 %v1288_v56, %v1746_v7 }
 0x234   :  { %v1292_v0 = vpop.eup %1291  ;;  %990 = vst [vmem:[%s1825_s5 + $0x28] sm:$0xff] %v1114_v59  ;;  %v916_v51 = vmul.f32 %v1290_v5, %v1750_v2 }
 0x235   :  { %v1294_v60 = vpop.eup %1293  ;;  %v1115_v61 = vpack.c.bf16 %v914_v47, %v913_v45  ;;  %v857_v6 = vadd.f32 1.0, %v1292_v0 }
 0x236   :  { %v1296_v8 = vpop.eup %1295  ;;  %v1116_v1 = vpack.c.bf16 %v916_v51, %v915_v42  ;;  %v859_v9 = vadd.f32 1.0, %v1294_v60 }
 0x237   :  { %v1298_v3 = vpop.eup %1297  ;;  %991 = vst [vmem:[%s1825_s5 + $0x30] sm:$0xff] %v1115_v61  ;;  %1299 = vrcp.f32 %v857_v6  ;;  %v858_v55 = vadd.f32 1.0, %v1296_v8 }
 0x238   :  { %992 = vst [vmem:[%s1825_s5 + $0x38] sm:$0xff] %v1116_v1  ;;  %1301 = vrcp.f32 %v859_v9  ;;  %v860_v62 = vadd.f32 1.0, %v1298_v3 }
 0x239   :  { %1303 = vrcp.f32 %v858_v55 }
 0x23a   :  { %1305 = vrcp.f32 %v860_v62 }
 0x244   :  { %v1300_v7 = vpop.eup %1299 }
 0x245   :  { %v1302_v2 = vpop.eup %1301  ;;  %v917_v11 = vmul.f32 %v1300_v7, %v1755_v50 }
 0x246   :  { %v1304_v4 = vpop.eup %1303  ;;  %v919_v16 = vmul.f32 %v1302_v2, %v1758_v58 }
 0x247   :  { %v1306_v14 = vpop.eup %1305  ;;  %v918_v10 = vmul.f32 %v1304_v4, %v1761_v54 }
 0x248   :  { %v920_v13 = vmul.f32 %v1306_v14, %v1764_v63 }
 0x249   :  { %v1117_v17 = vpack.c.bf16 %v918_v10, %v917_v11 }
 0x24a   :  { %v1118_v19 = vpack.c.bf16 %v920_v13, %v919_v16 }
 0x24b   :  { %993 = vst [vmem:[%s1825_s5 + $0x40] sm:$0x11] %v1117_v17 }
 0x24c   :  { %994 = vst [vmem:[%s1825_s5 + $0x48] sm:$0x11] %v1118_v19 }

// kernel: clip_vision_tower_forward.18
= control target key start
LH: loop header
LB: loop body
LE: loop exit
PB: predicated region body
PF: predicated region fallthrough
CT: control target
= control target key end

     0   :  { %s1214_s1 = inlined_call_operand.vmem [shape: bf16[512,256], index: 1, kind: input, shape index: {}]   ;;  %s1215_s0 = inlined_call_operand.vmem [shape: bf16[34,512], index: 0, kind: input, shape index: {}]   ;;  %s1216_s2 = inlined_call_operand.vmem [shape: f32[1,256], index: 2, kind: input, shape index: {}]   ;;  %s1217_s3 = inlined_call_operand.vmem [shape: f32[34,256], index: 3, kind: input, shape index: {}]   ;;  %s1218_s4 = inlined_call_operand.vmem [shape: f32[34,256], index: 4, kind: output, shape index: {}]  }
   0x1   :  { %v777_v0 = vld [vmem:[%s1214_s1 + $0x74] ss:$8 sps:$4 sm:$0xff]   ;;  %v781_v2 = vld [vmem:[%s1214_s1 + $0x70] ss:$8 sps:$4 sm:$0xff]   ;;  %v783_v4 = vld [vmem:[%s1214_s1 + $0x64] ss:$8 sps:$4 sm:$0xff]  }
   0x2   :  { %v779_v1 = vld [vmem:[%s1214_s1 + $0x174] ss:$8 sps:$4 sm:$0xff]   ;;  %489 = vmatprep.subr.bf16.mxu0 %v777_v0  ;;  %v782_v3 = vld [vmem:[%s1214_s1 + $0x170] ss:$8 sps:$4 sm:$0xff]   ;;  %v785_v5 = vld [vmem:[%s1214_s1 + $0x164] ss:$8 sps:$4 sm:$0xff]  }
   0x3   :  { %550 = vmatprep.subr.bf16.mxu1 %v779_v1  ;;  %490 = vmatpush1.bf16.msra.mxu0 %v781_v2  ;;  %v787_v6 = vld [vmem:[%s1214_s1 + $0x60] ss:$8 sps:$4 sm:$0xff]   ;;  %v789_v8 = vld [vmem:[%s1214_s1 + $0x54] ss:$8 sps:$4 sm:$0xff]   ;;  %v793_v10 = vld [vmem:[%s1214_s1 + $0x50] ss:$8 sps:$4 sm:$0xff]  }
   0x4   :  { %551 = vmatpush1.bf16.msra.mxu1 %v782_v3  ;;  %491 = vmatprep.subr.bf16.mxu0 %v783_v4  ;;  %v788_v7 = vld [vmem:[%s1214_s1 + $0x160] ss:$8 sps:$4 sm:$0xff]   ;;  %v791_v9 = vld [vmem:[%s1214_s1 + $0x154] ss:$8 sps:$4 sm:$0xff]   ;;  %v794_v11 = vld [vmem:[%s1214_s1 + $0x150] ss:$8 sps:$4 sm:$0xff]  }
   0x5   :  { %552 = vmatprep.subr.bf16.mxu1 %v785_v5  ;;  %v795_v12 = vld [vmem:[%s1214_s1 + $0x44] ss:$8 sps:$4 sm:$0xff]   ;;  %v799_v14 = vld [vmem:[%s1214_s1 + $0x40] ss:$8 sps:$4 sm:$0xff]   ;;  %v801_v16 = vld [vmem:[%s1214_s1 + $0x34] ss:$8 sps:$4 sm:$0xff]  }
   0x6   :  { %v797_v13 = vld [vmem:[%s1214_s1 + $0x144] ss:$8 sps:$4 sm:$0xff]   ;;  %v800_v15 = vld [vmem:[%s1214_s1 + $0x140] ss:$8 sps:$4 sm:$0xff]   ;;  %v803_v17 = vld [vmem:[%s1214_s1 + $0x134] ss:$8 sps:$4 sm:$0xff]  }
   0x7   :  { %492 = vmatpush1.bf16.msra.mxu0 %v787_v6  ;;  %v805_v18 = vld [vmem:[%s1214_s1 + $0x30] ss:$8 sps:$4 sm:$0xff]   ;;  %v807_v20 = vld [vmem:[%s1214_s1 + $0x24] ss:$8 sps:$4 sm:$0xff]   ;;  %v811_v22 = vld [vmem:[%s1214_s1 + $0x20] ss:$8 sps:$4 sm:$0xff]  }
   0x8   :  { %553 = vmatpush1.bf16.msra.mxu1 %v788_v7  ;;  %493 = vmatprep.subr.bf16.mxu0 %v789_v8  ;;  %v806_v19 = vld [vmem:[%s1214_s1 + $0x130] ss:$8 sps:$4 sm:$0xff]   ;;  %v809_v21 = vld [vmem:[%s1214_s1 + $0x124] ss:$8 sps:$4 sm:$0xff]   ;;  %v812_v23 = vld [vmem:[%s1214_s1 + $0x120] ss:$8 sps:$4 sm:$0xff]  }
   0x9   :  { %554 = vmatprep.subr.bf16.mxu1 %v791_v9  ;;  %v813_v24 = vld [vmem:[%s1214_s1 + $0x14] ss:$8 sps:$4 sm:$0xff]   ;;  %v817_v26 = vld [vmem:[%s1214_s1 + $0x10] ss:$8 sps:$4 sm:$0xff]   ;;  %v819_v28 = vld [vmem:[%s1214_s1 + $0x4] ss:$8 sps:$4 sm:$0xff]  }
   0xa   :  { %v815_v25 = vld [vmem:[%s1214_s1 + $0x114] ss:$8 sps:$4 sm:$0xff]   ;;  %v818_v27 = vld [vmem:[%s1214_s1 + $0x110] ss:$8 sps:$4 sm:$0xff]   ;;  %v821_v29 = vld [vmem:[%s1214_s1 + $0x104] ss:$8 sps:$4 sm:$0xff]  }
   0xb   :  { %494 = vmatpush1.bf16.msra.mxu0 %v793_v10  ;;  %v823_v30 = vld [vmem:[%s1214_s1] ss:$8 sps:$4 sm:$0xff]   ;;  %v825_v32 = vld [vmem:[%s1214_s1 + $0xf4] ss:$8 sps:$4 sm:$0xff]   ;;  %v829_v34 = vld [vmem:[%s1214_s1 + $0xf0] ss:$8 sps:$4 sm:$0xff]  }
   0xc   :  { %555 = vmatpush1.bf16.msra.mxu1 %v794_v11  ;;  %495 = vmatprep.subr.bf16.mxu0 %v795_v12  ;;  %v824_v31 = vld [vmem:[%s1214_s1 + $0x100] ss:$8 sps:$4 sm:$0xff]   ;;  %v827_v33 = vld [vmem:[%s1214_s1 + $0x1f4] ss:$8 sps:$4 sm:$0xff]   ;;  %v830_v35 = vld [vmem:[%s1214_s1 + $0x1f0] ss:$8 sps:$4 sm:$0xff]  }
   0xd   :  { %556 = vmatprep.subr.bf16.mxu1 %v797_v13  ;;  %v831_v36 = vld [vmem:[%s1214_s1 + $0xe4] ss:$8 sps:$4 sm:$0xff]   ;;  %v835_v38 = vld [vmem:[%s1214_s1 + $0xe0] ss:$8 sps:$4 sm:$0xff]   ;;  %v837_v40 = vld [vmem:[%s1214_s1 + $0xd4] ss:$8 sps:$4 sm:$0xff]  }
   0xe   :  { %v833_v37 = vld [vmem:[%s1214_s1 + $0x1e4] ss:$8 sps:$4 sm:$0xff]   ;;  %v836_v39 = vld [vmem:[%s1214_s1 + $0x1e0] ss:$8 sps:$4 sm:$0xff]   ;;  %v839_v41 = vld [vmem:[%s1214_s1 + $0x1d4] ss:$8 sps:$4 sm:$0xff]  }
   0xf   :  { %496 = vmatpush1.bf16.msra.mxu0 %v799_v14  ;;  %v841_v42 = vld [vmem:[%s1214_s1 + $0xd0] ss:$8 sps:$4 sm:$0xff]   ;;  %v843_v44 = vld [vmem:[%s1214_s1 + $0xc4] ss:$8 sps:$4 sm:$0xff]   ;;  %v847_v46 = vld [vmem:[%s1214_s1 + $0xc0] ss:$8 sps:$4 sm:$0xff]  }
  0x10   :  { %557 = vmatpush1.bf16.msra.mxu1 %v800_v15  ;;  %497 = vmatprep.subr.bf16.mxu0 %v801_v16  ;;  %v842_v43 = vld [vmem:[%s1214_s1 + $0x1d0] ss:$8 sps:$4 sm:$0xff]   ;;  %v845_v45 = vld [vmem:[%s1214_s1 + $0x1c4] ss:$8 sps:$4 sm:$0xff]   ;;  %v848_v47 = vld [vmem:[%s1214_s1 + $0x1c0] ss:$8 sps:$4 sm:$0xff]   ;;  %v646_v15 = vlaneseq }
  0x11   :  { %558 = vmatprep.subr.bf16.mxu1 %v803_v17  ;;  %v849_v48 = vld [vmem:[%s1214_s1 + $0xb4] ss:$8 sps:$4 sm:$0xff]   ;;  %v853_v52 = vld [vmem:[%s1214_s1 + $0xb0] ss:$8 sps:$4 sm:$0xff]   ;;  %v855_v54 = vld [vmem:[%s1214_s1 + $0xa4] ss:$8 sps:$4 sm:$0xff]  }
  0x12   :  { %v875_v49 = vld [vmem:[%s1215_s0 + $0x4] ss:$16 sps:$4 sm:$0xff]   ;;  %v878_v51 = vld [vmem:[%s1215_s0 + $0xc] ss:$16 sps:$4 sm:$0xff]   ;;  %v854_v53 = vld [vmem:[%s1214_s1 + $0x1b0] ss:$8 sps:$4 sm:$0xff]  }
  0x13   :  { %498 = vmatpush1.bf16.msra.mxu0 %v805_v18  ;;  %v851_v50 = vld [vmem:[%s1214_s1 + $0x1b4] ss:$8 sps:$4 sm:$0xff]   ;;  %521 = vmatprep.mubr.bf16.mxu0 %v875_v49  ;;  %v857_v55 = vld [vmem:[%s1214_s1 + $0x1a4] ss:$8 sps:$4 sm:$0xff]   ;;  %v859_v56 = vld [vmem:[%s1214_s1 + $0xa0] ss:$8 sps:$4 sm:$0xff]  }
  0x14   :  { %559 = vmatpush1.bf16.msra.mxu1 %v806_v19  ;;  %499 = vmatprep.subr.bf16.mxu0 %v807_v20  ;;  %v860_v57 = vld [vmem:[%s1214_s1 + $0x1a0] ss:$8 sps:$4 sm:$0xff]   ;;  %v861_v58 = vld [vmem:[%s1214_s1 + $0x94] ss:$8 sps:$4 sm:$0xff]   ;;  %v865_v60 = vld [vmem:[%s1214_s1 + $0x90] ss:$8 sps:$4 sm:$0xff]  }
  0x15   :  { %560 = vmatprep.subr.bf16.mxu1 %v809_v21  ;;  %582 = vmatprep.mubr.bf16.mxu1 %v878_v51  ;;  %v863_v59 = vld [vmem:[%s1214_s1 + $0x194] ss:$8 sps:$4 sm:$0xff]   ;;  %v866_v61 = vld [vmem:[%s1214_s1 + $0x190] ss:$8 sps:$4 sm:$0xff]   ;;  %v867_v62 = vld [vmem:[%s1214_s1 + $0x84] ss:$8 sps:$4 sm:$0xff]  }
  0x16   :  { %v869_v63 = vld [vmem:[%s1214_s1 + $0x184] ss:$8 sps:$4 sm:$0xff]   ;;  %v871_v0 = vld [vmem:[%s1214_s1 + $0x80] ss:$8 sps:$4 sm:$0xff]   ;;  %v889_v14 = vmov 0.0   ;;  %v647_v16 = vshrl.u32 %v646_v15, 7 }
  0x17   :  { %500 = vmatpush1.bf16.msra.mxu0 %v811_v22  ;;  %v872_v1 = vld [vmem:[%s1214_s1 + $0x180] ss:$8 sps:$4 sm:$0xff]   ;;  %v879_v4 = vld [vmem:[%s1215_s0 + $0x24] ss:$16 sps:$4 sm:$0xff]   ;;  %v881_v5 = vld [vmem:[%s1215_s0 + $0x2c] ss:$16 sps:$4 sm:$0xff]  }
  0x18   :  { %561 = vmatpush1.bf16.msra.mxu1 %v812_v23  ;;  %501 = vmatprep.subr.bf16.mxu0 %v813_v24  ;;  %v873_v2 = vld [vmem:[%s1215_s0] ss:$16 sps:$4 sm:$0xff]   ;;  %v876_v3 = vld [vmem:[%s1215_s0 + $0x8] ss:$16 sps:$4 sm:$0xff]   ;;  %29 = vst [vmem:[#allocation2 + $0x40] sm:$0x3] %v889_v14 }
  0x19   :  { %562 = vmatprep.subr.bf16.mxu1 %v815_v25  ;;  %v49_v6 = vld [vmem:[%s1215_s0 + $0x40] sm:$0x11]  ;;  %v50_v7 = vld [vmem:[%s1215_s0 + $0x48] sm:$0x11]  ;;  %30 = vst [vmem:[#allocation2 + $0x38] sm:$0x3] %v889_v14 }
  0x1a   :  { %v883_v8 = vld [vmem:[%s1215_s0 + $0x20] ss:$16 sps:$4 sm:$0xff]   ;;  %v884_v9 = vld [vmem:[%s1215_s0 + $0x28] ss:$16 sps:$4 sm:$0xff]   ;;  %v709_v10 = vcombine.high %v49_v6, %v49_v6  ;;  %v711_v11 = vcombine.high %v50_v7, %v50_v7  ;;  %v708_v12 = vcombine.low %v49_v6, %v49_v6  ;;  %v710_v13 = vcombine.low %v50_v7, %v50_v7 }
  0x1b   :  { %502 = vmatpush1.bf16.msra.mxu0 %v817_v26  ;;  %v648_v17 = vsub.s32 0, %v647_v16  ;;  %v644_v18 = vld [vmem:[%s1216_s2] sm:$0x3]  ;;  %v652_v19 = vsub.s32 1, %v647_v16  ;;  %v673_v6 = vld [vmem:[%s1217_s3 + $0x38] sm:$0xff] }
  0x1c   :  { %563 = vmatpush1.bf16.msra.mxu1 %v818_v27  ;;  %503 = vmatprep.subr.bf16.mxu0 %v819_v28  ;;  %v666_v28 = vld [vmem:[%s1217_s3] sm:$0xff] }
  0x1d   :  { %564 = vmatprep.subr.bf16.mxu1 %v821_v29  ;;  %v1140_v23 = vrot.slane %v644_v18, %v648_v17  ;;  %v1142_v27 = vrot.slane %v644_v18, %v652_v19  ;;  %v670_v51 = vld [vmem:[%s1217_s3 + $0x20] sm:$0xff] }
  0x1f   :  { %504 = vmatpush1.bf16.msra.mxu0 %v823_v30 }
  0x20   :  { %565 = vmatpush1.bf16.msra.mxu1 %v824_v31  ;;  %505 = vmatprep.subr.bf16.mxu0 %v825_v32 }
  0x21   :  { %566 = vmatprep.subr.bf16.mxu1 %v827_v33  ;;  %v667_v33 = vld [vmem:[%s1217_s3 + $0x8] sm:$0xff] }
  0x23   :  { %506 = vmatpush2.bf16.msra.mxu0 %v829_v34 }
  0x24   :  { %567 = vmatpush2.bf16.msra.mxu1 %v830_v35  ;;  %507 = vmatprep.subr.bf16.mxu0 %v831_v36 }
  0x25   :  { %568 = vmatprep.subr.bf16.mxu1 %v833_v37 }
  0x27   :  { %508 = vmatpush2.bf16.msra.mxu0 %v835_v38 }
  0x28   :  { %569 = vmatpush2.bf16.msra.mxu1 %v836_v39  ;;  %509 = vmatprep.subr.bf16.mxu0 %v837_v40  ;;  %v668_v39 = vld [vmem:[%s1217_s3 + $0x10] sm:$0xff] }
  0x29   :  { %570 = vmatprep.subr.bf16.mxu1 %v839_v41 }
  0x2b   :  { %510 = vmatpush2.bf16.msra.mxu0 %v841_v42 }
  0x2c   :  { %571 = vmatpush2.bf16.msra.mxu1 %v842_v43  ;;  %511 = vmatprep.subr.bf16.mxu0 %v843_v44 }
  0x2d   :  { %572 = vmatprep.subr.bf16.mxu1 %v845_v45  ;;  %v669_v45 = vld [vmem:[%s1217_s3 + $0x18] sm:$0xff] }
  0x2f   :  { %512 = vmatpush2.bf16.msra.mxu0 %v847_v46 }
  0x30   :  { %573 = vmatpush2.bf16.msra.mxu1 %v848_v47  ;;  %513 = vmatprep.subr.bf16.mxu0 %v849_v48 }
  0x31   :  { %574 = vmatprep.subr.bf16.mxu1 %v851_v50 }
  0x33   :  { %514 = vmatpush2.bf16.msra.mxu0 %v853_v52 }
  0x34   :  { %575 = vmatpush2.bf16.msra.mxu1 %v854_v53  ;;  %515 = vmatprep.subr.bf16.mxu0 %v855_v54 }
  0x35   :  { %576 = vmatprep.subr.bf16.mxu1 %v857_v55 }
  0x37   :  { %516 = vmatpush2.bf16.msra.mxu0 %v859_v56 }
  0x38   :  { %577 = vmatpush2.bf16.msra.mxu1 %v860_v57  ;;  %517 = vmatprep.subr.bf16.mxu0 %v861_v58  ;;  %v671_v57 = vld [vmem:[%s1217_s3 + $0x28] sm:$0xff] }
  0x39   :  { %578 = vmatprep.subr.bf16.mxu1 %v863_v59 }
  0x3b   :  { %518 = vmatpush2.bf16.msra.mxu0 %v865_v60 }
  0x3c   :  { %579 = vmatpush2.bf16.msra.mxu1 %v866_v61  ;;  %519 = vmatprep.subr.bf16.mxu0 %v867_v62 }
  0x3d   :  { %580 = vmatprep.subr.bf16.mxu1 %v869_v63  ;;  %v672_v63 = vld [vmem:[%s1217_s3 + $0x30] sm:$0xff] }
  0x3f   :  { %520 = vmatpush2.bf16.msra.mxu0 %v871_v0 }
  0x40   :  { %581 = vmatpush2.bf16.msra.mxu1 %v872_v1  ;;  %v39_v1 = vld [vmem:[#allocation2 + $0x40] sm:$0x3] }
  0x42   :  { %522 = vmatmul.mubr.bf16.vlgmr.msra.gmra.mxu0 %v873_v2 }
  0x43   :  { %583 = vmatmul.mubr.bf16.vlgmr.msra.gmra.mxu1 %v876_v3  ;;  %531 = vmatprep.mubr.bf16.mxu0 %v879_v4 }
  0x44   :  { %592 = vmatprep.mubr.bf16.mxu1 %v881_v5 }
  0x4a   :  { %532 = vmatmul.mubr.bf16.gmra.mxu0 %v883_v8  ;;  %v40_v8 = vld [vmem:[#allocation2 + $0x38] sm:$0x3] }
  0x4b   :  { %593 = vmatmul.mubr.bf16.gmra.mxu1 %v884_v9  ;;  %541 = vmatprep.mubr.bf16.mxu0 %v709_v10 }
  0x4c   :  { %602 = vmatprep.mubr.bf16.mxu1 %v711_v11 }
  0x52   :  { %542 = vmatmul.mubr.bf16.gmra.mxu0 %v708_v12 }
  0x53   :  { %603 = vmatmul.mubr.bf16.gmra.mxu1 %v710_v13 }
 0x102   :  { %v523_v20 = vpop.f32.mrf.mxu0 }
 0x103   :  { %v584_v21 = vpop.f32.mrf.mxu1 }
 0x104   :  { %v585_v22 = vadd.f32 %v584_v21, %v523_v20  ;;  %v525_v24 = vpop.f32.mrf.mxu0  ;;  %v674_v21 = vld [vmem:[%s1217_s3 + $0x40] sm:$0x3] }
 0x105   :  { %v586_v25 = vpop.f32.mrf.mxu1 }
 0x106   :  { %v587_v26 = vadd.f32 %v586_v25, %v525_v24  ;;  %v527_v29 = vpop.f32.mrf.mxu0  ;;  %v656_v31 = vadd.f32 %v1140_v23, %v585_v22  ;;  %v675_v25 = vld [vmem:[%s1217_s3 + $0x48] sm:$0x3] }
 0x107   :  { %v588_v30 = vpop.f32.mrf.mxu1 }
 0x108   :  { %v589_v32 = vadd.f32 %v588_v30, %v527_v29  ;;  %v529_v34 = vpop.f32.mrf.mxu0  ;;  %v676_v36 = vadd.f32 %v666_v28, %v656_v31  ;;  %v657_v37 = vadd.f32 %v1142_v27, %v587_v26 }
 0x109   :  { %v590_v35 = vpop.f32.mrf.mxu1 }
 0x10a   :  { %v591_v38 = vadd.f32 %v590_v35, %v529_v34  ;;  %v533_v40 = vpop.f32.mrf.mxu0  ;;  %686 = vst [vmem:[%s1218_s4] sm:$0xff] %v676_v36  ;;  %v677_v42 = vadd.f32 %v667_v33, %v657_v37  ;;  %v658_v43 = vadd.f32 %v1140_v23, %v589_v32 }
 0x10b   :  { %v594_v41 = vpop.f32.mrf.mxu1 }
 0x10c   :  { %v595_v44 = vadd.f32 %v594_v41, %v533_v40  ;;  %v535_v46 = vpop.f32.mrf.mxu0  ;;  %687 = vst [vmem:[%s1218_s4 + $0x8] sm:$0xff] %v677_v42  ;;  %v678_v48 = vadd.f32 %v668_v39, %v658_v43  ;;  %v659_v49 = vadd.f32 %v1142_v27, %v591_v38 }
 0x10d   :  { %v596_v47 = vpop.f32.mrf.mxu1 }
 0x10e   :  { %v597_v50 = vadd.f32 %v596_v47, %v535_v46  ;;  %v537_v52 = vpop.f32.mrf.mxu0  ;;  %688 = vst [vmem:[%s1218_s4 + $0x10] sm:$0xff] %v678_v48  ;;  %v679_v54 = vadd.f32 %v669_v45, %v659_v49  ;;  %v660_v55 = vadd.f32 %v1140_v23, %v595_v44 }
 0x10f   :  { %v598_v53 = vpop.f32.mrf.mxu1 }
 0x110   :  { %v599_v56 = vadd.f32 %v598_v53, %v537_v52  ;;  %v539_v58 = vpop.f32.mrf.mxu0  ;;  %689 = vst [vmem:[%s1218_s4 + $0x18] sm:$0xff] %v679_v54  ;;  %v680_v60 = vadd.f32 %v670_v51, %v660_v55  ;;  %v661_v61 = vadd.f32 %v1142_v27, %v597_v50 }
 0x111   :  { %v600_v59 = vpop.f32.mrf.mxu1 }
 0x112   :  { %v601_v62 = vadd.f32 %v600_v59, %v539_v58  ;;  %v543_v0 = vpop.f32.mrf.mxu0  ;;  %690 = vst [vmem:[%s1218_s4 + $0x20] sm:$0xff] %v680_v60  ;;  %v681_v3 = vadd.f32 %v671_v57, %v661_v61  ;;  %v662_v4 = vadd.f32 %v1140_v23, %v599_v56 }
 0x113   :  { %v604_v2 = vpop.f32.mrf.mxu1 }
 0x114   :  { %v605_v5 = vadd.f32 %v604_v2, %v543_v0  ;;  %v545_v7 = vpop.f32.mrf.mxu0  ;;  %691 = vst [vmem:[%s1218_s4 + $0x28] sm:$0xff] %v681_v3  ;;  %v682_v10 = vadd.f32 %v672_v63, %v662_v4  ;;  %v663_v11 = vadd.f32 %v1142_v27, %v601_v62 }
 0x115   :  { %v606_v9 = vpop.f32.mrf.mxu1 }
 0x116   :  { %v619_v12 = vadd.f32 %v605_v5, %v39_v1  ;;  %v607_v13 = vadd.f32 %v606_v9, %v545_v7  ;;  %v547_v14 = vpop.f32.mrf.mxu0  ;;  %692 = vst [vmem:[%s1218_s4 + $0x30] sm:$0xff] %v682_v10  ;;  %v683_v16 = vadd.f32 %v673_v6, %v663_v11 }
 0x117   :  { %v608_v15 = vpop.f32.mrf.mxu1 }
 0x118   :  { %629 = vst [vmem:[#allocation2 + $0x40] sm:$0x3] %v619_v12  ;;  %v620_v17 = vadd.f32 %v607_v13, %v40_v8  ;;  %v548_v18 = vpop.f32.mrf.mxu0  ;;  %693 = vst [vmem:[%s1218_s4 + $0x38] sm:$0xff] %v683_v16 }
 0x119   :  { %v609_v19 = vpop.f32.mrf.mxu1 }
 0x11a   :  { %630 = vst [vmem:[#allocation2 + $0x38] sm:$0x3] %v620_v17 }
 0x11f   :  { %v642_v20 = vld [vmem:[#allocation2 + $0x40] sm:$0x3] }
 0x120   :  { %v664_v22 = vadd.f32 %v1140_v23, %v642_v20 }
 0x121   :  { %v643_v24 = vld [vmem:[#allocation2 + $0x38] sm:$0x3] }
 0x122   :  { %v684_v26 = vadd.f32 %v674_v21, %v664_v22  ;;  %v665_v28 = vadd.f32 %v1142_v27, %v643_v24 }
 0x124   :  { %694 = vst [vmem:[%s1218_s4 + $0x40] sm:$0x3] %v684_v26  ;;  %v685_v29 = vadd.f32 %v675_v25, %v665_v28 }
 0x126   :  { %695 = vst [vmem:[%s1218_s4 + $0x48] sm:$0x3] %v685_v29 }

</bundles_post_ra>
